<compile_context>
chip_gen: v5e
topology: v5e:2x2
jax: 0.10.0
libtpu: 0.0.40
codegen_flags: <defaults>
</compile_context>

<pallas_src>
import functools

import jax
import jax.numpy as jnp
from jax.experimental import pallas as pl
from jax.experimental.pallas import tpu as pltpu

DIM = 32        # args.dim
N_VARS = 8
N_LITS = 2 * N_VARS
N_CLAUSES = 12
N_ROUNDS = 4    # args.n_rounds
BATCH = 4       # independent SAT instances (grid axis)

# ------------- packed-parameter layout (shared by host packer and kernel) -------------
# (dim, dim) weight stack
LM_W1, LM_W2, CM_W1, CM_W2, VV_W1A, VV_W1B, VV_W2 = range(7)
N_M32 = 7
# (dim, 4*dim) gate-packed weight stack (lanes = gates i|f|g|o, dim each)
LM_W3C, CM_W3L, L_WIHB, C_WHH, L_WHH, VV_W3P = range(6)
N_M128 = 6
# (1, dim) bias / init rows
L_INIT, C_INIT, LM_B1, LM_B2, CM_B1, CM_B2, VV_B1, VV_B2 = range(8)
N_V32 = 8
# (1, 4*dim) bias rows
C_GB, LM_B3C, L_GB, CM_B3L, VV_B3P = range(5)
N_V128 = 5


# ----------------------------------- Pallas kernel -----------------------------------

def gms_kernel(a_ref, at_ref, m32_ref, m128_ref, v32_ref, v128_ref, out_ref,
               *, n_vars, n_rounds, dim):
    f32 = jnp.float32
    n_lits = 2 * n_vars
    A = a_ref[0]                     # (n_lits, nc_pad)
    AT = at_ref[0]                   # (nc_pad, n_lits), host-transposed
    nc = A.shape[1]

    V32 = v32_ref[...]               # (N_V32, dim)    -- small bias rows, hoisted
    V128 = v128_ref[...]             # (N_V128, 4*dim)

    def b32(k):
        return V32[k:k + 1, :]

    def b128(k):
        return V128[k:k + 1, :]

    def dot(x, w):
        return jnp.dot(x, w, preferred_element_type=jnp.float32)

    # Degree vectors for the folded message-MLP output bias (computed once).
    deg_c = jnp.sum(AT, axis=1, keepdims=True)            # (nc, 1)      = A^T @ 1
    deg_l = jnp.sum(A, axis=1, keepdims=True)              # (n_lits, 1)  = A @ 1
    c_gate_const = b128(C_GB) + deg_c * b128(LM_B3C)        # (nc, 4*dim)
    l_gate_const = b128(L_GB) + deg_l * b128(CM_B3L)        # (n_lits, 4*dim)

    def lstm_gates(gates, c):
        # gates: (rows, 4*dim), lane blocks = i | f | g | o
        i = jax.nn.sigmoid(gates[:, 0 * dim:1 * dim])
        f = jax.nn.sigmoid(gates[:, 1 * dim:2 * dim])
        g = jnp.tanh(gates[:, 2 * dim:3 * dim])
        o = jax.nn.sigmoid(gates[:, 3 * dim:4 * dim])
        c_new = f * c + i * g
        return o * jnp.tanh(c_new), c_new

    L_h = jnp.broadcast_to(b32(L_INIT), (n_lits, dim))
    L_c = jnp.zeros((n_lits, dim), f32)
    C_h = jnp.broadcast_to(b32(C_INIT), (nc, dim))
    C_c = jnp.zeros((nc, dim), f32)

    for _ in range(n_rounds):
        # literal -> clause messages (L_msg layer 3 folded into C_update W_ih)
        h = jnp.maximum(dot(L_h, m32_ref[LM_W1]) + b32(LM_B1), 0.0)
        h = jnp.maximum(dot(h, m32_ref[LM_W2]) + b32(LM_B2), 0.0)
        Lm = dot(h, m128_ref[LM_W3C])                               # (n_lits, 4*dim)
        c_gates = dot(AT, Lm) + dot(C_h, m128_ref[C_WHH]) + c_gate_const
        C_h, C_c = lstm_gates(c_gates, C_c)

        # clause -> literal messages (C_msg layer 3 folded into L_update W_ih, CL half)
        h = jnp.maximum(dot(C_h, m32_ref[CM_W1]) + b32(CM_B1), 0.0)
        h = jnp.maximum(dot(h, m32_ref[CM_W2]) + b32(CM_B2), 0.0)
        Cm = dot(h, m128_ref[CM_W3L])                               # (nc, 4*dim)
        L_flip = pltpu.roll(L_h, n_vars, 0)     # flip(L) == rotate rows by n_vars
        l_gates = (dot(A, Cm)
                   + dot(L_flip, m128_ref[L_WIHB])
                   + dot(L_h, m128_ref[L_WHH])
                   + l_gate_const)
        L_h, L_c = lstm_gates(l_gates, L_c)

    # var_vote(cat([L[:n_vars], L[n_vars:]], dim=1)) with a split first layer.
    pos = L_h[:n_vars, :]
    neg = L_h[n_vars:, :]
    h1 = jnp.maximum(dot(pos, m32_ref[VV_W1A]) + dot(neg, m32_ref[VV_W1B])
                     + b32(VV_B1), 0.0)
    h2 = jnp.maximum(dot(h1, m32_ref[VV_W2]) + b32(VV_B2), 0.0)
    vote = dot(h2, m128_ref[VV_W3P]) + b128(VV_B3P)   # (n_vars, 4*dim), lane 0 real
    nv_pad = out_ref.shape[1]
    if nv_pad != n_vars:   # static; not traced for the demo shapes
        vote = jnp.concatenate(
            [vote, jnp.zeros((nv_pad - n_vars, 4 * dim), f32)], axis=0)
    out_ref[0] = vote.astype(out_ref.dtype)


# --------------------------------- host-side packing ---------------------------------

def pack_params(p, dim=DIM):
    lm_w1, lm_b1, lm_w2, lm_b2, lm_w3, lm_b3 = p["L_msg"]
    cm_w1, cm_b1, cm_w2, cm_b2, cm_w3, cm_b3 = p["C_msg"]
    c_wih, c_whh, c_b = p["C_lstm"]          # (dim,4dim), (dim,4dim), (1,4dim)
    l_wih, l_whh, l_b = p["L_lstm_full"]     # (2dim,4dim), (dim,4dim), (1,4dim)
    vv_w1, vv_b1, vv_w2, vv_b2, vv_w3, vv_b3 = p["var_vote_full"]

    l_wih_a = l_wih[:dim, :]                 # CL half
    l_wih_b = l_wih[dim:, :]                 # flip(L) half

    m32 = [None] * N_M32
    m32[LM_W1], m32[LM_W2] = lm_w1, lm_w2
    m32[CM_W1], m32[CM_W2] = cm_w1, cm_w2
    m32[VV_W1A], m32[VV_W1B] = vv_w1[:dim, :], vv_w1[dim:, :]
    m32[VV_W2] = vv_w2

    m128 = [None] * N_M128
    m128[LM_W3C] = lm_w3 @ c_wih             # fold L_msg layer 3 into C_update W_ih
    m128[CM_W3L] = cm_w3 @ l_wih_a           # fold C_msg layer 3 into L_update W_ih (CL)
    m128[L_WIHB] = l_wih_b
    m128[C_WHH] = c_whh
    m128[L_WHH] = l_whh
    m128[VV_W3P] = jnp.pad(vv_w3, ((0, 0), (0, 4 * dim - vv_w3.shape[1])))

    v32 = [None] * N_V32
    v32[L_INIT], v32[C_INIT] = p["l_init"], p["c_init"]
    v32[LM_B1], v32[LM_B2] = lm_b1, lm_b2
    v32[CM_B1], v32[CM_B2] = cm_b1, cm_b2
    v32[VV_B1], v32[VV_B2] = vv_b1, vv_b2

    v128 = [None] * N_V128
    v128[C_GB] = c_b
    v128[LM_B3C] = lm_b3 @ c_wih             # folded bias, scaled by clause degree
    v128[L_GB] = l_b
    v128[CM_B3L] = cm_b3 @ l_wih_a           # folded bias, scaled by literal degree
    v128[VV_B3P] = jnp.pad(vv_b3, ((0, 0), (0, 4 * dim - vv_b3.shape[1])))

    return (jnp.stack(m32, 0).astype(jnp.float32),
            jnp.stack(m128, 0).astype(jnp.float32),
            jnp.concatenate(v32, 0).astype(jnp.float32),
            jnp.concatenate(v128, 0).astype(jnp.float32))


def gms_forward(A_batch, params, *, n_vars=N_VARS, n_rounds=N_ROUNDS, dim=DIM):
    """A_batch: (B, n_lits, n_clauses) dense literal/clause incidence, one SAT
    instance per batch entry (or a single (n_lits, n_clauses) matrix)."""
    squeeze = A_batch.ndim == 2
    if squeeze:
        A_batch = A_batch[None]
    B, n_lits, n_clauses = A_batch.shape
    assert n_lits == 2 * n_vars
    nc_pad = ((n_clauses + 7) // 8) * 8       # sublane-align clause axis
    nv_pad = ((n_vars + 7) // 8) * 8
    A_pad = jnp.pad(A_batch.astype(jnp.float32),
                    ((0, 0), (0, 0), (0, nc_pad - n_clauses)))
    AT_pad = jnp.transpose(A_pad, (0, 2, 1))  # host-side transpose
    m32, m128, v32, v128 = pack_params(params, dim)

    kernel = functools.partial(gms_kernel, n_vars=n_vars, n_rounds=n_rounds, dim=dim)
    out = pl.pallas_call(
        kernel,
        out_shape=jax.ShapeDtypeStruct((B, nv_pad, 4 * dim), jnp.float32),
        grid=(B,),
        in_specs=[
            pl.BlockSpec((1, n_lits, nc_pad), lambda b: (b, 0, 0)),
            pl.BlockSpec((1, nc_pad, n_lits), lambda b: (b, 0, 0)),
            # constant index maps -> parameters stay VMEM-resident across grid steps
            pl.BlockSpec(m32.shape, lambda b: (0, 0, 0)),
            pl.BlockSpec(m128.shape, lambda b: (0, 0, 0)),
            pl.BlockSpec(v32.shape, lambda b: (0, 0)),
            pl.BlockSpec(v128.shape, lambda b: (0, 0)),
        ],
        out_specs=pl.BlockSpec((1, nv_pad, 4 * dim), lambda b: (b, 0, 0)),
        compiler_params=pltpu.CompilerParams(dimension_semantics=("parallel",)),
    )(A_pad, AT_pad, m32, m128, v32, v128)

    vote = out[:, :n_vars, 0:1]               # lane 0 is the real vote column
    return vote[0] if squeeze else vote


# ----------------------------------- parameter init -----------------------------------

def init_params(key, dim=DIM):
    keys = iter(jax.random.split(key, 40))

    def nrm(shape, scale):
        return scale * jax.random.normal(next(keys), shape, jnp.float32)

    def linear(in_d, out_d):
        s = 1.0 / (in_d ** 0.5)
        return nrm((in_d, out_d), s), nrm((1, out_d), s)

    def mlp_params(in_d, hid, out_d):
        w1, b1 = linear(in_d, hid)
        w2, b2 = linear(hid, hid)
        w3, b3 = linear(hid, out_d)
        return [w1, b1, w2, b2, w3, b3]

    p = {}
    # L_init / C_init = Linear(1, dim) applied to ones(1)  ->  w[0] + b
    li_w, li_b = linear(1, dim)
    ci_w, ci_b = linear(1, dim)
    p["l_init"] = li_w[0:1, :] + li_b            # (1, dim)
    p["c_init"] = ci_w[0:1, :] + ci_b            # (1, dim)

    p["L_msg"] = mlp_params(dim, dim, dim)
    p["C_msg"] = mlp_params(dim, dim, dim)

    def lstm_params(in_d, hid):
        s = 1.0 / (hid ** 0.5)
        wih = nrm((in_d, 4 * hid), s)            # gate order i, f, g, o
        whh = nrm((hid, 4 * hid), s)
        b = nrm((1, 4 * hid), s)                 # combined b_ih + b_hh
        return wih, whh, b

    p["C_lstm"] = list(lstm_params(dim, dim))
    p["L_lstm_full"] = list(lstm_params(2 * dim, dim))
    p["var_vote_full"] = mlp_params(2 * dim, dim, 1)
    return p


# ----------------------------------- pure-JAX reference --------------------------------

def gms_reference(A, p, *, n_vars=N_VARS, n_rounds=N_ROUNDS, dim=DIM):
    n_lits = 2 * n_vars
    n_clauses = A.shape[1]

    def mlp(x, ws):
        w1, b1, w2, b2, w3, b3 = ws
        h = jax.nn.relu(x @ w1 + b1)
        h = jax.nn.relu(h @ w2 + b2)
        return h @ w3 + b3

    def lstm(x, h, c, wih, whh, b):
        g = x @ wih + h @ whh + b
        i, f, gg, o = jnp.split(g, 4, axis=1)
        c_new = jax.nn.sigmoid(f) * c + jax.nn.sigmoid(i) * jnp.tanh(gg)
        h_new = jax.nn.sigmoid(o) * jnp.tanh(c_new)
        return h_new, c_new

    L_h = jnp.broadcast_to(p["l_init"], (n_lits, dim))
    L_c = jnp.zeros((n_lits, dim), jnp.float32)
    C_h = jnp.broadcast_to(p["c_init"], (n_clauses, dim))
    C_c = jnp.zeros((n_clauses, dim), jnp.float32)
    c_wih, c_whh, c_b = p["C_lstm"]
    l_wih, l_whh, l_b = p["L_lstm_full"]

    for _ in range(n_rounds):
        L_pre = mlp(L_h, p["L_msg"])
        LC = A.T @ L_pre
        C_h, C_c = lstm(LC, C_h, C_c, c_wih, c_whh, c_b)
        C_pre = mlp(C_h, p["C_msg"])
        CL = A @ C_pre
        flip = jnp.concatenate([L_h[n_vars:2 * n_vars], L_h[:n_vars]], axis=0)
        x_in = jnp.concatenate([CL, flip], axis=1)
        L_h, L_c = lstm(x_in, L_h, L_c, l_wih, l_whh, l_b)

    xv = jnp.concatenate([L_h[:n_vars], L_h[n_vars:]], axis=1)
    return mlp(xv, p["var_vote_full"])


# --------------------------------------- main ------------------------------------------

if __name__ == "__main__":
    root = jax.random.PRNGKey(0)
    k_params, k_adj = jax.random.split(root, 2)

    params = init_params(k_params, DIM)

    # A small batch of dense literal/clause incidence matrices (stand-in for the sparse
    # L_unpack of independent problems).
    A = (jax.random.uniform(k_adj, (BATCH, N_LITS, N_CLAUSES)) < 0.25).astype(jnp.float32)

    out = jax.block_until_ready(gms_forward(A, params))
    ref = jnp.stack([gms_reference(A[b], params) for b in range(BATCH)], axis=0)

    assert out.shape == (BATCH, N_VARS, 1), out.shape
    assert jnp.allclose(out, ref, atol=5e-4, rtol=5e-4), (out, ref)

    print("KERNEL_OK")
</pallas_src>

<mosaic_0001>
module attributes {stable_mosaic.version = 11 : i64} {
  func.func @gms_kernel(%arg0: i32, %arg1: memref<1x16x16xf32, #tpu.memory_space<vmem>>, %arg2: memref<1x16x16xf32, #tpu.memory_space<vmem>>, %arg3: memref<7x32x32xf32, #tpu.memory_space<vmem>>, %arg4: memref<6x32x128xf32, #tpu.memory_space<vmem>>, %arg5: memref<8x32xf32, #tpu.memory_space<vmem>>, %arg6: memref<5x128xf32, #tpu.memory_space<vmem>>, %arg7: memref<1x8x128xf32, #tpu.memory_space<vmem>>) attributes {dimension_semantics = [#tpu.dimension_semantics<parallel>], iteration_bounds = array<i64: 4>, scalar_prefetch = 0 : i64, scratch_operands = 0 : i64, tpu.core_type = #tpu.core_type<tc>, window_params = [{transform_indices = @transform_0, window_bounds = array<i64: 1, 16, 16>}, {transform_indices = @transform_1, window_bounds = array<i64: 1, 16, 16>}, {pipeline_mode = #tpu.pipeline_mode<synchronous>, transform_indices = @transform_2, window_bounds = array<i64: 7, 32, 32>}, {pipeline_mode = #tpu.pipeline_mode<synchronous>, transform_indices = @transform_3, window_bounds = array<i64: 6, 32, 128>}, {pipeline_mode = #tpu.pipeline_mode<synchronous>, transform_indices = @transform_4, window_bounds = array<i64: 8, 32>}, {pipeline_mode = #tpu.pipeline_mode<synchronous>, transform_indices = @transform_5, window_bounds = array<i64: 5, 128>}, {transform_indices = @transform_6, window_bounds = array<i64: 1, 8, 128>}]} {
    %c0 = arith.constant 0 : index
    %c0_0 = arith.constant 0 : index
    %c0_1 = arith.constant 0 : index
    %0 = vector.load %arg1[%c0, %c0_0, %c0_1] : memref<1x16x16xf32, #tpu.memory_space<vmem>>, vector<1x16x16xf32>
    %1 = vector.shape_cast %0 : vector<1x16x16xf32> to vector<16x16xf32>
    %c0_2 = arith.constant 0 : index
    %c0_3 = arith.constant 0 : index
    %c0_4 = arith.constant 0 : index
    %2 = vector.load %arg2[%c0_2, %c0_3, %c0_4] : memref<1x16x16xf32, #tpu.memory_space<vmem>>, vector<1x16x16xf32>
    %3 = vector.shape_cast %2 : vector<1x16x16xf32> to vector<16x16xf32>
    %c0_5 = arith.constant 0 : index
    %c0_6 = arith.constant 0 : index
    %4 = vector.load %arg5[%c0_5, %c0_6] : memref<8x32xf32, #tpu.memory_space<vmem>>, vector<8x32xf32>
    %c0_7 = arith.constant 0 : index
    %c0_8 = arith.constant 0 : index
    %5 = vector.load %arg6[%c0_7, %c0_8] : memref<5x128xf32, #tpu.memory_space<vmem>>, vector<5x128xf32>
    %cst = arith.constant dense<0.000000e+00> : vector<16xf32>
    %6 = vector.multi_reduction <add>, %3, %cst [1] : vector<16x16xf32> to vector<16xf32>
    %7 = vector.shape_cast %6 : vector<16xf32> to vector<16x1xf32>
    %cst_9 = arith.constant dense<0.000000e+00> : vector<16xf32>
    %8 = vector.multi_reduction <add>, %1, %cst_9 [1] : vector<16x16xf32> to vector<16xf32>
    %9 = vector.shape_cast %8 : vector<16xf32> to vector<16x1xf32>
    %10 = vector.extract_strided_slice %5 {offsets = [0, 0], sizes = [1, 128], strides = [1, 1]} : vector<5x128xf32> to vector<1x128xf32>
    %11 = vector.extract_strided_slice %5 {offsets = [1, 0], sizes = [1, 128], strides = [1, 1]} : vector<5x128xf32> to vector<1x128xf32>
    %12 = vector.broadcast %7 : vector<16x1xf32> to vector<16x128xf32>
    %13 = vector.broadcast %11 : vector<1x128xf32> to vector<16x128xf32>
    %14 = arith.mulf %12, %13 : vector<16x128xf32>
    %15 = vector.broadcast %10 : vector<1x128xf32> to vector<16x128xf32>
    %16 = arith.addf %15, %14 : vector<16x128xf32>
    %17 = vector.extract_strided_slice %5 {offsets = [2, 0], sizes = [1, 128], strides = [1, 1]} : vector<5x128xf32> to vector<1x128xf32>
    %18 = vector.extract_strided_slice %5 {offsets = [3, 0], sizes = [1, 128], strides = [1, 1]} : vector<5x128xf32> to vector<1x128xf32>
    %19 = vector.broadcast %9 : vector<16x1xf32> to vector<16x128xf32>
    %20 = vector.broadcast %18 : vector<1x128xf32> to vector<16x128xf32>
    %21 = arith.mulf %19, %20 : vector<16x128xf32>
    %22 = vector.broadcast %17 : vector<1x128xf32> to vector<16x128xf32>
    %23 = arith.addf %22, %21 : vector<16x128xf32>
    %24 = vector.extract_strided_slice %4 {offsets = [0, 0], sizes = [1, 32], strides = [1, 1]} : vector<8x32xf32> to vector<1x32xf32>
    %25 = vector.shape_cast %24 : vector<1x32xf32> to vector<1x32xf32>
    %26 = vector.broadcast %25 : vector<1x32xf32> to vector<16x32xf32>
    %cst_10 = arith.constant 0.000000e+00 : f32
    %27 = vector.broadcast %cst_10 : f32 to vector<16x32xf32>
    %28 = vector.extract_strided_slice %4 {offsets = [1, 0], sizes = [1, 32], strides = [1, 1]} : vector<8x32xf32> to vector<1x32xf32>
    %29 = vector.shape_cast %28 : vector<1x32xf32> to vector<1x32xf32>
    %30 = vector.broadcast %29 : vector<1x32xf32> to vector<16x32xf32>
    %cst_11 = arith.constant 0.000000e+00 : f32
    %31 = vector.broadcast %cst_11 : f32 to vector<16x32xf32>
    %c0_12 = arith.constant 0 : index
    %c0_13 = arith.constant 0 : index
    %c0_14 = arith.constant 0 : index
    %32 = vector.load %arg3[%c0_12, %c0_13, %c0_14] : memref<7x32x32xf32, #tpu.memory_space<vmem>>, vector<1x32x32xf32>
    %33 = vector.shape_cast %32 : vector<1x32x32xf32> to vector<32x32xf32>
    %cst_15 = arith.constant dense<0.000000e+00> : vector<16x32xf32>
    %34 = tpu.matmul %26, %33, %cst_15 {dimension_numbers = #tpu.dot_dimension_numbers<[1], [0], [0], [1], [0, 0, 1, 1], [], []>} : vector<16x32xf32>, vector<32x32xf32>, vector<16x32xf32> -> vector<16x32xf32>
    %35 = vector.extract_strided_slice %4 {offsets = [2, 0], sizes = [1, 32], strides = [1, 1]} : vector<8x32xf32> to vector<1x32xf32>
    %36 = vector.broadcast %35 : vector<1x32xf32> to vector<16x32xf32>
    %37 = arith.addf %34, %36 : vector<16x32xf32>
    %cst_16 = arith.constant 0.000000e+00 : f32
    %38 = vector.broadcast %cst_16 : f32 to vector<16x32xf32>
    %39 = arith.maximumf %37, %38 : vector<16x32xf32>
    %c1 = arith.constant 1 : index
    %c0_17 = arith.constant 0 : index
    %c0_18 = arith.constant 0 : index
    %40 = vector.load %arg3[%c1, %c0_17, %c0_18] : memref<7x32x32xf32, #tpu.memory_space<vmem>>, vector<1x32x32xf32>
    %41 = vector.shape_cast %40 : vector<1x32x32xf32> to vector<32x32xf32>
    %cst_19 = arith.constant dense<0.000000e+00> : vector<16x32xf32>
    %42 = tpu.matmul %39, %41, %cst_19 {dimension_numbers = #tpu.dot_dimension_numbers<[1], [0], [0], [1], [0, 0, 1, 1], [], []>} : vector<16x32xf32>, vector<32x32xf32>, vector<16x32xf32> -> vector<16x32xf32>
    %43 = vector.extract_strided_slice %4 {offsets = [3, 0], sizes = [1, 32], strides = [1, 1]} : vector<8x32xf32> to vector<1x32xf32>
    %44 = vector.broadcast %43 : vector<1x32xf32> to vector<16x32xf32>
    %45 = arith.addf %42, %44 : vector<16x32xf32>
    %cst_20 = arith.constant 0.000000e+00 : f32
    %46 = vector.broadcast %cst_20 : f32 to vector<16x32xf32>
    %47 = arith.maximumf %45, %46 : vector<16x32xf32>
    %c0_21 = arith.constant 0 : index
    %c0_22 = arith.constant 0 : index
    %c0_23 = arith.constant 0 : index
    %48 = vector.load %arg4[%c0_21, %c0_22, %c0_23] : memref<6x32x128xf32, #tpu.memory_space<vmem>>, vector<1x32x128xf32>
    %49 = vector.shape_cast %48 : vector<1x32x128xf32> to vector<32x128xf32>
    %cst_24 = arith.constant dense<0.000000e+00> : vector<16x128xf32>
    %50 = tpu.matmul %47, %49, %cst_24 {dimension_numbers = #tpu.dot_dimension_numbers<[1], [0], [0], [1], [0, 0, 1, 1], [], []>} : vector<16x32xf32>, vector<32x128xf32>, vector<16x128xf32> -> vector<16x128xf32>
    %cst_25 = arith.constant dense<0.000000e+00> : vector<16x128xf32>
    %51 = tpu.matmul %3, %50, %cst_25 {dimension_numbers = #tpu.dot_dimension_numbers<[1], [0], [0], [1], [0, 0, 1, 1], [], []>} : vector<16x16xf32>, vector<16x128xf32>, vector<16x128xf32> -> vector<16x128xf32>
    %c3 = arith.constant 3 : index
    %c0_26 = arith.constant 0 : index
    %c0_27 = arith.constant 0 : index
    %52 = vector.load %arg4[%c3, %c0_26, %c0_27] : memref<6x32x128xf32, #tpu.memory_space<vmem>>, vector<1x32x128xf32>
    %53 = vector.shape_cast %52 : vector<1x32x128xf32> to vector<32x128xf32>
    %cst_28 = arith.constant dense<0.000000e+00> : vector<16x128xf32>
    %54 = tpu.matmul %30, %53, %cst_28 {dimension_numbers = #tpu.dot_dimension_numbers<[1], [0], [0], [1], [0, 0, 1, 1], [], []>} : vector<16x32xf32>, vector<32x128xf32>, vector<16x128xf32> -> vector<16x128xf32>
    %55 = arith.addf %51, %54 : vector<16x128xf32>
    %56 = arith.addf %55, %16 : vector<16x128xf32>
    %57 = vector.extract_strided_slice %56 {offsets = [0, 0], sizes = [16, 32], strides = [1, 1]} : vector<16x128xf32> to vector<16x32xf32>
    %58 = arith.negf %57 : vector<16x32xf32>
    %59 = math.exp %58 : vector<16x32xf32>
    %cst_29 = arith.constant 1.000000e+00 : f32
    %60 = vector.broadcast %cst_29 : f32 to vector<16x32xf32>
    %61 = arith.addf %60, %59 : vector<16x32xf32>
    %62 = arith.divf %60, %61 : vector<16x32xf32>
    %63 = vector.extract_strided_slice %56 {offsets = [0, 32], sizes = [16, 32], strides = [1, 1]} : vector<16x128xf32> to vector<16x32xf32>
    %64 = arith.negf %63 : vector<16x32xf32>
    %65 = math.exp %64 : vector<16x32xf32>
    %cst_30 = arith.constant 1.000000e+00 : f32
    %66 = vector.broadcast %cst_30 : f32 to vector<16x32xf32>
    %67 = arith.addf %66, %65 : vector<16x32xf32>
    %68 = arith.divf %66, %67 : vector<16x32xf32>
    %69 = vector.extract_strided_slice %56 {offsets = [0, 64], sizes = [16, 32], strides = [1, 1]} : vector<16x128xf32> to vector<16x32xf32>
    %70 = math.tanh %69 : vector<16x32xf32>
    %71 = vector.extract_strided_slice %56 {offsets = [0, 96], sizes = [16, 32], strides = [1, 1]} : vector<16x128xf32> to vector<16x32xf32>
    %72 = arith.negf %71 : vector<16x32xf32>
    %73 = math.exp %72 : vector<16x32xf32>
    %cst_31 = arith.constant 1.000000e+00 : f32
    %74 = vector.broadcast %cst_31 : f32 to vector<16x32xf32>
    %75 = arith.addf %74, %73 : vector<16x32xf32>
    %76 = arith.divf %74, %75 : vector<16x32xf32>
    %77 = arith.mulf %68, %31 : vector<16x32xf32>
    %78 = arith.mulf %62, %70 : vector<16x32xf32>
    %79 = arith.addf %77, %78 : vector<16x32xf32>
    %80 = math.tanh %79 : vector<16x32xf32>
    %81 = arith.mulf %76, %80 : vector<16x32xf32>
    %c2 = arith.constant 2 : index
    %c0_32 = arith.constant 0 : index
    %c0_33 = arith.constant 0 : index
    %82 = vector.load %arg3[%c2, %c0_32, %c0_33] : memref<7x32x32xf32, #tpu.memory_space<vmem>>, vector<1x32x32xf32>
    %83 = vector.shape_cast %82 : vector<1x32x32xf32> to vector<32x32xf32>
    %cst_34 = arith.constant dense<0.000000e+00> : vector<16x32xf32>
    %84 = tpu.matmul %81, %83, %cst_34 {dimension_numbers = #tpu.dot_dimension_numbers<[1], [0], [0], [1], [0, 0, 1, 1], [], []>} : vector<16x32xf32>, vector<32x32xf32>, vector<16x32xf32> -> vector<16x32xf32>
    %85 = vector.extract_strided_slice %4 {offsets = [4, 0], sizes = [1, 32], strides = [1, 1]} : vector<8x32xf32> to vector<1x32xf32>
    %86 = vector.broadcast %85 : vector<1x32xf32> to vector<16x32xf32>
    %87 = arith.addf %84, %86 : vector<16x32xf32>
    %cst_35 = arith.constant 0.000000e+00 : f32
    %88 = vector.broadcast %cst_35 : f32 to vector<16x32xf32>
    %89 = arith.maximumf %87, %88 : vector<16x32xf32>
    %c3_36 = arith.constant 3 : index
    %c0_37 = arith.constant 0 : index
    %c0_38 = arith.constant 0 : index
    %90 = vector.load %arg3[%c3_36, %c0_37, %c0_38] : memref<7x32x32xf32, #tpu.memory_space<vmem>>, vector<1x32x32xf32>
    %91 = vector.shape_cast %90 : vector<1x32x32xf32> to vector<32x32xf32>
    %cst_39 = arith.constant dense<0.000000e+00> : vector<16x32xf32>
    %92 = tpu.matmul %89, %91, %cst_39 {dimension_numbers = #tpu.dot_dimension_numbers<[1], [0], [0], [1], [0, 0, 1, 1], [], []>} : vector<16x32xf32>, vector<32x32xf32>, vector<16x32xf32> -> vector<16x32xf32>
    %93 = vector.extract_strided_slice %4 {offsets = [5, 0], sizes = [1, 32], strides = [1, 1]} : vector<8x32xf32> to vector<1x32xf32>
    %94 = vector.broadcast %93 : vector<1x32xf32> to vector<16x32xf32>
    %95 = arith.addf %92, %94 : vector<16x32xf32>
    %cst_40 = arith.constant 0.000000e+00 : f32
    %96 = vector.broadcast %cst_40 : f32 to vector<16x32xf32>
    %97 = arith.maximumf %95, %96 : vector<16x32xf32>
    %c1_41 = arith.constant 1 : index
    %c0_42 = arith.constant 0 : index
    %c0_43 = arith.constant 0 : index
    %98 = vector.load %arg4[%c1_41, %c0_42, %c0_43] : memref<6x32x128xf32, #tpu.memory_space<vmem>>, vector<1x32x128xf32>
    %99 = vector.shape_cast %98 : vector<1x32x128xf32> to vector<32x128xf32>
    %cst_44 = arith.constant dense<0.000000e+00> : vector<16x128xf32>
    %100 = tpu.matmul %97, %99, %cst_44 {dimension_numbers = #tpu.dot_dimension_numbers<[1], [0], [0], [1], [0, 0, 1, 1], [], []>} : vector<16x32xf32>, vector<32x128xf32>, vector<16x128xf32> -> vector<16x128xf32>
    %c8_i32 = arith.constant 8 : i32
    %101 = tpu.dynamic_rotate %26 by %c8_i32 dim 0 : vector<16x32xf32>, i32 -> vector<16x32xf32>
    %cst_45 = arith.constant dense<0.000000e+00> : vector<16x128xf32>
    %102 = tpu.matmul %1, %100, %cst_45 {dimension_numbers = #tpu.dot_dimension_numbers<[1], [0], [0], [1], [0, 0, 1, 1], [], []>} : vector<16x16xf32>, vector<16x128xf32>, vector<16x128xf32> -> vector<16x128xf32>
    %c2_46 = arith.constant 2 : index
    %c0_47 = arith.constant 0 : index
    %c0_48 = arith.constant 0 : index
    %103 = vector.load %arg4[%c2_46, %c0_47, %c0_48] : memref<6x32x128xf32, #tpu.memory_space<vmem>>, vector<1x32x128xf32>
    %104 = vector.shape_cast %103 : vector<1x32x128xf32> to vector<32x128xf32>
    %cst_49 = arith.constant dense<0.000000e+00> : vector<16x128xf32>
    %105 = tpu.matmul %101, %104, %cst_49 {dimension_numbers = #tpu.dot_dimension_numbers<[1], [0], [0], [1], [0, 0, 1, 1], [], []>} : vector<16x32xf32>, vector<32x128xf32>, vector<16x128xf32> -> vector<16x128xf32>
    %106 = arith.addf %102, %105 : vector<16x128xf32>
    %c4 = arith.constant 4 : index
    %c0_50 = arith.constant 0 : index
    %c0_51 = arith.constant 0 : index
    %107 = vector.load %arg4[%c4, %c0_50, %c0_51] : memref<6x32x128xf32, #tpu.memory_space<vmem>>, vector<1x32x128xf32>
    %108 = vector.shape_cast %107 : vector<1x32x128xf32> to vector<32x128xf32>
    %cst_52 = arith.constant dense<0.000000e+00> : vector<16x128xf32>
    %109 = tpu.matmul %26, %108, %cst_52 {dimension_numbers = #tpu.dot_dimension_numbers<[1], [0], [0], [1], [0, 0, 1, 1], [], []>} : vector<16x32xf32>, vector<32x128xf32>, vector<16x128xf32> -> vector<16x128xf32>
    %110 = arith.addf %106, %109 : vector<16x128xf32>
    %111 = arith.addf %110, %23 : vector<16x128xf32>
    %112 = vector.extract_strided_slice %111 {offsets = [0, 0], sizes = [16, 32], strides = [1, 1]} : vector<16x128xf32> to vector<16x32xf32>
    %113 = arith.negf %112 : vector<16x32xf32>
    %114 = math.exp %113 : vector<16x32xf32>
    %cst_53 = arith.constant 1.000000e+00 : f32
    %115 = vector.broadcast %cst_53 : f32 to vector<16x32xf32>
    %116 = arith.addf %115, %114 : vector<16x32xf32>
    %117 = arith.divf %115, %116 : vector<16x32xf32>
    %118 = vector.extract_strided_slice %111 {offsets = [0, 32], sizes = [16, 32], strides = [1, 1]} : vector<16x128xf32> to vector<16x32xf32>
    %119 = arith.negf %118 : vector<16x32xf32>
    %120 = math.exp %119 : vector<16x32xf32>
    %cst_54 = arith.constant 1.000000e+00 : f32
    %121 = vector.broadcast %cst_54 : f32 to vector<16x32xf32>
    %122 = arith.addf %121, %120 : vector<16x32xf32>
    %123 = arith.divf %121, %122 : vector<16x32xf32>
    %124 = vector.extract_strided_slice %111 {offsets = [0, 64], sizes = [16, 32], strides = [1, 1]} : vector<16x128xf32> to vector<16x32xf32>
    %125 = math.tanh %124 : vector<16x32xf32>
    %126 = vector.extract_strided_slice %111 {offsets = [0, 96], sizes = [16, 32], strides = [1, 1]} : vector<16x128xf32> to vector<16x32xf32>
    %127 = arith.negf %126 : vector<16x32xf32>
    %128 = math.exp %127 : vector<16x32xf32>
    %cst_55 = arith.constant 1.000000e+00 : f32
    %129 = vector.broadcast %cst_55 : f32 to vector<16x32xf32>
    %130 = arith.addf %129, %128 : vector<16x32xf32>
    %131 = arith.divf %129, %130 : vector<16x32xf32>
    %132 = arith.mulf %123, %27 : vector<16x32xf32>
    %133 = arith.mulf %117, %125 : vector<16x32xf32>
    %134 = arith.addf %132, %133 : vector<16x32xf32>
    %135 = math.tanh %134 : vector<16x32xf32>
    %136 = arith.mulf %131, %135 : vector<16x32xf32>
    %c0_56 = arith.constant 0 : index
    %c0_57 = arith.constant 0 : index
    %c0_58 = arith.constant 0 : index
    %137 = vector.load %arg3[%c0_56, %c0_57, %c0_58] : memref<7x32x32xf32, #tpu.memory_space<vmem>>, vector<1x32x32xf32>
    %138 = vector.shape_cast %137 : vector<1x32x32xf32> to vector<32x32xf32>
    %cst_59 = arith.constant dense<0.000000e+00> : vector<16x32xf32>
    %139 = tpu.matmul %136, %138, %cst_59 {dimension_numbers = #tpu.dot_dimension_numbers<[1], [0], [0], [1], [0, 0, 1, 1], [], []>} : vector<16x32xf32>, vector<32x32xf32>, vector<16x32xf32> -> vector<16x32xf32>
    %140 = vector.extract_strided_slice %4 {offsets = [2, 0], sizes = [1, 32], strides = [1, 1]} : vector<8x32xf32> to vector<1x32xf32>
    %141 = vector.broadcast %140 : vector<1x32xf32> to vector<16x32xf32>
    %142 = arith.addf %139, %141 : vector<16x32xf32>
    %cst_60 = arith.constant 0.000000e+00 : f32
    %143 = vector.broadcast %cst_60 : f32 to vector<16x32xf32>
    %144 = arith.maximumf %142, %143 : vector<16x32xf32>
    %c1_61 = arith.constant 1 : index
    %c0_62 = arith.constant 0 : index
    %c0_63 = arith.constant 0 : index
    %145 = vector.load %arg3[%c1_61, %c0_62, %c0_63] : memref<7x32x32xf32, #tpu.memory_space<vmem>>, vector<1x32x32xf32>
    %146 = vector.shape_cast %145 : vector<1x32x32xf32> to vector<32x32xf32>
    %cst_64 = arith.constant dense<0.000000e+00> : vector<16x32xf32>
    %147 = tpu.matmul %144, %146, %cst_64 {dimension_numbers = #tpu.dot_dimension_numbers<[1], [0], [0], [1], [0, 0, 1, 1], [], []>} : vector<16x32xf32>, vector<32x32xf32>, vector<16x32xf32> -> vector<16x32xf32>
    %148 = vector.extract_strided_slice %4 {offsets = [3, 0], sizes = [1, 32], strides = [1, 1]} : vector<8x32xf32> to vector<1x32xf32>
    %149 = vector.broadcast %148 : vector<1x32xf32> to vector<16x32xf32>
    %150 = arith.addf %147, %149 : vector<16x32xf32>
    %cst_65 = arith.constant 0.000000e+00 : f32
    %151 = vector.broadcast %cst_65 : f32 to vector<16x32xf32>
    %152 = arith.maximumf %150, %151 : vector<16x32xf32>
    %c0_66 = arith.constant 0 : index
    %c0_67 = arith.constant 0 : index
    %c0_68 = arith.constant 0 : index
    %153 = vector.load %arg4[%c0_66, %c0_67, %c0_68] : memref<6x32x128xf32, #tpu.memory_space<vmem>>, vector<1x32x128xf32>
    %154 = vector.shape_cast %153 : vector<1x32x128xf32> to vector<32x128xf32>
    %cst_69 = arith.constant dense<0.000000e+00> : vector<16x128xf32>
    %155 = tpu.matmul %152, %154, %cst_69 {dimension_numbers = #tpu.dot_dimension_numbers<[1], [0], [0], [1], [0, 0, 1, 1], [], []>} : vector<16x32xf32>, vector<32x128xf32>, vector<16x128xf32> -> vector<16x128xf32>
    %cst_70 = arith.constant dense<0.000000e+00> : vector<16x128xf32>
    %156 = tpu.matmul %3, %155, %cst_70 {dimension_numbers = #tpu.dot_dimension_numbers<[1], [0], [0], [1], [0, 0, 1, 1], [], []>} : vector<16x16xf32>, vector<16x128xf32>, vector<16x128xf32> -> vector<16x128xf32>
    %c3_71 = arith.constant 3 : index
    %c0_72 = arith.constant 0 : index
    %c0_73 = arith.constant 0 : index
    %157 = vector.load %arg4[%c3_71, %c0_72, %c0_73] : memref<6x32x128xf32, #tpu.memory_space<vmem>>, vector<1x32x128xf32>
    %158 = vector.shape_cast %157 : vector<1x32x128xf32> to vector<32x128xf32>
    %cst_74 = arith.constant dense<0.000000e+00> : vector<16x128xf32>
    %159 = tpu.matmul %81, %158, %cst_74 {dimension_numbers = #tpu.dot_dimension_numbers<[1], [0], [0], [1], [0, 0, 1, 1], [], []>} : vector<16x32xf32>, vector<32x128xf32>, vector<16x128xf32> -> vector<16x128xf32>
    %160 = arith.addf %156, %159 : vector<16x128xf32>
    %161 = arith.addf %160, %16 : vector<16x128xf32>
    %162 = vector.extract_strided_slice %161 {offsets = [0, 0], sizes = [16, 32], strides = [1, 1]} : vector<16x128xf32> to vector<16x32xf32>
    %163 = arith.negf %162 : vector<16x32xf32>
    %164 = math.exp %163 : vector<16x32xf32>
    %cst_75 = arith.constant 1.000000e+00 : f32
    %165 = vector.broadcast %cst_75 : f32 to vector<16x32xf32>
    %166 = arith.addf %165, %164 : vector<16x32xf32>
    %167 = arith.divf %165, %166 : vector<16x32xf32>
    %168 = vector.extract_strided_slice %161 {offsets = [0, 32], sizes = [16, 32], strides = [1, 1]} : vector<16x128xf32> to vector<16x32xf32>
    %169 = arith.negf %168 : vector<16x32xf32>
    %170 = math.exp %169 : vector<16x32xf32>
    %cst_76 = arith.constant 1.000000e+00 : f32
    %171 = vector.broadcast %cst_76 : f32 to vector<16x32xf32>
    %172 = arith.addf %171, %170 : vector<16x32xf32>
    %173 = arith.divf %171, %172 : vector<16x32xf32>
    %174 = vector.extract_strided_slice %161 {offsets = [0, 64], sizes = [16, 32], strides = [1, 1]} : vector<16x128xf32> to vector<16x32xf32>
    %175 = math.tanh %174 : vector<16x32xf32>
    %176 = vector.extract_strided_slice %161 {offsets = [0, 96], sizes = [16, 32], strides = [1, 1]} : vector<16x128xf32> to vector<16x32xf32>
    %177 = arith.negf %176 : vector<16x32xf32>
    %178 = math.exp %177 : vector<16x32xf32>
    %cst_77 = arith.constant 1.000000e+00 : f32
    %179 = vector.broadcast %cst_77 : f32 to vector<16x32xf32>
    %180 = arith.addf %179, %178 : vector<16x32xf32>
    %181 = arith.divf %179, %180 : vector<16x32xf32>
    %182 = arith.mulf %173, %79 : vector<16x32xf32>
    %183 = arith.mulf %167, %175 : vector<16x32xf32>
    %184 = arith.addf %182, %183 : vector<16x32xf32>
    %185 = math.tanh %184 : vector<16x32xf32>
    %186 = arith.mulf %181, %185 : vector<16x32xf32>
    %c2_78 = arith.constant 2 : index
    %c0_79 = arith.constant 0 : index
    %c0_80 = arith.constant 0 : index
    %187 = vector.load %arg3[%c2_78, %c0_79, %c0_80] : memref<7x32x32xf32, #tpu.memory_space<vmem>>, vector<1x32x32xf32>
    %188 = vector.shape_cast %187 : vector<1x32x32xf32> to vector<32x32xf32>
    %cst_81 = arith.constant dense<0.000000e+00> : vector<16x32xf32>
    %189 = tpu.matmul %186, %188, %cst_81 {dimension_numbers = #tpu.dot_dimension_numbers<[1], [0], [0], [1], [0, 0, 1, 1], [], []>} : vector<16x32xf32>, vector<32x32xf32>, vector<16x32xf32> -> vector<16x32xf32>
    %190 = vector.extract_strided_slice %4 {offsets = [4, 0], sizes = [1, 32], strides = [1, 1]} : vector<8x32xf32> to vector<1x32xf32>
    %191 = vector.broadcast %190 : vector<1x32xf32> to vector<16x32xf32>
    %192 = arith.addf %189, %191 : vector<16x32xf32>
    %cst_82 = arith.constant 0.000000e+00 : f32
    %193 = vector.broadcast %cst_82 : f32 to vector<16x32xf32>
    %194 = arith.maximumf %192, %193 : vector<16x32xf32>
    %c3_83 = arith.constant 3 : index
    %c0_84 = arith.constant 0 : index
    %c0_85 = arith.constant 0 : index
    %195 = vector.load %arg3[%c3_83, %c0_84, %c0_85] : memref<7x32x32xf32, #tpu.memory_space<vmem>>, vector<1x32x32xf32>
    %196 = vector.shape_cast %195 : vector<1x32x32xf32> to vector<32x32xf32>
    %cst_86 = arith.constant dense<0.000000e+00> : vector<16x32xf32>
    %197 = tpu.matmul %194, %196, %cst_86 {dimension_numbers = #tpu.dot_dimension_numbers<[1], [0], [0], [1], [0, 0, 1, 1], [], []>} : vector<16x32xf32>, vector<32x32xf32>, vector<16x32xf32> -> vector<16x32xf32>
    %198 = vector.extract_strided_slice %4 {offsets = [5, 0], sizes = [1, 32], strides = [1, 1]} : vector<8x32xf32> to vector<1x32xf32>
    %199 = vector.broadcast %198 : vector<1x32xf32> to vector<16x32xf32>
    %200 = arith.addf %197, %199 : vector<16x32xf32>
    %cst_87 = arith.constant 0.000000e+00 : f32
    %201 = vector.broadcast %cst_87 : f32 to vector<16x32xf32>
    %202 = arith.maximumf %200, %201 : vector<16x32xf32>
    %c1_88 = arith.constant 1 : index
    %c0_89 = arith.constant 0 : index
    %c0_90 = arith.constant 0 : index
    %203 = vector.load %arg4[%c1_88, %c0_89, %c0_90] : memref<6x32x128xf32, #tpu.memory_space<vmem>>, vector<1x32x128xf32>
    %204 = vector.shape_cast %203 : vector<1x32x128xf32> to vector<32x128xf32>
    %cst_91 = arith.constant dense<0.000000e+00> : vector<16x128xf32>
    %205 = tpu.matmul %202, %204, %cst_91 {dimension_numbers = #tpu.dot_dimension_numbers<[1], [0], [0], [1], [0, 0, 1, 1], [], []>} : vector<16x32xf32>, vector<32x128xf32>, vector<16x128xf32> -> vector<16x128xf32>
    %c8_i32_92 = arith.constant 8 : i32
    %206 = tpu.dynamic_rotate %136 by %c8_i32_92 dim 0 : vector<16x32xf32>, i32 -> vector<16x32xf32>
    %cst_93 = arith.constant dense<0.000000e+00> : vector<16x128xf32>
    %207 = tpu.matmul %1, %205, %cst_93 {dimension_numbers = #tpu.dot_dimension_numbers<[1], [0], [0], [1], [0, 0, 1, 1], [], []>} : vector<16x16xf32>, vector<16x128xf32>, vector<16x128xf32> -> vector<16x128xf32>
    %c2_94 = arith.constant 2 : index
    %c0_95 = arith.constant 0 : index
    %c0_96 = arith.constant 0 : index
    %208 = vector.load %arg4[%c2_94, %c0_95, %c0_96] : memref<6x32x128xf32, #tpu.memory_space<vmem>>, vector<1x32x128xf32>
    %209 = vector.shape_cast %208 : vector<1x32x128xf32> to vector<32x128xf32>
    %cst_97 = arith.constant dense<0.000000e+00> : vector<16x128xf32>
    %210 = tpu.matmul %206, %209, %cst_97 {dimension_numbers = #tpu.dot_dimension_numbers<[1], [0], [0], [1], [0, 0, 1, 1], [], []>} : vector<16x32xf32>, vector<32x128xf32>, vector<16x128xf32> -> vector<16x128xf32>
    %211 = arith.addf %207, %210 : vector<16x128xf32>
    %c4_98 = arith.constant 4 : index
    %c0_99 = arith.constant 0 : index
    %c0_100 = arith.constant 0 : index
    %212 = vector.load %arg4[%c4_98, %c0_99, %c0_100] : memref<6x32x128xf32, #tpu.memory_space<vmem>>, vector<1x32x128xf32>
    %213 = vector.shape_cast %212 : vector<1x32x128xf32> to vector<32x128xf32>
    %cst_101 = arith.constant dense<0.000000e+00> : vector<16x128xf32>
    %214 = tpu.matmul %136, %213, %cst_101 {dimension_numbers = #tpu.dot_dimension_numbers<[1], [0], [0], [1], [0, 0, 1, 1], [], []>} : vector<16x32xf32>, vector<32x128xf32>, vector<16x128xf32> -> vector<16x128xf32>
    %215 = arith.addf %211, %214 : vector<16x128xf32>
    %216 = arith.addf %215, %23 : vector<16x128xf32>
    %217 = vector.extract_strided_slice %216 {offsets = [0, 0], sizes = [16, 32], strides = [1, 1]} : vector<16x128xf32> to vector<16x32xf32>
    %218 = arith.negf %217 : vector<16x32xf32>
    %219 = math.exp %218 : vector<16x32xf32>
    %cst_102 = arith.constant 1.000000e+00 : f32
    %220 = vector.broadcast %cst_102 : f32 to vector<16x32xf32>
    %221 = arith.addf %220, %219 : vector<16x32xf32>
    %222 = arith.divf %220, %221 : vector<16x32xf32>
    %223 = vector.extract_strided_slice %216 {offsets = [0, 32], sizes = [16, 32], strides = [1, 1]} : vector<16x128xf32> to vector<16x32xf32>
    %224 = arith.negf %223 : vector<16x32xf32>
    %225 = math.exp %224 : vector<16x32xf32>
    %cst_103 = arith.constant 1.000000e+00 : f32
    %226 = vector.broadcast %cst_103 : f32 to vector<16x32xf32>
    %227 = arith.addf %226, %225 : vector<16x32xf32>
    %228 = arith.divf %226, %227 : vector<16x32xf32>
    %229 = vector.extract_strided_slice %216 {offsets = [0, 64], sizes = [16, 32], strides = [1, 1]} : vector<16x128xf32> to vector<16x32xf32>
    %230 = math.tanh %229 : vector<16x32xf32>
    %231 = vector.extract_strided_slice %216 {offsets = [0, 96], sizes = [16, 32], strides = [1, 1]} : vector<16x128xf32> to vector<16x32xf32>
    %232 = arith.negf %231 : vector<16x32xf32>
    %233 = math.exp %232 : vector<16x32xf32>
    %cst_104 = arith.constant 1.000000e+00 : f32
    %234 = vector.broadcast %cst_104 : f32 to vector<16x32xf32>
    %235 = arith.addf %234, %233 : vector<16x32xf32>
    %236 = arith.divf %234, %235 : vector<16x32xf32>
    %237 = arith.mulf %228, %134 : vector<16x32xf32>
    %238 = arith.mulf %222, %230 : vector<16x32xf32>
    %239 = arith.addf %237, %238 : vector<16x32xf32>
    %240 = math.tanh %239 : vector<16x32xf32>
    %241 = arith.mulf %236, %240 : vector<16x32xf32>
    %c0_105 = arith.constant 0 : index
    %c0_106 = arith.constant 0 : index
    %c0_107 = arith.constant 0 : index
    %242 = vector.load %arg3[%c0_105, %c0_106, %c0_107] : memref<7x32x32xf32, #tpu.memory_space<vmem>>, vector<1x32x32xf32>
    %243 = vector.shape_cast %242 : vector<1x32x32xf32> to vector<32x32xf32>
    %cst_108 = arith.constant dense<0.000000e+00> : vector<16x32xf32>
    %244 = tpu.matmul %241, %243, %cst_108 {dimension_numbers = #tpu.dot_dimension_numbers<[1], [0], [0], [1], [0, 0, 1, 1], [], []>} : vector<16x32xf32>, vector<32x32xf32>, vector<16x32xf32> -> vector<16x32xf32>
    %245 = vector.extract_strided_slice %4 {offsets = [2, 0], sizes = [1, 32], strides = [1, 1]} : vector<8x32xf32> to vector<1x32xf32>
    %246 = vector.broadcast %245 : vector<1x32xf32> to vector<16x32xf32>
    %247 = arith.addf %244, %246 : vector<16x32xf32>
    %cst_109 = arith.constant 0.000000e+00 : f32
    %248 = vector.broadcast %cst_109 : f32 to vector<16x32xf32>
    %249 = arith.maximumf %247, %248 : vector<16x32xf32>
    %c1_110 = arith.constant 1 : index
    %c0_111 = arith.constant 0 : index
    %c0_112 = arith.constant 0 : index
    %250 = vector.load %arg3[%c1_110, %c0_111, %c0_112] : memref<7x32x32xf32, #tpu.memory_space<vmem>>, vector<1x32x32xf32>
    %251 = vector.shape_cast %250 : vector<1x32x32xf32> to vector<32x32xf32>
    %cst_113 = arith.constant dense<0.000000e+00> : vector<16x32xf32>
    %252 = tpu.matmul %249, %251, %cst_113 {dimension_numbers = #tpu.dot_dimension_numbers<[1], [0], [0], [1], [0, 0, 1, 1], [], []>} : vector<16x32xf32>, vector<32x32xf32>, vector<16x32xf32> -> vector<16x32xf32>
    %253 = vector.extract_strided_slice %4 {offsets = [3, 0], sizes = [1, 32], strides = [1, 1]} : vector<8x32xf32> to vector<1x32xf32>
    %254 = vector.broadcast %253 : vector<1x32xf32> to vector<16x32xf32>
    %255 = arith.addf %252, %254 : vector<16x32xf32>
    %cst_114 = arith.constant 0.000000e+00 : f32
    %256 = vector.broadcast %cst_114 : f32 to vector<16x32xf32>
    %257 = arith.maximumf %255, %256 : vector<16x32xf32>
    %c0_115 = arith.constant 0 : index
    %c0_116 = arith.constant 0 : index
    %c0_117 = arith.constant 0 : index
    %258 = vector.load %arg4[%c0_115, %c0_116, %c0_117] : memref<6x32x128xf32, #tpu.memory_space<vmem>>, vector<1x32x128xf32>
    %259 = vector.shape_cast %258 : vector<1x32x128xf32> to vector<32x128xf32>
    %cst_118 = arith.constant dense<0.000000e+00> : vector<16x128xf32>
    %260 = tpu.matmul %257, %259, %cst_118 {dimension_numbers = #tpu.dot_dimension_numbers<[1], [0], [0], [1], [0, 0, 1, 1], [], []>} : vector<16x32xf32>, vector<32x128xf32>, vector<16x128xf32> -> vector<16x128xf32>
    %cst_119 = arith.constant dense<0.000000e+00> : vector<16x128xf32>
    %261 = tpu.matmul %3, %260, %cst_119 {dimension_numbers = #tpu.dot_dimension_numbers<[1], [0], [0], [1], [0, 0, 1, 1], [], []>} : vector<16x16xf32>, vector<16x128xf32>, vector<16x128xf32> -> vector<16x128xf32>
    %c3_120 = arith.constant 3 : index
    %c0_121 = arith.constant 0 : index
    %c0_122 = arith.constant 0 : index
    %262 = vector.load %arg4[%c3_120, %c0_121, %c0_122] : memref<6x32x128xf32, #tpu.memory_space<vmem>>, vector<1x32x128xf32>
    %263 = vector.shape_cast %262 : vector<1x32x128xf32> to vector<32x128xf32>
    %cst_123 = arith.constant dense<0.000000e+00> : vector<16x128xf32>
    %264 = tpu.matmul %186, %263, %cst_123 {dimension_numbers = #tpu.dot_dimension_numbers<[1], [0], [0], [1], [0, 0, 1, 1], [], []>} : vector<16x32xf32>, vector<32x128xf32>, vector<16x128xf32> -> vector<16x128xf32>
    %265 = arith.addf %261, %264 : vector<16x128xf32>
    %266 = arith.addf %265, %16 : vector<16x128xf32>
    %267 = vector.extract_strided_slice %266 {offsets = [0, 0], sizes = [16, 32], strides = [1, 1]} : vector<16x128xf32> to vector<16x32xf32>
    %268 = arith.negf %267 : vector<16x32xf32>
    %269 = math.exp %268 : vector<16x32xf32>
    %cst_124 = arith.constant 1.000000e+00 : f32
    %270 = vector.broadcast %cst_124 : f32 to vector<16x32xf32>
    %271 = arith.addf %270, %269 : vector<16x32xf32>
    %272 = arith.divf %270, %271 : vector<16x32xf32>
    %273 = vector.extract_strided_slice %266 {offsets = [0, 32], sizes = [16, 32], strides = [1, 1]} : vector<16x128xf32> to vector<16x32xf32>
    %274 = arith.negf %273 : vector<16x32xf32>
    %275 = math.exp %274 : vector<16x32xf32>
    %cst_125 = arith.constant 1.000000e+00 : f32
    %276 = vector.broadcast %cst_125 : f32 to vector<16x32xf32>
    %277 = arith.addf %276, %275 : vector<16x32xf32>
    %278 = arith.divf %276, %277 : vector<16x32xf32>
    %279 = vector.extract_strided_slice %266 {offsets = [0, 64], sizes = [16, 32], strides = [1, 1]} : vector<16x128xf32> to vector<16x32xf32>
    %280 = math.tanh %279 : vector<16x32xf32>
    %281 = vector.extract_strided_slice %266 {offsets = [0, 96], sizes = [16, 32], strides = [1, 1]} : vector<16x128xf32> to vector<16x32xf32>
    %282 = arith.negf %281 : vector<16x32xf32>
    %283 = math.exp %282 : vector<16x32xf32>
    %cst_126 = arith.constant 1.000000e+00 : f32
    %284 = vector.broadcast %cst_126 : f32 to vector<16x32xf32>
    %285 = arith.addf %284, %283 : vector<16x32xf32>
    %286 = arith.divf %284, %285 : vector<16x32xf32>
    %287 = arith.mulf %278, %184 : vector<16x32xf32>
    %288 = arith.mulf %272, %280 : vector<16x32xf32>
    %289 = arith.addf %287, %288 : vector<16x32xf32>
    %290 = math.tanh %289 : vector<16x32xf32>
    %291 = arith.mulf %286, %290 : vector<16x32xf32>
    %c2_127 = arith.constant 2 : index
    %c0_128 = arith.constant 0 : index
    %c0_129 = arith.constant 0 : index
    %292 = vector.load %arg3[%c2_127, %c0_128, %c0_129] : memref<7x32x32xf32, #tpu.memory_space<vmem>>, vector<1x32x32xf32>
    %293 = vector.shape_cast %292 : vector<1x32x32xf32> to vector<32x32xf32>
    %cst_130 = arith.constant dense<0.000000e+00> : vector<16x32xf32>
    %294 = tpu.matmul %291, %293, %cst_130 {dimension_numbers = #tpu.dot_dimension_numbers<[1], [0], [0], [1], [0, 0, 1, 1], [], []>} : vector<16x32xf32>, vector<32x32xf32>, vector<16x32xf32> -> vector<16x32xf32>
    %295 = vector.extract_strided_slice %4 {offsets = [4, 0], sizes = [1, 32], strides = [1, 1]} : vector<8x32xf32> to vector<1x32xf32>
    %296 = vector.broadcast %295 : vector<1x32xf32> to vector<16x32xf32>
    %297 = arith.addf %294, %296 : vector<16x32xf32>
    %cst_131 = arith.constant 0.000000e+00 : f32
    %298 = vector.broadcast %cst_131 : f32 to vector<16x32xf32>
    %299 = arith.maximumf %297, %298 : vector<16x32xf32>
    %c3_132 = arith.constant 3 : index
    %c0_133 = arith.constant 0 : index
    %c0_134 = arith.constant 0 : index
    %300 = vector.load %arg3[%c3_132, %c0_133, %c0_134] : memref<7x32x32xf32, #tpu.memory_space<vmem>>, vector<1x32x32xf32>
    %301 = vector.shape_cast %300 : vector<1x32x32xf32> to vector<32x32xf32>
    %cst_135 = arith.constant dense<0.000000e+00> : vector<16x32xf32>
    %302 = tpu.matmul %299, %301, %cst_135 {dimension_numbers = #tpu.dot_dimension_numbers<[1], [0], [0], [1], [0, 0, 1, 1], [], []>} : vector<16x32xf32>, vector<32x32xf32>, vector<16x32xf32> -> vector<16x32xf32>
    %303 = vector.extract_strided_slice %4 {offsets = [5, 0], sizes = [1, 32], strides = [1, 1]} : vector<8x32xf32> to vector<1x32xf32>
    %304 = vector.broadcast %303 : vector<1x32xf32> to vector<16x32xf32>
    %305 = arith.addf %302, %304 : vector<16x32xf32>
    %cst_136 = arith.constant 0.000000e+00 : f32
    %306 = vector.broadcast %cst_136 : f32 to vector<16x32xf32>
    %307 = arith.maximumf %305, %306 : vector<16x32xf32>
    %c1_137 = arith.constant 1 : index
    %c0_138 = arith.constant 0 : index
    %c0_139 = arith.constant 0 : index
    %308 = vector.load %arg4[%c1_137, %c0_138, %c0_139] : memref<6x32x128xf32, #tpu.memory_space<vmem>>, vector<1x32x128xf32>
    %309 = vector.shape_cast %308 : vector<1x32x128xf32> to vector<32x128xf32>
    %cst_140 = arith.constant dense<0.000000e+00> : vector<16x128xf32>
    %310 = tpu.matmul %307, %309, %cst_140 {dimension_numbers = #tpu.dot_dimension_numbers<[1], [0], [0], [1], [0, 0, 1, 1], [], []>} : vector<16x32xf32>, vector<32x128xf32>, vector<16x128xf32> -> vector<16x128xf32>
    %c8_i32_141 = arith.constant 8 : i32
    %311 = tpu.dynamic_rotate %241 by %c8_i32_141 dim 0 : vector<16x32xf32>, i32 -> vector<16x32xf32>
    %cst_142 = arith.constant dense<0.000000e+00> : vector<16x128xf32>
    %312 = tpu.matmul %1, %310, %cst_142 {dimension_numbers = #tpu.dot_dimension_numbers<[1], [0], [0], [1], [0, 0, 1, 1], [], []>} : vector<16x16xf32>, vector<16x128xf32>, vector<16x128xf32> -> vector<16x128xf32>
    %c2_143 = arith.constant 2 : index
    %c0_144 = arith.constant 0 : index
    %c0_145 = arith.constant 0 : index
    %313 = vector.load %arg4[%c2_143, %c0_144, %c0_145] : memref<6x32x128xf32, #tpu.memory_space<vmem>>, vector<1x32x128xf32>
    %314 = vector.shape_cast %313 : vector<1x32x128xf32> to vector<32x128xf32>
    %cst_146 = arith.constant dense<0.000000e+00> : vector<16x128xf32>
    %315 = tpu.matmul %311, %314, %cst_146 {dimension_numbers = #tpu.dot_dimension_numbers<[1], [0], [0], [1], [0, 0, 1, 1], [], []>} : vector<16x32xf32>, vector<32x128xf32>, vector<16x128xf32> -> vector<16x128xf32>
    %316 = arith.addf %312, %315 : vector<16x128xf32>
    %c4_147 = arith.constant 4 : index
    %c0_148 = arith.constant 0 : index
    %c0_149 = arith.constant 0 : index
    %317 = vector.load %arg4[%c4_147, %c0_148, %c0_149] : memref<6x32x128xf32, #tpu.memory_space<vmem>>, vector<1x32x128xf32>
    %318 = vector.shape_cast %317 : vector<1x32x128xf32> to vector<32x128xf32>
    %cst_150 = arith.constant dense<0.000000e+00> : vector<16x128xf32>
    %319 = tpu.matmul %241, %318, %cst_150 {dimension_numbers = #tpu.dot_dimension_numbers<[1], [0], [0], [1], [0, 0, 1, 1], [], []>} : vector<16x32xf32>, vector<32x128xf32>, vector<16x128xf32> -> vector<16x128xf32>
    %320 = arith.addf %316, %319 : vector<16x128xf32>
    %321 = arith.addf %320, %23 : vector<16x128xf32>
    %322 = vector.extract_strided_slice %321 {offsets = [0, 0], sizes = [16, 32], strides = [1, 1]} : vector<16x128xf32> to vector<16x32xf32>
    %323 = arith.negf %322 : vector<16x32xf32>
    %324 = math.exp %323 : vector<16x32xf32>
    %cst_151 = arith.constant 1.000000e+00 : f32
    %325 = vector.broadcast %cst_151 : f32 to vector<16x32xf32>
    %326 = arith.addf %325, %324 : vector<16x32xf32>
    %327 = arith.divf %325, %326 : vector<16x32xf32>
    %328 = vector.extract_strided_slice %321 {offsets = [0, 32], sizes = [16, 32], strides = [1, 1]} : vector<16x128xf32> to vector<16x32xf32>
    %329 = arith.negf %328 : vector<16x32xf32>
    %330 = math.exp %329 : vector<16x32xf32>
    %cst_152 = arith.constant 1.000000e+00 : f32
    %331 = vector.broadcast %cst_152 : f32 to vector<16x32xf32>
    %332 = arith.addf %331, %330 : vector<16x32xf32>
    %333 = arith.divf %331, %332 : vector<16x32xf32>
    %334 = vector.extract_strided_slice %321 {offsets = [0, 64], sizes = [16, 32], strides = [1, 1]} : vector<16x128xf32> to vector<16x32xf32>
    %335 = math.tanh %334 : vector<16x32xf32>
    %336 = vector.extract_strided_slice %321 {offsets = [0, 96], sizes = [16, 32], strides = [1, 1]} : vector<16x128xf32> to vector<16x32xf32>
    %337 = arith.negf %336 : vector<16x32xf32>
    %338 = math.exp %337 : vector<16x32xf32>
    %cst_153 = arith.constant 1.000000e+00 : f32
    %339 = vector.broadcast %cst_153 : f32 to vector<16x32xf32>
    %340 = arith.addf %339, %338 : vector<16x32xf32>
    %341 = arith.divf %339, %340 : vector<16x32xf32>
    %342 = arith.mulf %333, %239 : vector<16x32xf32>
    %343 = arith.mulf %327, %335 : vector<16x32xf32>
    %344 = arith.addf %342, %343 : vector<16x32xf32>
    %345 = math.tanh %344 : vector<16x32xf32>
    %346 = arith.mulf %341, %345 : vector<16x32xf32>
    %c0_154 = arith.constant 0 : index
    %c0_155 = arith.constant 0 : index
    %c0_156 = arith.constant 0 : index
    %347 = vector.load %arg3[%c0_154, %c0_155, %c0_156] : memref<7x32x32xf32, #tpu.memory_space<vmem>>, vector<1x32x32xf32>
    %348 = vector.shape_cast %347 : vector<1x32x32xf32> to vector<32x32xf32>
    %cst_157 = arith.constant dense<0.000000e+00> : vector<16x32xf32>
    %349 = tpu.matmul %346, %348, %cst_157 {dimension_numbers = #tpu.dot_dimension_numbers<[1], [0], [0], [1], [0, 0, 1, 1], [], []>} : vector<16x32xf32>, vector<32x32xf32>, vector<16x32xf32> -> vector<16x32xf32>
    %350 = vector.extract_strided_slice %4 {offsets = [2, 0], sizes = [1, 32], strides = [1, 1]} : vector<8x32xf32> to vector<1x32xf32>
    %351 = vector.broadcast %350 : vector<1x32xf32> to vector<16x32xf32>
    %352 = arith.addf %349, %351 : vector<16x32xf32>
    %cst_158 = arith.constant 0.000000e+00 : f32
    %353 = vector.broadcast %cst_158 : f32 to vector<16x32xf32>
    %354 = arith.maximumf %352, %353 : vector<16x32xf32>
    %c1_159 = arith.constant 1 : index
    %c0_160 = arith.constant 0 : index
    %c0_161 = arith.constant 0 : index
    %355 = vector.load %arg3[%c1_159, %c0_160, %c0_161] : memref<7x32x32xf32, #tpu.memory_space<vmem>>, vector<1x32x32xf32>
    %356 = vector.shape_cast %355 : vector<1x32x32xf32> to vector<32x32xf32>
    %cst_162 = arith.constant dense<0.000000e+00> : vector<16x32xf32>
    %357 = tpu.matmul %354, %356, %cst_162 {dimension_numbers = #tpu.dot_dimension_numbers<[1], [0], [0], [1], [0, 0, 1, 1], [], []>} : vector<16x32xf32>, vector<32x32xf32>, vector<16x32xf32> -> vector<16x32xf32>
    %358 = vector.extract_strided_slice %4 {offsets = [3, 0], sizes = [1, 32], strides = [1, 1]} : vector<8x32xf32> to vector<1x32xf32>
    %359 = vector.broadcast %358 : vector<1x32xf32> to vector<16x32xf32>
    %360 = arith.addf %357, %359 : vector<16x32xf32>
    %cst_163 = arith.constant 0.000000e+00 : f32
    %361 = vector.broadcast %cst_163 : f32 to vector<16x32xf32>
    %362 = arith.maximumf %360, %361 : vector<16x32xf32>
    %c0_164 = arith.constant 0 : index
    %c0_165 = arith.constant 0 : index
    %c0_166 = arith.constant 0 : index
    %363 = vector.load %arg4[%c0_164, %c0_165, %c0_166] : memref<6x32x128xf32, #tpu.memory_space<vmem>>, vector<1x32x128xf32>
    %364 = vector.shape_cast %363 : vector<1x32x128xf32> to vector<32x128xf32>
    %cst_167 = arith.constant dense<0.000000e+00> : vector<16x128xf32>
    %365 = tpu.matmul %362, %364, %cst_167 {dimension_numbers = #tpu.dot_dimension_numbers<[1], [0], [0], [1], [0, 0, 1, 1], [], []>} : vector<16x32xf32>, vector<32x128xf32>, vector<16x128xf32> -> vector<16x128xf32>
    %cst_168 = arith.constant dense<0.000000e+00> : vector<16x128xf32>
    %366 = tpu.matmul %3, %365, %cst_168 {dimension_numbers = #tpu.dot_dimension_numbers<[1], [0], [0], [1], [0, 0, 1, 1], [], []>} : vector<16x16xf32>, vector<16x128xf32>, vector<16x128xf32> -> vector<16x128xf32>
    %c3_169 = arith.constant 3 : index
    %c0_170 = arith.constant 0 : index
    %c0_171 = arith.constant 0 : index
    %367 = vector.load %arg4[%c3_169, %c0_170, %c0_171] : memref<6x32x128xf32, #tpu.memory_space<vmem>>, vector<1x32x128xf32>
    %368 = vector.shape_cast %367 : vector<1x32x128xf32> to vector<32x128xf32>
    %cst_172 = arith.constant dense<0.000000e+00> : vector<16x128xf32>
    %369 = tpu.matmul %291, %368, %cst_172 {dimension_numbers = #tpu.dot_dimension_numbers<[1], [0], [0], [1], [0, 0, 1, 1], [], []>} : vector<16x32xf32>, vector<32x128xf32>, vector<16x128xf32> -> vector<16x128xf32>
    %370 = arith.addf %366, %369 : vector<16x128xf32>
    %371 = arith.addf %370, %16 : vector<16x128xf32>
    %372 = vector.extract_strided_slice %371 {offsets = [0, 0], sizes = [16, 32], strides = [1, 1]} : vector<16x128xf32> to vector<16x32xf32>
    %373 = arith.negf %372 : vector<16x32xf32>
    %374 = math.exp %373 : vector<16x32xf32>
    %cst_173 = arith.constant 1.000000e+00 : f32
    %375 = vector.broadcast %cst_173 : f32 to vector<16x32xf32>
    %376 = arith.addf %375, %374 : vector<16x32xf32>
    %377 = arith.divf %375, %376 : vector<16x32xf32>
    %378 = vector.extract_strided_slice %371 {offsets = [0, 32], sizes = [16, 32], strides = [1, 1]} : vector<16x128xf32> to vector<16x32xf32>
    %379 = arith.negf %378 : vector<16x32xf32>
    %380 = math.exp %379 : vector<16x32xf32>
    %cst_174 = arith.constant 1.000000e+00 : f32
    %381 = vector.broadcast %cst_174 : f32 to vector<16x32xf32>
    %382 = arith.addf %381, %380 : vector<16x32xf32>
    %383 = arith.divf %381, %382 : vector<16x32xf32>
    %384 = vector.extract_strided_slice %371 {offsets = [0, 64], sizes = [16, 32], strides = [1, 1]} : vector<16x128xf32> to vector<16x32xf32>
    %385 = math.tanh %384 : vector<16x32xf32>
    %386 = vector.extract_strided_slice %371 {offsets = [0, 96], sizes = [16, 32], strides = [1, 1]} : vector<16x128xf32> to vector<16x32xf32>
    %387 = arith.negf %386 : vector<16x32xf32>
    %388 = math.exp %387 : vector<16x32xf32>
    %cst_175 = arith.constant 1.000000e+00 : f32
    %389 = vector.broadcast %cst_175 : f32 to vector<16x32xf32>
    %390 = arith.addf %389, %388 : vector<16x32xf32>
    %391 = arith.divf %389, %390 : vector<16x32xf32>
    %392 = arith.mulf %383, %289 : vector<16x32xf32>
    %393 = arith.mulf %377, %385 : vector<16x32xf32>
    %394 = arith.addf %392, %393 : vector<16x32xf32>
    %395 = math.tanh %394 : vector<16x32xf32>
    %396 = arith.mulf %391, %395 : vector<16x32xf32>
    %c2_176 = arith.constant 2 : index
    %c0_177 = arith.constant 0 : index
    %c0_178 = arith.constant 0 : index
    %397 = vector.load %arg3[%c2_176, %c0_177, %c0_178] : memref<7x32x32xf32, #tpu.memory_space<vmem>>, vector<1x32x32xf32>
    %398 = vector.shape_cast %397 : vector<1x32x32xf32> to vector<32x32xf32>
    %cst_179 = arith.constant dense<0.000000e+00> : vector<16x32xf32>
    %399 = tpu.matmul %396, %398, %cst_179 {dimension_numbers = #tpu.dot_dimension_numbers<[1], [0], [0], [1], [0, 0, 1, 1], [], []>} : vector<16x32xf32>, vector<32x32xf32>, vector<16x32xf32> -> vector<16x32xf32>
    %400 = vector.extract_strided_slice %4 {offsets = [4, 0], sizes = [1, 32], strides = [1, 1]} : vector<8x32xf32> to vector<1x32xf32>
    %401 = vector.broadcast %400 : vector<1x32xf32> to vector<16x32xf32>
    %402 = arith.addf %399, %401 : vector<16x32xf32>
    %cst_180 = arith.constant 0.000000e+00 : f32
    %403 = vector.broadcast %cst_180 : f32 to vector<16x32xf32>
    %404 = arith.maximumf %402, %403 : vector<16x32xf32>
    %c3_181 = arith.constant 3 : index
    %c0_182 = arith.constant 0 : index
    %c0_183 = arith.constant 0 : index
    %405 = vector.load %arg3[%c3_181, %c0_182, %c0_183] : memref<7x32x32xf32, #tpu.memory_space<vmem>>, vector<1x32x32xf32>
    %406 = vector.shape_cast %405 : vector<1x32x32xf32> to vector<32x32xf32>
    %cst_184 = arith.constant dense<0.000000e+00> : vector<16x32xf32>
    %407 = tpu.matmul %404, %406, %cst_184 {dimension_numbers = #tpu.dot_dimension_numbers<[1], [0], [0], [1], [0, 0, 1, 1], [], []>} : vector<16x32xf32>, vector<32x32xf32>, vector<16x32xf32> -> vector<16x32xf32>
    %408 = vector.extract_strided_slice %4 {offsets = [5, 0], sizes = [1, 32], strides = [1, 1]} : vector<8x32xf32> to vector<1x32xf32>
    %409 = vector.broadcast %408 : vector<1x32xf32> to vector<16x32xf32>
    %410 = arith.addf %407, %409 : vector<16x32xf32>
    %cst_185 = arith.constant 0.000000e+00 : f32
    %411 = vector.broadcast %cst_185 : f32 to vector<16x32xf32>
    %412 = arith.maximumf %410, %411 : vector<16x32xf32>
    %c1_186 = arith.constant 1 : index
    %c0_187 = arith.constant 0 : index
    %c0_188 = arith.constant 0 : index
    %413 = vector.load %arg4[%c1_186, %c0_187, %c0_188] : memref<6x32x128xf32, #tpu.memory_space<vmem>>, vector<1x32x128xf32>
    %414 = vector.shape_cast %413 : vector<1x32x128xf32> to vector<32x128xf32>
    %cst_189 = arith.constant dense<0.000000e+00> : vector<16x128xf32>
    %415 = tpu.matmul %412, %414, %cst_189 {dimension_numbers = #tpu.dot_dimension_numbers<[1], [0], [0], [1], [0, 0, 1, 1], [], []>} : vector<16x32xf32>, vector<32x128xf32>, vector<16x128xf32> -> vector<16x128xf32>
    %c8_i32_190 = arith.constant 8 : i32
    %416 = tpu.dynamic_rotate %346 by %c8_i32_190 dim 0 : vector<16x32xf32>, i32 -> vector<16x32xf32>
    %cst_191 = arith.constant dense<0.000000e+00> : vector<16x128xf32>
    %417 = tpu.matmul %1, %415, %cst_191 {dimension_numbers = #tpu.dot_dimension_numbers<[1], [0], [0], [1], [0, 0, 1, 1], [], []>} : vector<16x16xf32>, vector<16x128xf32>, vector<16x128xf32> -> vector<16x128xf32>
    %c2_192 = arith.constant 2 : index
    %c0_193 = arith.constant 0 : index
    %c0_194 = arith.constant 0 : index
    %418 = vector.load %arg4[%c2_192, %c0_193, %c0_194] : memref<6x32x128xf32, #tpu.memory_space<vmem>>, vector<1x32x128xf32>
    %419 = vector.shape_cast %418 : vector<1x32x128xf32> to vector<32x128xf32>
    %cst_195 = arith.constant dense<0.000000e+00> : vector<16x128xf32>
    %420 = tpu.matmul %416, %419, %cst_195 {dimension_numbers = #tpu.dot_dimension_numbers<[1], [0], [0], [1], [0, 0, 1, 1], [], []>} : vector<16x32xf32>, vector<32x128xf32>, vector<16x128xf32> -> vector<16x128xf32>
    %421 = arith.addf %417, %420 : vector<16x128xf32>
    %c4_196 = arith.constant 4 : index
    %c0_197 = arith.constant 0 : index
    %c0_198 = arith.constant 0 : index
    %422 = vector.load %arg4[%c4_196, %c0_197, %c0_198] : memref<6x32x128xf32, #tpu.memory_space<vmem>>, vector<1x32x128xf32>
    %423 = vector.shape_cast %422 : vector<1x32x128xf32> to vector<32x128xf32>
    %cst_199 = arith.constant dense<0.000000e+00> : vector<16x128xf32>
    %424 = tpu.matmul %346, %423, %cst_199 {dimension_numbers = #tpu.dot_dimension_numbers<[1], [0], [0], [1], [0, 0, 1, 1], [], []>} : vector<16x32xf32>, vector<32x128xf32>, vector<16x128xf32> -> vector<16x128xf32>
    %425 = arith.addf %421, %424 : vector<16x128xf32>
    %426 = arith.addf %425, %23 : vector<16x128xf32>
    %427 = vector.extract_strided_slice %426 {offsets = [0, 0], sizes = [16, 32], strides = [1, 1]} : vector<16x128xf32> to vector<16x32xf32>
    %428 = arith.negf %427 : vector<16x32xf32>
    %429 = math.exp %428 : vector<16x32xf32>
    %cst_200 = arith.constant 1.000000e+00 : f32
    %430 = vector.broadcast %cst_200 : f32 to vector<16x32xf32>
    %431 = arith.addf %430, %429 : vector<16x32xf32>
    %432 = arith.divf %430, %431 : vector<16x32xf32>
    %433 = vector.extract_strided_slice %426 {offsets = [0, 32], sizes = [16, 32], strides = [1, 1]} : vector<16x128xf32> to vector<16x32xf32>
    %434 = arith.negf %433 : vector<16x32xf32>
    %435 = math.exp %434 : vector<16x32xf32>
    %cst_201 = arith.constant 1.000000e+00 : f32
    %436 = vector.broadcast %cst_201 : f32 to vector<16x32xf32>
    %437 = arith.addf %436, %435 : vector<16x32xf32>
    %438 = arith.divf %436, %437 : vector<16x32xf32>
    %439 = vector.extract_strided_slice %426 {offsets = [0, 64], sizes = [16, 32], strides = [1, 1]} : vector<16x128xf32> to vector<16x32xf32>
    %440 = math.tanh %439 : vector<16x32xf32>
    %441 = vector.extract_strided_slice %426 {offsets = [0, 96], sizes = [16, 32], strides = [1, 1]} : vector<16x128xf32> to vector<16x32xf32>
    %442 = arith.negf %441 : vector<16x32xf32>
    %443 = math.exp %442 : vector<16x32xf32>
    %cst_202 = arith.constant 1.000000e+00 : f32
    %444 = vector.broadcast %cst_202 : f32 to vector<16x32xf32>
    %445 = arith.addf %444, %443 : vector<16x32xf32>
    %446 = arith.divf %444, %445 : vector<16x32xf32>
    %447 = arith.mulf %438, %344 : vector<16x32xf32>
    %448 = arith.mulf %432, %440 : vector<16x32xf32>
    %449 = arith.addf %447, %448 : vector<16x32xf32>
    %450 = math.tanh %449 : vector<16x32xf32>
    %451 = arith.mulf %446, %450 : vector<16x32xf32>
    %452 = vector.extract_strided_slice %451 {offsets = [0, 0], sizes = [8, 32], strides = [1, 1]} : vector<16x32xf32> to vector<8x32xf32>
    %453 = vector.extract_strided_slice %451 {offsets = [8, 0], sizes = [8, 32], strides = [1, 1]} : vector<16x32xf32> to vector<8x32xf32>
    %c4_203 = arith.constant 4 : index
    %c0_204 = arith.constant 0 : index
    %c0_205 = arith.constant 0 : index
    %454 = vector.load %arg3[%c4_203, %c0_204, %c0_205] : memref<7x32x32xf32, #tpu.memory_space<vmem>>, vector<1x32x32xf32>
    %455 = vector.shape_cast %454 : vector<1x32x32xf32> to vector<32x32xf32>
    %cst_206 = arith.constant dense<0.000000e+00> : vector<8x32xf32>
    %456 = tpu.matmul %452, %455, %cst_206 {dimension_numbers = #tpu.dot_dimension_numbers<[1], [0], [0], [1], [0, 0, 1, 1], [], []>} : vector<8x32xf32>, vector<32x32xf32>, vector<8x32xf32> -> vector<8x32xf32>
    %c5 = arith.constant 5 : index
    %c0_207 = arith.constant 0 : index
    %c0_208 = arith.constant 0 : index
    %457 = vector.load %arg3[%c5, %c0_207, %c0_208] : memref<7x32x32xf32, #tpu.memory_space<vmem>>, vector<1x32x32xf32>
    %458 = vector.shape_cast %457 : vector<1x32x32xf32> to vector<32x32xf32>
    %cst_209 = arith.constant dense<0.000000e+00> : vector<8x32xf32>
    %459 = tpu.matmul %453, %458, %cst_209 {dimension_numbers = #tpu.dot_dimension_numbers<[1], [0], [0], [1], [0, 0, 1, 1], [], []>} : vector<8x32xf32>, vector<32x32xf32>, vector<8x32xf32> -> vector<8x32xf32>
    %460 = arith.addf %456, %459 : vector<8x32xf32>
    %461 = vector.extract_strided_slice %4 {offsets = [6, 0], sizes = [1, 32], strides = [1, 1]} : vector<8x32xf32> to vector<1x32xf32>
    %462 = vector.broadcast %461 : vector<1x32xf32> to vector<8x32xf32>
    %463 = arith.addf %460, %462 : vector<8x32xf32>
    %cst_210 = arith.constant 0.000000e+00 : f32
    %464 = vector.broadcast %cst_210 : f32 to vector<8x32xf32>
    %465 = arith.maximumf %463, %464 : vector<8x32xf32>
    %c6 = arith.constant 6 : index
    %c0_211 = arith.constant 0 : index
    %c0_212 = arith.constant 0 : index
    %466 = vector.load %arg3[%c6, %c0_211, %c0_212] : memref<7x32x32xf32, #tpu.memory_space<vmem>>, vector<1x32x32xf32>
    %467 = vector.shape_cast %466 : vector<1x32x32xf32> to vector<32x32xf32>
    %cst_213 = arith.constant dense<0.000000e+00> : vector<8x32xf32>
    %468 = tpu.matmul %465, %467, %cst_213 {dimension_numbers = #tpu.dot_dimension_numbers<[1], [0], [0], [1], [0, 0, 1, 1], [], []>} : vector<8x32xf32>, vector<32x32xf32>, vector<8x32xf32> -> vector<8x32xf32>
    %469 = vector.extract_strided_slice %4 {offsets = [7, 0], sizes = [1, 32], strides = [1, 1]} : vector<8x32xf32> to vector<1x32xf32>
    %470 = vector.broadcast %469 : vector<1x32xf32> to vector<8x32xf32>
    %471 = arith.addf %468, %470 : vector<8x32xf32>
    %cst_214 = arith.constant 0.000000e+00 : f32
    %472 = vector.broadcast %cst_214 : f32 to vector<8x32xf32>
    %473 = arith.maximumf %471, %472 : vector<8x32xf32>
    %c5_215 = arith.constant 5 : index
    %c0_216 = arith.constant 0 : index
    %c0_217 = arith.constant 0 : index
    %474 = vector.load %arg4[%c5_215, %c0_216, %c0_217] : memref<6x32x128xf32, #tpu.memory_space<vmem>>, vector<1x32x128xf32>
    %475 = vector.shape_cast %474 : vector<1x32x128xf32> to vector<32x128xf32>
    %cst_218 = arith.constant dense<0.000000e+00> : vector<8x128xf32>
    %476 = tpu.matmul %473, %475, %cst_218 {dimension_numbers = #tpu.dot_dimension_numbers<[1], [0], [0], [1], [0, 0, 1, 1], [], []>} : vector<8x32xf32>, vector<32x128xf32>, vector<8x128xf32> -> vector<8x128xf32>
    %477 = vector.extract_strided_slice %5 {offsets = [4, 0], sizes = [1, 128], strides = [1, 1]} : vector<5x128xf32> to vector<1x128xf32>
    %478 = vector.broadcast %477 : vector<1x128xf32> to vector<8x128xf32>
    %479 = arith.addf %476, %478 : vector<8x128xf32>
    %c0_219 = arith.constant 0 : index
    %c0_220 = arith.constant 0 : index
    %c0_221 = arith.constant 0 : index
    %480 = vector.load %arg7[%c0_219, %c0_220, %c0_221] : memref<1x8x128xf32, #tpu.memory_space<vmem>>, vector<1x8x128xf32>
    %481 = vector.shape_cast %480 : vector<1x8x128xf32> to vector<8x128xf32>
    %482 = vector.shape_cast %479 : vector<8x128xf32> to vector<1x8x128xf32>
    tpu.vector_store %arg7[%c0_219, %c0_220, %c0_221], %482 {strides = array<i32>} : memref<1x8x128xf32, #tpu.memory_space<vmem>>, vector<1x8x128xf32>,
    return
  }
  func.func @transform_0(%arg0: i32) -> (i32, i32, i32) {
    %c0_i32 = arith.constant 0 : i32
    %c0_i32_0 = arith.constant 0 : i32
    %c0_i32_1 = arith.constant 0 : i32
    return %arg0, %c0_i32, %c0_i32_0 : i32, i32, i32
  }
  func.func @transform_1(%arg0: i32) -> (i32, i32, i32) {
    %c0_i32 = arith.constant 0 : i32
    %c0_i32_0 = arith.constant 0 : i32
    %c0_i32_1 = arith.constant 0 : i32
    return %arg0, %c0_i32, %c0_i32_0 : i32, i32, i32
  }
  func.func @transform_2(%arg0: i32) -> (i32, i32, i32) {
    %c0_i32 = arith.constant 0 : i32
    %c0_i32_0 = arith.constant 0 : i32
    %c0_i32_1 = arith.constant 0 : i32
    %c0_i32_2 = arith.constant 0 : i32
    return %c0_i32, %c0_i32_0, %c0_i32_1 : i32, i32, i32
  }
  func.func @transform_3(%arg0: i32) -> (i32, i32, i32) {
    %c0_i32 = arith.constant 0 : i32
    %c0_i32_0 = arith.constant 0 : i32
    %c0_i32_1 = arith.constant 0 : i32
    %c0_i32_2 = arith.constant 0 : i32
    return %c0_i32, %c0_i32_0, %c0_i32_1 : i32, i32, i32
  }
  func.func @transform_4(%arg0: i32) -> (i32, i32) {
    %c0_i32 = arith.constant 0 : i32
    %c0_i32_0 = arith.constant 0 : i32
    %c0_i32_1 = arith.constant 0 : i32
    return %c0_i32, %c0_i32_0 : i32, i32
  }
  func.func @transform_5(%arg0: i32) -> (i32, i32) {
    %c0_i32 = arith.constant 0 : i32
    %c0_i32_0 = arith.constant 0 : i32
    %c0_i32_1 = arith.constant 0 : i32
    return %c0_i32, %c0_i32_0 : i32, i32
  }
  func.func @transform_6(%arg0: i32) -> (i32, i32, i32) {
    %c0_i32 = arith.constant 0 : i32
    %c0_i32_0 = arith.constant 0 : i32
    %c0_i32_1 = arith.constant 0 : i32
    return %arg0, %c0_i32, %c0_i32_0 : i32, i32, i32
  }
}

</mosaic_0001>

<bundles_post_ra>
// kernel: tpu_custom_call.1
= control target key start
LH: loop header
LB: loop body
LE: loop exit
PB: predicated region body
PF: predicated region fallthrough
CT: control target
= control target key end

     0   :  { %s4036_s0 = inlined_call_operand.hbm [shape: f32[4,16,16], index: 0, kind: input, shape index: {}]   ;;  %s4037_s1 = inlined_call_operand.hbm [shape: f32[4,16,16], index: 1, kind: input, shape index: {}]   ;;  %s4038_s2 = inlined_call_operand.hbm [shape: f32[7,32,32], index: 2, kind: input, shape index: {}]   ;;  %s4039_s3 = inlined_call_operand.hbm [shape: f32[6,32,128], index: 3, kind: input, shape index: {}]   ;;  %s4040_s4 = inlined_call_operand.hbm [shape: f32[8,32], index: 4, kind: input, shape index: {}]   ;;  %s4041_s5 = inlined_call_operand.hbm [shape: f32[5,128], index: 5, kind: input, shape index: {}]   ;;  %s4042_s6 = inlined_call_operand.hbm [shape: f32[4,8,128], index: 6, kind: output, shape index: {}]  }
   0x1   :  { %4055 = sst [smem:[#allocation26_spill]] %s4036_s0 }
   0x2   :  { %4056 = sst [smem:[#allocation27_spill]] %s4038_s2 }
   0x3   :  { %4057 = sst [smem:[#allocation28_spill]] %s4039_s3 }
   0x4   :  { %4058 = sst [smem:[#allocation29_spill]] %s4040_s4 }
   0x5   :  { %4059 = sst [smem:[#allocation30_spill]] %s4041_s5 }
   0x6   :  { %11 = vsyncpa [#allocation3], 0 }
   0x7   :  { %13 = vsyncpa [#allocation3 + $0x1], 0 }
   0x8   :  { %14 = vsyncpa [#allocation6], 0 }
   0x9   :  { %16 = vsyncpa [#allocation6 + $0x1], 0 }
   0xa   :  { %17 = vsyncpa [#allocation9], 0 }
   0xb   :  { %18 = vsyncpa [#allocation12], 0 }
   0xc   :  { %19 = vsyncpa [#allocation4], 0 }
   0xd   :  { %21 = vsyncpa [#allocation4 + $0x1], 0  ;;  %s3271_s21 = smov 0   ;;  %s3273_s22 = smov 0  }
   0xe   :  { %s3275_s23 = smov 0   ;;  %s3277_s24 = smov 0  }
   0xf LB: > { %s3292_s25 = sadd.s32 4294967295, %s3226_s24   ;;  %s2571_s26 = sadd.s32 4294967294, %s3226_s24   ;;  %s3226_s24 = sphi %s3277_s24, %s4088_s24   ;;  %s3222_s23 = sphi %s3275_s23, %s4087_s23   ;;  %s3218_s22 = sphi %s3273_s22, %s4086_s22   ;;  %s3214_s21 = sphi %s3271_s21, %s4085_s21  }
  0x10   : > { %p47_p0 = scmp.ne.s32.totalorder %s3218_s22, %s3214_s21  ;;  %p48_p1 = scmp.eq.s32.totalorder %s3292_s25, 0 }
  0x11   : > { %p181_p2 = scmp.eq.s32.totalorder %s3292_s25, 3  ;;  %p187_p3 = scmp.eq.s32.totalorder %s2571_s26, 3 }
  0x12   : > { %p3301_p4 = por %p48_p1, %p47_p0  ;;  %p2572_p5 = scmp.ge.s32.totalorder %s3226_s24, 1 }
  0x13   : > { %p3306_p6 = por %p187_p3, %p47_p0  ;;  %p194_p7 = scmp.lt.s32.totalorder %s3226_s24, 5 }
  0x14   : > { %s4062_s2 = sld [smem:[#allocation27_spill]]  ;;  %s3228_s9 = smov [#allocation7]  }
  0x15   : > { %p3314_p8 = pnand %p2572_p5, %p194_p7  ;;  %s207_s10 = sshll.u32 %s3228_s9, 4  ;;  %s208_s10 = int_to_ptr.vmem [resolvable:$true] %s207_s10 }
  0x16   : > { %s4065_s3 = sld [smem:[#allocation28_spill]]  ;;  %s4043_s15 = smov 128  }
  0x17   : > { %p2728_p9 = pneg %p3314_p8  ;;  %s4045_s16 = smov 8  }
  0x18   : > { %s3231_s17 = smov [#allocation8]   ;;  %s4066_s4 = sld [smem:[#allocation29_spill]] }
  0x19   : > { %p3322_p10 = pnand %p2728_p9, %p48_p1  ;;  %s221_s18 = sshll.u32 %s3231_s17, 4  ;;  %s222_s18 = int_to_ptr.vmem [resolvable:$true] %s221_s18 }
  0x1a   : > { %s205_s7 = sshll.u32 %s4062_s2, 4  ;;  %s4067_s5 = sld [smem:[#allocation30_spill]]  ;;  %s206_s7 = int_to_ptr.hbm [resolvable:$true] %s205_s7 }
  0x1b   : > { %2731 = dma.hbm_to_vmem [thread:$0]  (!%p3322_p10), %s206_s7, 3584, %s208_s10, [#allocation6], %s4043_s15, %s4043_s15, %s4045_s16  }
  0x1c   : > { %s219_s14 = sshll.u32 %s4065_s3, 4  ;;  %s3232_s9 = smov [#allocation10]   ;;  %s220_s14 = int_to_ptr.hbm [resolvable:$true] %s219_s14 }
  0x1d   : > { %2734 = dma.hbm_to_vmem [thread:$0]  (!%p3322_p10), %s220_s14, 3072, %s222_s18, [#allocation9], %s4043_s15, %s4043_s15, %s4045_s16  }
  0x1e   : > { %s234_s26 = sshll.u32 %s4066_s4, 4  ;;  %s236_s10 = sshll.u32 %s3232_s9, 4  ;;  %s235_s26 = int_to_ptr.hbm [resolvable:$true] %s234_s26  ;;  %s237_s10 = int_to_ptr.vmem [resolvable:$true] %s236_s10 }
  0x1f   : > { %2737 = dma.hbm_to_vmem [thread:$0]  (!%p3322_p10), %s235_s26, 128, %s237_s10, [#allocation9]  }
  0x20   : > { %s246_s7 = sshll.u32 %s4067_s5, 4  ;;  %s3233_s12 = smov [#allocation11]   ;;  %s247_s7 = int_to_ptr.hbm [resolvable:$true] %s246_s7 }
  0x21   : > { %s248_s13 = sshll.u32 %s3233_s12, 4  ;;  %s3350_s14 = sadd.s32 1, %s3226_s24   ;;  %s249_s13 = int_to_ptr.vmem [resolvable:$true] %s248_s13 }
  0x22   : > { %2740 = dma.hbm_to_vmem [thread:$0]  (!%p3322_p10), %s247_s7, 128, %s249_s13, [#allocation12]  }
  0x23   : > { %s34_s17 = sadd.s32 1, %s3222_s23  ;;  %s31_s18 = ssub.s32 %s3226_s24, %s3350_s14 }
  0x24   : > { %p41_p11 = scmp.ne.s32.totalorder %s3222_s23, %s3218_s22  ;;  %p32_p12 = scmp.eq.s32.totalorder %s31_s18, 0 }
  0x25   : > { %p42_p13 = scmp.eq.s32.totalorder %s3226_s24, 0  ;;  %p2756_p3 = scmp.lt.s32.totalorder %s3226_s24, 4 }
  0x26   : > { %p3360_p0 = por %p181_p2, %p41_p11  ;;  %s259_s26 = sand.u32 1, %s3222_s23  }
  0x27   : > { %s3366_s20 = scalar_select %p32_p12, %s3222_s23, %s34_s17  }
  0x28   : > { %p43_p5 = por %p42_p13, %p41_p11  ;;  %s3369_s11 = sshll.u32 %s259_s26, 4 }
  0x29   : > { %s2704_s29 = sshll.u32 %s3226_s24, 4  ;;  %s4069_s0 = sld [smem:[#allocation26_spill]] }
  0x2a   : > { %s263_s10 = scalar_lea.vmem [#allocation2], %s3369_s11  ;;  %p3376_p2 = pnand %p2756_p3, %p43_p5 }
  0x2b   : > { %s271_s12 = sshll.u32 %s263_s10, 4  ;;  %s290_s16 = scalar_lea.hbm %s4037_s1, %s2704_s29  ;;  %s272_s12 = int_to_ptr.vmem [resolvable:$true] %s271_s12 }
  0x2c   : > { %s291_s2 = sshll.u32 %s290_s16, 4  ;;  %s260_s3 = scalar_lea.sflag [#allocation3], %s259_s26  ;;  %s292_s2 = int_to_ptr.hbm [resolvable:$true] %s291_s2 }
  0x2d   : > { %p3088_p9 = pneg %p3376_p2 }
  0x2f   : > { %s268_s9 = scalar_lea.hbm %s4069_s0, %s2704_s29  ;;  %s3091_s10 = scalar_lea.hbm %s4069_s0, 64 }
  0x30   : > { %s269_s13 = sshll.u32 %s268_s9, 4  ;;  %s270_s13 = int_to_ptr.hbm [resolvable:$true] %s269_s13 }
  0x31   : > { %s3084_s4 = sshra.s32 %s270_s13, 4  ;;  %s3085_s4 = int_to_ptr.hbm [resolvable:$true] %s3084_s4 }
  0x32   : > { %s3086_s30 = scalar_lea.hbm %s3085_s4, 16  ;;  %p3092_p12 = scmp.lt.s32.totalorder %s3085_s4, %s4069_s0 }
  0x33   : > { %p3087_p7 = scmp.ne.s32.totalorder %s3085_s4, %s3086_s30  ;;  %p3093_p13 = scmp.lt.s32.totalorder %s3091_s10, %s3086_s30 }
  0x35   : > { %p3089_p10 = pnand %p3088_p9, %p3087_p7  ;;  %p3094_p3 = por %p3093_p13, %p3092_p12 }
  0x37   : > { %p3090_p11 = pneg %p3089_p10 }
  0x39   : > { %p3095_p5 = pnand %p3094_p3, %p3090_p11 }
  0x3b   : > { %3098 = shalt.err (!%p3095_p5)
}
  0x3c   : > { %s4071_s16 = smov 8   ;;  %s4072_s26 = smov 128  }
  0x3d   : > { %2744 = dma.hbm_to_vmem [thread:$0]  (!%p3376_p2), %s270_s13, 256, %s272_s12, %s260_s3, %s4072_s26, %s4072_s26, %s4071_s16  }
  0x3e   : > { %s285_s29 = scalar_lea.vmem [#allocation5], %s3369_s11  ;;  %s281_s9 = sand.u32 1, %s3226_s24  }
  0x3f   : > { %s293_s7 = sshll.u32 %s285_s29, 4  ;;  %s282_s15 = scalar_lea.sflag [#allocation6], %s281_s9  ;;  %s294_s7 = int_to_ptr.vmem [resolvable:$true] %s293_s7 }
  0x40   : > { %s3114_s4 = sshra.s32 %s292_s2, 4  ;;  %s3121_s0 = scalar_lea.hbm %s4037_s1, 64  ;;  %s3115_s4 = int_to_ptr.hbm [resolvable:$true] %s3114_s4 }
  0x41   : > { %s3116_s30 = scalar_lea.hbm %s3115_s4, 16  ;;  %p3122_p12 = scmp.lt.s32.totalorder %s3115_s4, %s4037_s1 }
  0x42   : > { %p3117_p7 = scmp.ne.s32.totalorder %s3115_s4, %s3116_s30  ;;  %p3123_p13 = scmp.lt.s32.totalorder %s3121_s0, %s3116_s30 }
  0x44   : > { %p3119_p10 = pnand %p3117_p7, %p3088_p9  ;;  %p3124_p3 = por %p3123_p13, %p3122_p12 }
  0x46   : > { %p3120_p11 = pneg %p3119_p10 }
  0x48   : > { %p3125_p5 = pnand %p3124_p3, %p3120_p11 }
  0x4a   : > { %3128 = shalt.err (!%p3125_p5)
}
  0x4b   : > { %2747 = dma.hbm_to_vmem [thread:$0]  (!%p3376_p2), %s292_s2, 256, %s294_s7, %s282_s15, %s4072_s26, %s4072_s26, %s4071_s16  }
  0x4c   : > { %305 = sbr.rel (%p3314_p8) target bundleno = 8507 (0x213b), region = 44 }
  0x51   : > { %s3418_s11 = sand.u32 1, %s3218_s22  }
  0x52   : > { %s2585_s5 = sshll.u32 %s3418_s11, 4  ;;  %s308_s0 = scalar_lea.sflag [#allocation3], %s3418_s11 }
  0x53   : > { %s3422_s12 = scalar_lea.vmem [#allocation2], %s2585_s5 }
  0x54   : > { %3189 = dma.done.wait (%p3301_p4), %s308_s0, 256  }
  0x55   : > { %3191 = vsyncadd (%p3301_p4), %s308_s0, 4294967040  ;;  %s317_s2 = sand.u32 1, %s3292_s25   ;;  %s3429_s13 = scalar_lea.vmem [#allocation5], %s2585_s5 }
  0x56   : > { %s318_s8 = scalar_lea.sflag [#allocation6], %s317_s2 }
  0x57   : > { %3193 = dma.done.wait (%p3301_p4), %s318_s8, 256  }
  0x58   : > { %3195 = vsyncadd (%p3301_p4), %s318_s8, 4294967040 }
  0x59   : > { %3197 = dma.done.wait (%p48_p1), [#allocation6], 3584  }
  0x5a   : > { %3199 = vsyncadd (%p48_p1), [#allocation6], 4294963712 }
  0x5b   : > { %3201 = dma.done.wait (%p48_p1), [#allocation9], 3200  }
  0x5c   : > { %3203 = vsyncadd (%p48_p1), [#allocation9], 4294964096 }
  0x5d   : > { %3205 = dma.done.wait (%p48_p1), [#allocation12], 128  }
  0x5e   : > { %3207 = vsyncadd (%p48_p1), [#allocation12], 4294967168  ;;  %v3447_v0 = vld [vmem:[#allocation7 + $0x18] sm:$0xff]  ;;  %v3449_v1 = vld [vmem:[#allocation7 + $0x10] sm:$0xff]  ;;  %vm415_vm0 = vcmask 261120   ;;  %vm382_vm1 = vcmask 130048  }
  0x5f   : > { %430 = vmatpush.msra.mxu0 %v3447_v0  ;;  %v3452_v2 = vld [vmem:[#allocation10] sm:$0xff]  ;;  %v3454_v3 = vld [vmem:[#allocation7 + $0x38] sm:$0xff]  ;;  %v3456_v4 = vld [vmem:[#allocation7 + $0x8] sm:$0xff]  ;;  %s3234_s27 = smov 64   ;;  %s3235_s18 = smov 32  }
  0x60   : > { %467 = vmatpush.msra.mxu1 %v3454_v3  ;;  %v3460_v5 = vld [vmem:[#allocation7] sm:$0xff]  ;;  %v3463_v6 = vperm.slane %v3452_v2, 0  ;;  %v3471_v7 = vld [vmem:[#allocation7 + $0x30] sm:$0xff]  ;;  %v3474_v8 = vld [vmem:[#allocation7 + $0x28] sm:$0xff]  ;;  %v3484_v11 = vperm.slane %v3452_v2, 2  ;;  %v3503_v22 = vperm.slane %v3452_v2, 3 }
  0x61   : > { %431 = vmatpush.msra.mxu0 %v3449_v1  ;;  %v3477_v9 = vld [vmem:[#allocation7 + $0x20] sm:$0xff]  ;;  %v3480_v10 = vld [vmem:[#allocation8 + $0x18] sm:$0xff]  ;;  %v3490_v18 = vld [vmem:[#allocation8 + $0x10] sm:$0xff]  ;;  %v408_v32 = vperm.slane %v3452_v2, 1  ;;  %s2591_s16 = sshll.u32 %s3418_s11, 3  ;;  %s2701_s26 = sshll.u32 %s3292_s25, 3 }
  0x62   : > { %468 = vmatpush.msra.mxu1 %v3471_v7  ;;  %502 = vmatpush.msra.mxu2 %v3480_v10  ;;  %v3493_v19 = vld [vmem:[#allocation8 + $0x8] sm:$0xff]  ;;  %v3496_v20 = vld [vmem:[#allocation8] sm:$0xff]  ;;  %v3499_v21 = vld [vmem:[#allocation8 + $0x78] sm:$0xff]  ;;  %s2435_s9 = scalar_lea.hbm %s4042_s6, %s2701_s26  ;;  %s375_s15 = scalar_lea.vmem [#allocation13], %s2591_s16 }
  0x63   : > { %432 = vmatpush.msra.mxu0 %v3456_v4  ;;  %533 = vmatpush.msra.mxu3 %v3499_v21  ;;  %v3509_v29 = vld [vmem:[#allocation8 + $0x70] sm:$0xff]  ;;  %v3511_v30 = vld [vmem:[#allocation8 + $0x68] sm:$0xff]  ;;  %v3514_v31 = vld [vmem:[#allocation8 + $0x60] sm:$0xff]  ;;  %s2437_s4 = sshll.u32 %s375_s15, 4  ;;  %s2439_s30 = sshll.u32 %s2435_s9, 4  ;;  %s2438_s4 = int_to_ptr.vmem [resolvable:$true] %s2437_s4  ;;  %s2440_s30 = int_to_ptr.hbm [resolvable:$true] %s2439_s30 }
  0x64   : > { %469 = vmatpush.msra.mxu1 %v3474_v8  ;;  %503 = vmatpush.msra.mxu2 %v3490_v18  ;;  %v3522_v33 = vld [vmem:[%s3429_s13] sm:$0xff]  ;;  %v3527_v35 = vld [vmem:[%s3429_s13 + $0x8] sm:$0xff]  ;;  %s2425_s10 = scalar_lea.sflag [#allocation4], %s3418_s11  ;;  %s3158_s17 = sshra.s32 %s2440_s30, 4  ;;  %s3159_s17 = int_to_ptr.hbm [resolvable:$true] %s3158_s17 }
  0x65   : > { %433 = vmatpush.msra.mxu0 %v3460_v5  ;;  %534 = vmatpush.msra.mxu3 %v3509_v29  ;;  %v383_v34 = vsel %vm382_vm1, %v3522_v33, 0.0  ;;  %v386_v36 = vsel %vm382_vm1, %v3527_v35, 0.0  ;;  %v3535_v39 = vld [vmem:[#allocation11] sm:$0x1f]  ;;  %s3160_s3 = scalar_lea.hbm %s3159_s17, 8  ;;  %s3164_s0 = scalar_lea.hbm %s4042_s6, 32 }
  0x66   : > { %2592 = vmatmul.msk.f32.vlgmr.msra.gmra.mxu0 %vm415_vm0, %v3463_v6  ;;  %470 = vmatpush.msra.mxu1 %v3477_v9  ;;  %v395_v41 = vperm.slane %v3535_v39, 1  ;;  %v398_v42 = vperm.slane %v3535_v39, 0  ;;  %p3161_p1 = scmp.ne.s32.totalorder %s3159_s17, %s3160_s3  ;;  %p3165_p2 = scmp.lt.s32.totalorder %s3159_s17, %s4042_s6 }
  0x67   : > { %504 = vmatpush.msra.mxu2 %v3493_v19  ;;  %535 = vmatpush.msra.mxu3 %v3511_v30  ;;  %p3166_p9 = scmp.lt.s32.totalorder %s3164_s0, %s3160_s3 }
  0x68   : > { %384 = vadd.xlane.f32.xlu0 %v383_v34  ;;  %p3162_p4 = pnand %p3161_p1, %p3360_p0 }
  0x69   : > { %505 = vmatpush.msra.mxu2 %v3496_v20  ;;  %536 = vmatpush.msra.mxu3 %v3514_v31  ;;  %p3167_p7 = por %p3166_p9, %p3165_p2 }
  0x6a   : > { %2598 = vmatmul.msk.f32.vlgmr.msra.gmra.mxu3 %vm415_vm0, %v408_v32  ;;  %p3163_p8 = pneg %p3162_p4 }
  0x6c   : > { %p3168_p10 = pnand %p3167_p7, %p3163_p8 }
  0x6e   : > { %2593 = vmatmul.msk.f32.gmra.mxu0 %vm415_vm0, %v3463_v6 }
  0x70   : > { %387 = vadd.xlane.f32.xlu0 %v386_v36 }
  0x72   : > { %2599 = vmatmul.msk.f32.gmra.mxu3 %vm415_vm0, %v408_v32 }
  0xdb   : > { %v385_v40 = vpop.xlane.xlu0 %384 }
  0xdc   : > { %v396_v43 = vmul.f32 %v395_v41, %v385_v40 }
  0xde   : > { %v3539_v45 = vadd.f32 %v398_v42, %v396_v43 }
  0xe3   : > { %v435_v12 = vpop.f32.mrf.mxu0  ;;  %v388_v47 = vpop.xlane.xlu0 %387 }
  0xe4   : > { %v436_v13 = vadd.f32 %v435_v12, %v3484_v11  ;;  %v397_v50 = vmul.f32 %v395_v41, %v388_v47 }
  0xe6   : > { %v441_v14 = vmax.f32 %v436_v13, 0.0  ;;  %v3542_v52 = vadd.f32 %v398_v42, %v397_v50 }
  0xe8   : > { %2594 = vmatmul.msk.f32.vlgmr.msra.gmra.mxu1 %vm415_vm0, %v441_v14 }
  0xeb   : > { %v438_v15 = vpop.f32.mrf.mxu0 }
  0xec   : > { %v439_v16 = vadd.f32 %v438_v15, %v3484_v11 }
  0xed   : > { %v538_v44 = vpop.f32.mrf.mxu3 }
  0xee   : > { %v442_v17 = vmax.f32 %v439_v16, 0.0 }
  0xf0   : > { %2595 = vmatmul.msk.f32.gmra.mxu1 %vm415_vm0, %v442_v17 }
  0xf5   : > { %v541_v51 = vpop.f32.mrf.mxu3 }
 0x165   : > { %v472_v23 = vpop.f32.mrf.mxu1 }
 0x166   : > { %v473_v24 = vadd.f32 %v472_v23, %v3503_v22 }
 0x168   : > { %v478_v25 = vmax.f32 %v473_v24, 0.0 }
 0x16a   : > { %2596 = vmatmul.msk.f32.vlgmr.msra.gmra.mxu2 %vm415_vm0, %v478_v25 }
 0x16d   : > { %v475_v26 = vpop.f32.mrf.mxu1 }
 0x16e   : > { %v476_v27 = vadd.f32 %v475_v26, %v3503_v22 }
 0x170   : > { %v479_v28 = vmax.f32 %v476_v27, 0.0 }
 0x172   : > { %2597 = vmatmul.msk.f32.gmra.mxu2 %vm415_vm0, %v479_v28 }
 0x1ed   : > { %v507_v37 = vpop.f32.mrf.mxu2 }
 0x1f5   : > { %v510_v38 = vpop.f32.mrf.mxu2 }
 0x1f6   : > { %564 = vmatpush.msrb.mxu0 %v510_v38 }
 0x1f8   : > { %565 = vmatpush.msrb.mxu0 %v507_v37 }
 0x1f9   : > { %2600 = vmatmul.msk.f32.vlgmr.msrb.gmra.mxu0 %vm382_vm1, %v3522_v33 }
 0x201   : > { %2601 = vmatmul.msk.f32.gmra.mxu0 %vm382_vm1, %v3527_v35 }
 0x276   : > { %v567_v46 = vpop.f32.mrf.mxu0 }
 0x277   : > { %v568_v48 = vadd.f32 %v567_v46, %v538_v44 }
 0x279   : > { %v573_v49 = vadd.f32 %v568_v48, %v3539_v45 }
 0x27b   : > { %2802 = vtanh.f32 %v573_v49  ;;  %v2602_v58 = vmul.f32 -1.442695, %v573_v49 }
 0x27e   : > { %v570_v53 = vpop.f32.mrf.mxu0 }
 0x27f   : > { %v571_v54 = vadd.f32 %v570_v53, %v541_v51 }
 0x281   : > { %v2803_v55 = vpop.eup %2802  ;;  %v574_v56 = vadd.f32 %v571_v54, %v3542_v52 }
 0x282   : > { %619 = vrot.lane.b32.xlu1 %v2803_v55, %s3234_s27 }
 0x283   : > { %2804 = vtanh.f32 %v574_v56  ;;  %v2603_v59 = vmul.f32 -1.442695, %v574_v56 }
 0x284   : > { %2806 = vpow2.f32 %v2602_v58  ;;  %v3559_v58 = vld [vmem:[#allocation7 + $0x50] sm:$0xff] }
 0x285   : > { %2808 = vpow2.f32 %v2603_v59  ;;  %v3562_v59 = vld [vmem:[#allocation7 + $0x48] sm:$0xff] }
 0x289   : > { %v2805_v57 = vpop.eup %2804 }
 0x28a   : > { %621 = vrot.lane.b32.xlu1 %v2805_v57, %s3234_s27  ;;  %v2807_v60 = vpop.eup %2806  ;;  %v3557_v57 = vld [vmem:[#allocation7 + $0x58] sm:$0xff] }
 0x28b   : > { %v581_v61 = vadd.f32 1.0, %v2807_v60  ;;  %v2809_v62 = vpop.eup %2808  ;;  %677 = vmatpush.msrb.mxu1 %v3557_v57  ;;  %v3565_v60 = vld [vmem:[#allocation7 + $0x40] sm:$0xff] }
 0x28c   : > { %v582_v63 = vadd.f32 1.0, %v2809_v62 }
 0x28d   : > { %2810 = vrcp.f32 %v581_v61  ;;  %v594_v25 = vand.u32 2147483648, %v581_v61  ;;  %vm588_vm3 = vweird.f32 %v581_v61  ;;  %v592_v26 = vand.u32 2147483647, %v581_v61  ;;  %678 = vmatpush.msrb.mxu1 %v3559_v58 }
 0x28e   : > { %2812 = vrcp.f32 %v582_v63  ;;  %v609_v40 = vand.u32 2147483648, %v582_v63  ;;  %vm603_vm7 = vweird.f32 %v582_v63  ;;  %v607_v41 = vand.u32 2147483647, %v582_v63 }
 0x28f   : > { %v595_v32 = vor.u32 1.1754944e-38, %v594_v25  ;;  %vm593_vm5 = vcmp.eq.f32.partialorder %v592_v26, 8.507059e+37  ;;  %679 = vmatpush.msrb.mxu1 %v3562_v59 }
 0x290   : > { %v610_v43 = vor.u32 1.1754944e-38, %v609_v40  ;;  %vm608_vm9 = vcmp.eq.f32.partialorder %v607_v41, 8.507059e+37  ;;  %v3608_v41 = vld [vmem:[#allocation8 + $0x38] sm:$0xff] }
 0x291   : > { %680 = vmatpush.msrb.mxu1 %v3565_v60  ;;  %750 = vmatpush.msrb.mxu3 %v3608_v41 }
 0x293   : > { %v2811_v12 = vpop.eup %2810 }
 0x294   : > { %v584_v13 = vmul.f32 %v2811_v12, %v581_v61  ;;  %v2813_v15 = vpop.eup %2812  ;;  %vm589_vm2 = vweird.f32 %v2811_v12 }
 0x295   : > { %v599_v17 = vmul.f32 %v2813_v15, %v582_v63  ;;  %vm590_vm4 = vmor %vm588_vm3, %vm589_vm2  ;;  %vm604_vm6 = vweird.f32 %v2813_v15 }
 0x296   : > { %v585_v14 = vsub.f32 1.0, %v584_v13  ;;  %vm605_vm8 = vmor %vm603_vm7, %vm604_vm6 }
 0x297   : > { %v600_v24 = vsub.f32 1.0, %v599_v17  ;;  %v3579_v17 = vld [vmem:[#allocation7 + $0x68] sm:$0xff] }
 0x298   : > { %v586_v16 = vmul.f32 %v2811_v12, %v585_v14  ;;  %v3572_v14 = vld [vmem:[#allocation7 + $0x78] sm:$0xff]  ;;  %4075 = vst [vmem:[#allocation22_spill] sm:$0xff] %v3579_v17 }
 0x299   : > { %v601_v28 = vmul.f32 %v2813_v15, %v600_v24  ;;  %4073 = vst [vmem:[#allocation20_spill] sm:$0xff] %v3572_v14  ;;  %714 = vmatpush.msrb.mxu2 %v3572_v14  ;;  %v3586_v24 = vperm.slane %v3452_v2, 4 }
 0x29a   : > { %v587_v23 = vadd.f32 %v2811_v12, %v586_v16  ;;  %v3576_v16 = vld [vmem:[#allocation7 + $0x70] sm:$0xff] }
 0x29b   : > { %v602_v38 = vadd.f32 %v2813_v15, %v601_v28  ;;  %4074 = vst [vmem:[#allocation21_spill] sm:$0xff] %v3576_v16  ;;  %715 = vmatpush.msrb.mxu2 %v3576_v16  ;;  %v3590_v28 = vld [vmem:[#allocation8 + $0x98] sm:$0xff] }
 0x29c   : > { %v591_v27 = vsel %vm590_vm4, %v2811_v12, %v587_v23  ;;  %v3582_v23 = vld [vmem:[#allocation7 + $0x60] sm:$0xff] }
 0x29d   : > { %v596_v36 = vsel %vm593_vm5, %v595_v32, %v591_v27  ;;  %v606_v42 = vsel %vm605_vm8, %v2813_v15, %v602_v38  ;;  %716 = vmatpush.msrb.mxu2 %v3579_v17  ;;  %4076 = vst [vmem:[#allocation23_spill] sm:$0xff] %v3582_v23  ;;  %v3592_v32 = vld [vmem:[#allocation8 + $0x90] sm:$0xff] }
 0x29e   : > { %v611_v46 = vsel %vm608_vm9, %v610_v43, %v606_v42  ;;  %v615_v48 = vmul.f32 0.0, %v596_v36  ;;  %v3618_v42 = vld [vmem:[#allocation8 + $0x30] sm:$0xff]  ;;  %v3622_v43 = vld [vmem:[#allocation8 + $0x28] sm:$0xff] }
 0x29f   : > { %v616_v51 = vmul.f32 0.0, %v611_v46  ;;  %717 = vmatpush.msrb.mxu2 %v3582_v23  ;;  %751 = vmatpush.msrb.mxu3 %v3618_v42 }
 0x2a1   : > { %835 = vmatpush.msra.mxu2 %v3590_v28  ;;  %752 = vmatpush.msrb.mxu3 %v3622_v43 }
 0x2a3   : > { %836 = vmatpush.msra.mxu2 %v3592_v32 }
 0x2f4   : > { %v620_v34 = vpop.permute.xlu1 %619 }
 0x2f5   : > { %v625_v37 = vmul.f32 %v620_v34, %v596_v36  ;;  %v3595_v34 = vld [vmem:[#allocation8 + $0x88] sm:$0xff] }
 0x2f6   : > { %837 = vmatpush.msra.mxu2 %v3595_v34 }
 0x2f7   : > { %629 = vrot.lane.b32.xlu2 %v625_v37, %s3235_s18 }
 0x2fc   : > { %v622_v44 = vpop.permute.xlu1 %621 }
 0x2fd   : > { %v626_v47 = vmul.f32 %v622_v44, %v611_v46  ;;  %v3626_v44 = vld [vmem:[#allocation8 + $0x20] sm:$0xff] }
 0x2fe   : > { %753 = vmatpush.msrb.mxu3 %v3626_v44 }
 0x2ff   : > { %631 = vrot.lane.b32.xlu2 %v626_v47, %s3235_s18 }
 0x300   : > { %946 = vmatpush.msra.mxu3 %v3447_v0 }
 0x302   : > { %947 = vmatpush.msra.mxu3 %v3449_v1 }
 0x304   : > { %948 = vmatpush.msra.mxu3 %v3456_v4 }
 0x306   : > { %949 = vmatpush.msra.mxu3 %v3460_v5 }
 0x351   : > { %v630_v49 = vpop.permute.xlu2 %629 }
 0x352   : > { %v3549_v50 = vadd.f32 %v630_v49, %v615_v48 }
 0x354   : > { %2814 = vtanh.f32 %v3549_v50 }
 0x359   : > { %v632_v53 = vpop.permute.xlu2 %631 }
 0x35a   : > { %v2815_v54 = vpop.eup %2814  ;;  %v3552_v55 = vadd.f32 %v632_v53, %v616_v51 }
 0x35b   : > { %641 = vrot.lane.b32.xlu0 %v2815_v54, %s3234_s27 }
 0x35c   : > { %2816 = vtanh.f32 %v3552_v55 }
 0x362   : > { %v2817_v56 = vpop.eup %2816 }
 0x363   : > { %643 = vrot.lane.b32.xlu1 %v2817_v56, %s3234_s27  ;;  %v3645_v56 = vld [vmem:[#allocation8 + $0x58] sm:$0xff] }
 0x364   : > { %778 = vmatpush.msra.mxu0 %v3645_v56 }
 0x3cd   : > { %v642_v61 = vpop.permute.xlu0 %641 }
 0x3ce   : > { %v647_v62 = vmul.f32 %v642_v61, %v596_v36  ;;  %v3598_v36 = vld [vmem:[#allocation8 + $0x80] sm:$0xff]  ;;  %v3647_v61 = vld [vmem:[#allocation8 + $0x50] sm:$0xff] }
 0x3cf   : > { %838 = vmatpush.msra.mxu2 %v3598_v36  ;;  %779 = vmatpush.msra.mxu0 %v3647_v61 }
 0x3d0   : > { %657 = vrot.lane.b32.xlu2 %v647_v62, %s3235_s18  ;;  %v3654_v62 = vld [vmem:[#allocation8 + $0x40] sm:$0xff] }
 0x3d5   : > { %v644_v63 = vpop.permute.xlu1 %643 }
 0x3d6   : > { %v648_v12 = vmul.f32 %v644_v63, %v611_v46  ;;  %v3639_v46 = vperm.slane %v3452_v2, 5  ;;  %v3651_v2 = vld [vmem:[#allocation8 + $0x48] sm:$0xff]  ;;  %v3663_v63 = vld [vmem:[%s3422_s12] sm:$0xff] }
 0x3d7   : > { %780 = vmatpush.msra.mxu0 %v3651_v2 }
 0x3d8   : > { %659 = vrot.lane.b32.xlu1 %v648_v12, %s3235_s18  ;;  %v3666_v12 = vld [vmem:[%s3422_s12 + $0x8] sm:$0xff] }
 0x3d9   : > { %781 = vmatpush.msra.mxu0 %v3654_v62 }
 0x3da   : > { %2610 = vmatmul.msk.f32.vlgmr.msra.gmra.mxu0 %vm415_vm0, %v3463_v6 }
 0x3db   : > { %977 = vmatpush.msrb.mxu0 %v3454_v3 }
 0x3dd   : > { %978 = vmatpush.msrb.mxu0 %v3471_v7 }
 0x3df   : > { %979 = vmatpush.msrb.mxu0 %v3474_v8 }
 0x3e1   : > { %980 = vmatpush.msrb.mxu0 %v3477_v9 }
 0x3e2   : > { %2611 = vmatmul.msk.f32.gmra.mxu0 %vm415_vm0, %v3463_v6 }
 0x3e3   : > { %1163 = vmatpush.msra.mxu0 %v3557_v57 }
 0x3e5   : > { %1164 = vmatpush.msra.mxu0 %v3559_v58 }
 0x3e7   : > { %1165 = vmatpush.msra.mxu0 %v3562_v59 }
 0x3e9   : > { %1166 = vmatpush.msra.mxu0 %v3565_v60 }
 0x42a   : > { %v658_v13 = vpop.permute.xlu2 %657 }
 0x42b   : > { %2604 = vmatmul.msk.f32.vlgmr.msrb.gmra.mxu1 %vm415_vm0, %v658_v13 }
 0x44a   : > { %v660_v15 = vpop.permute.xlu1 %659 }
 0x44b   : > { %2605 = vmatmul.msk.f32.gmra.mxu1 %vm415_vm0, %v660_v15 }
 0x4a8   : > { %v682_v25 = vpop.f32.mrf.mxu1 }
 0x4a9   : > { %v683_v26 = vadd.f32 %v682_v25, %v3586_v24 }
 0x4ab   : > { %v688_v27 = vmax.f32 %v683_v26, 0.0 }
 0x4ad   : > { %2606 = vmatmul.msk.f32.vlgmr.msrb.gmra.mxu2 %vm415_vm0, %v688_v27 }
 0x4ae   : > { %1031 = vmatpush.msrb.mxu2 %v3499_v21 }
 0x4b0   : > { %1032 = vmatpush.msrb.mxu2 %v3509_v29 }
 0x4b2   : > { %1033 = vmatpush.msrb.mxu2 %v3511_v30 }
 0x4b4   : > { %1034 = vmatpush.msrb.mxu2 %v3514_v31 }
 0x4c8   : > { %v685_v37 = vpop.f32.mrf.mxu1 }
 0x4c9   : > { %v686_v38 = vadd.f32 %v685_v37, %v3586_v24  ;;  %v783_v37 = vpop.f32.mrf.mxu0 }
 0x4cb   : > { %v689_v40 = vmax.f32 %v686_v38, 0.0  ;;  %v404_v38 = vperm.slane %v3535_v39, 2 }
 0x4cd   : > { %2607 = vmatmul.msk.f32.gmra.mxu2 %vm415_vm0, %v689_v40 }
 0x4d5   : > { %2614 = vmatmul.msk.f32.vlgmr.msra.gmra.mxu2 %vm415_vm0, %v3463_v6 }
 0x4d6   : > { %1225 = vmatpush.msra.mxu2 %v3608_v41 }
 0x4d8   : > { %1226 = vmatpush.msra.mxu2 %v3618_v42 }
 0x4da   : > { %1227 = vmatpush.msra.mxu2 %v3622_v43 }
 0x4dc   : > { %1228 = vmatpush.msra.mxu2 %v3626_v44 }
 0x4dd   : > { %2615 = vmatmul.msk.f32.gmra.mxu2 %vm415_vm0, %v3463_v6  ;;  %v401_v6 = vperm.slane %v3535_v39, 3 }
 0x4e5   : > { %2624 = vmatmul.msk.f32.vlgmr.msrb.gmra.mxu2 %vm415_vm0, %v658_v13  ;;  %v389_v13 = vsel %vm382_vm1, %v3663_v63, 0.0 }
 0x4e6   : > { %1405 = vmatpush.msrb.mxu2 %v3447_v0  ;;  %390 = vadd.xlane.f32.xlu2 %v389_v13 }
 0x4e8   : > { %1406 = vmatpush.msrb.mxu2 %v3449_v1 }
 0x4ea   : > { %1407 = vmatpush.msrb.mxu2 %v3456_v4 }
 0x4ec   : > { %1408 = vmatpush.msrb.mxu2 %v3460_v5 }
 0x4ed   : > { %2625 = vmatmul.msk.f32.gmra.mxu2 %vm415_vm0, %v660_v15  ;;  %v392_v15 = vsel %vm382_vm1, %v3666_v12, 0.0 }
 0x4ee   : > { %393 = vadd.xlane.f32.xlu1 %v392_v15 }
 0x530   : > { %v719_v47 = vpop.f32.mrf.mxu2 }
 0x531   : > { %v720_v48 = vadd.f32 %v719_v47, %v3639_v46 }
 0x533   : > { %v725_v49 = vmax.f32 %v720_v48, 0.0 }
 0x535   : > { %2608 = vmatmul.msk.f32.vlgmr.msrb.gmra.mxu3 %vm415_vm0, %v725_v49 }
 0x550   : > { %v722_v51 = vpop.f32.mrf.mxu2 }
 0x551   : > { %v723_v53 = vadd.f32 %v722_v51, %v3639_v46 }
 0x553   : > { %v726_v54 = vmax.f32 %v723_v53, 0.0 }
 0x555   : > { %2609 = vmatmul.msk.f32.gmra.mxu3 %vm415_vm0, %v726_v54 }
 0x558   : > { %v840_v47 = vpop.f32.mrf.mxu2 }
 0x559   : > { %v391_v27 = vpop.xlane.xlu2 %390 }
 0x55a   : > { %v402_v40 = vmul.f32 %v401_v6, %v391_v27 }
 0x55c   : > { %v3693_v51 = vadd.f32 %v404_v38, %v402_v40 }
 0x55e   : > { %4077 = vst [vmem:[#allocation24_spill] sm:$0xff] %v3693_v51 }
 0x561   : > { %v394_v53 = vpop.xlane.xlu1 %393 }
 0x562   : > { %v403_v15 = vmul.f32 %v401_v6, %v394_v53 }
 0x5b8   : > { %v755_v25 = vpop.f32.mrf.mxu3 }
 0x5d8   : > { %v758_v26 = vpop.f32.mrf.mxu3 }
 0x5d9   : > { %809 = vmatpush.msra.mxu1 %v758_v26 }
 0x5db   : > { %810 = vmatpush.msra.mxu1 %v755_v25  ;;  %v786_v25 = vpop.f32.mrf.mxu0 }
 0x5dc   : > { %2612 = vmatmul.msk.f32.vlgmr.msra.gmra.mxu1 %vm382_vm1, %v3663_v63 }
 0x5dd   : > { %1008 = vmatpush.msrb.mxu1 %v3480_v10 }
 0x5df   : > { %1009 = vmatpush.msrb.mxu1 %v3490_v18 }
 0x5e1   : > { %1010 = vmatpush.msrb.mxu1 %v3493_v19 }
 0x5e3   : > { %1011 = vmatpush.msrb.mxu1 %v3496_v20 }
 0x5e4   : > { %2613 = vmatmul.msk.f32.gmra.mxu1 %vm382_vm1, %v3666_v12 }
 0x5e5   : > { %1194 = vmatpush.msra.mxu1 %v3572_v14 }
 0x5e7   : > { %1195 = vmatpush.msra.mxu1 %v3576_v16  ;;  %v843_v16 = vpop.f32.mrf.mxu2 }
 0x5e9   : > { %1196 = vmatpush.msra.mxu1 %v3579_v17 }
 0x5eb   : > { %1197 = vmatpush.msra.mxu1 %v3582_v23  ;;  %v3696_v23 = vadd.f32 %v404_v38, %v403_v15 }
 0x5ed   : > { %4078 = vst [vmem:[#allocation25_spill] sm:$0xff] %v3696_v23 }
 0x659   : > { %v812_v48 = vpop.f32.mrf.mxu1 }
 0x65a   : > { %v813_v49 = vadd.f32 %v812_v48, %v783_v37 }
 0x65c   : > { %v846_v54 = vadd.f32 %v840_v47, %v813_v49 }
 0x65e   : > { %v848_v13 = vadd.f32 %v846_v54, %v3693_v51 }
 0x660   : > { %2818 = vtanh.f32 %v848_v13  ;;  %v2616_v40 = vmul.f32 -1.442695, %v848_v13 }
 0x661   : > { %v815_v26 = vpop.f32.mrf.mxu1 }
 0x662   : > { %v816_v17 = vadd.f32 %v815_v26, %v786_v25 }
 0x664   : > { %v847_v14 = vadd.f32 %v843_v16, %v816_v17 }
 0x666   : > { %v2819_v39 = vpop.eup %2818  ;;  %v849_v27 = vadd.f32 %v847_v14, %v3696_v23 }
 0x667   : > { %894 = vrot.lane.b32.xlu0 %v2819_v39, %s3234_s27 }
 0x668   : > { %2820 = vtanh.f32 %v849_v27  ;;  %v2617_v6 = vmul.f32 -1.442695, %v849_v27 }
 0x669   : > { %2822 = vpow2.f32 %v2616_v40 }
 0x66a   : > { %2824 = vpow2.f32 %v2617_v6 }
 0x66e   : > { %v2821_v37 = vpop.eup %2820 }
 0x66f   : > { %896 = vrot.lane.b32.xlu0 %v2821_v37, %s3234_s27  ;;  %v2823_v47 = vpop.eup %2822 }
 0x670   : > { %v856_v48 = vadd.f32 1.0, %v2823_v47  ;;  %v2825_v38 = vpop.eup %2824 }
 0x671   : > { %v857_v49 = vadd.f32 1.0, %v2825_v38 }
 0x672   : > { %2826 = vrcp.f32 %v856_v48  ;;  %v869_v39 = vand.u32 2147483648, %v856_v48  ;;  %vm863_vm11 = vweird.f32 %v856_v48  ;;  %v867_v13 = vand.u32 2147483647, %v856_v48 }
 0x673   : > { %2828 = vrcp.f32 %v857_v49  ;;  %vm878_vm15 = vweird.f32 %v857_v49 }
 0x674   : > { %v870_v40 = vor.u32 1.1754944e-38, %v869_v39  ;;  %vm868_vm13 = vcmp.eq.f32.partialorder %v867_v13, 8.507059e+37 }
 0x678   : > { %v2827_v53 = vpop.eup %2826 }
 0x679   : > { %v859_v16 = vmul.f32 %v2827_v53, %v856_v48  ;;  %v2829_v14 = vpop.eup %2828  ;;  %vm864_vm10 = vweird.f32 %v2827_v53 }
 0x67a   : > { %v874_v15 = vmul.f32 %v2829_v14, %v857_v49  ;;  %vm865_vm12 = vmor %vm863_vm11, %vm864_vm10  ;;  %vm879_vm14 = vweird.f32 %v2829_v14 }
 0x67b   : > { %v860_v17 = vsub.f32 1.0, %v859_v16  ;;  %v884_v16 = vand.u32 2147483648, %v857_v49  ;;  %vm880_vm2 = vmor %vm878_vm15, %vm879_vm14 }
 0x67c   : > { %v875_v26 = vsub.f32 1.0, %v874_v15 }
 0x67d   : > { %v861_v54 = vmul.f32 %v2827_v53, %v860_v17  ;;  %v882_v17 = vand.u32 2147483647, %v857_v49  ;;  %v885_v15 = vor.u32 1.1754944e-38, %v884_v16 }
 0x67e   : > { %v876_v37 = vmul.f32 %v2829_v14, %v875_v26 }
 0x67f   : > { %v862_v25 = vadd.f32 %v2827_v53, %v861_v54  ;;  %vm883_vm3 = vcmp.eq.f32.partialorder %v882_v17, 8.507059e+37 }
 0x680   : > { %v877_v23 = vadd.f32 %v2829_v14, %v876_v37 }
 0x681   : > { %v866_v27 = vsel %vm865_vm12, %v2827_v53, %v862_v25 }
 0x682   : > { %v871_v47 = vsel %vm868_vm13, %v870_v40, %v866_v27  ;;  %v881_v54 = vsel %vm880_vm2, %v2829_v14, %v877_v23 }
 0x683   : > { %v886_v48 = vsel %vm883_vm3, %v885_v15, %v881_v54  ;;  %v890_v25 = vmul.f32 0.0, %v871_v47 }
 0x684   : > { %v891_v13 = vmul.f32 0.0, %v886_v48 }
 0x6d9   : > { %v895_v6 = vpop.permute.xlu0 %894 }
 0x6da   : > { %v900_v38 = vmul.f32 %v895_v6, %v871_v47 }
 0x6dc   : > { %904 = vrot.lane.b32.xlu0 %v900_v38, %s3235_s18 }
 0x6e1   : > { %v897_v51 = vpop.permute.xlu0 %896 }
 0x6e2   : > { %v901_v53 = vmul.f32 %v897_v51, %v886_v48 }
 0x6e4   : > { %906 = vrot.lane.b32.xlu0 %v901_v53, %s3235_s18 }
 0x74e   : > { %v905_v26 = vpop.permute.xlu0 %904 }
 0x74f   : > { %v3703_v39 = vadd.f32 %v905_v26, %v890_v25 }
 0x751   : > { %2830 = vtanh.f32 %v3703_v39 }
 0x756   : > { %v907_v27 = vpop.permute.xlu0 %906 }
 0x757   : > { %v2831_v37 = vpop.eup %2830  ;;  %v3706_v40 = vadd.f32 %v907_v27, %v891_v13 }
 0x758   : > { %916 = vrot.lane.b32.xlu2 %v2831_v37, %s3234_s27 }
 0x759   : > { %2832 = vtanh.f32 %v3706_v40 }
 0x75f   : > { %v2833_v23 = vpop.eup %2832 }
 0x760   : > { %918 = vrot.lane.b32.xlu0 %v2833_v23, %s3234_s27 }
 0x7b2   : > { %v917_v51 = vpop.permute.xlu2 %916 }
 0x7b3   : > { %v922_v49 = vmul.f32 %v917_v51, %v871_v47 }
 0x7b5   : > { %926 = vrot.lane.b32.xlu1 %v922_v49, %s3235_s18 }
 0x7d2   : > { %v919_v14 = vpop.permute.xlu0 %918 }
 0x7d3   : > { %v923_v6 = vmul.f32 %v919_v14, %v886_v48 }
 0x7d5   : > { %928 = vrot.lane.b32.xlu0 %v923_v6, %s3235_s18 }
 0x827   : > { %v3713_v38 = vpop.permute.xlu1 %926 }
 0x828   : > { %2618 = vmatmul.msk.f32.vlgmr.msra.gmra.mxu3 %vm415_vm0, %v3713_v38 }
 0x847   : > { %v3717_v16 = vpop.permute.xlu0 %928 }
 0x848   : > { %2619 = vmatmul.msk.f32.gmra.mxu3 %vm415_vm0, %v3717_v16 }
 0x8ab   : > { %v951_v17 = vpop.f32.mrf.mxu3 }
 0x8ac   : > { %v952_v54 = vadd.f32 %v951_v17, %v3484_v11 }
 0x8ae   : > { %v957_v47 = vmax.f32 %v952_v54, 0.0 }
 0x8b0   : > { %2620 = vmatmul.msk.f32.vlgmr.msrb.gmra.mxu0 %vm415_vm0, %v957_v47 }
 0x8cb   : > { %v954_v15 = vpop.f32.mrf.mxu3 }
 0x8cc   : > { %v955_v48 = vadd.f32 %v954_v15, %v3484_v11 }
 0x8ce   : > { %v958_v53 = vmax.f32 %v955_v48, 0.0 }
 0x8d0   : > { %2621 = vmatmul.msk.f32.gmra.mxu0 %vm415_vm0, %v958_v53 }
 0x92d   : > { %v982_v25 = vpop.f32.mrf.mxu0 }
 0x92e   : > { %v983_v26 = vadd.f32 %v982_v25, %v3503_v22 }
 0x930   : > { %v988_v13 = vmax.f32 %v983_v26, 0.0 }
 0x932   : > { %2622 = vmatmul.msk.f32.vlgmr.msrb.gmra.mxu1 %vm415_vm0, %v988_v13 }
 0x933   : > { %1294 = vmatpush.msrb.mxu1 %v3590_v28 }
 0x935   : > { %1295 = vmatpush.msrb.mxu1 %v3592_v32 }
 0x937   : > { %1296 = vmatpush.msrb.mxu1 %v3595_v34 }
 0x939   : > { %1297 = vmatpush.msrb.mxu1 %v3598_v36 }
 0x94d   : > { %v985_v27 = vpop.f32.mrf.mxu0 }
 0x94e   : > { %v986_v37 = vadd.f32 %v985_v27, %v3503_v22 }
 0x950   : > { %v989_v23 = vmax.f32 %v986_v37, 0.0 }
 0x952   : > { %2623 = vmatmul.msk.f32.gmra.mxu1 %vm415_vm0, %v989_v23 }
 0x9af   : > { %v1013_v51 = vpop.f32.mrf.mxu1 }
 0x9cf   : > { %v1016_v49 = vpop.f32.mrf.mxu1 }
 0x9d0   : > { %1056 = vmatpush.msrb.mxu3 %v1016_v49 }
 0x9d2   : > { %1057 = vmatpush.msrb.mxu3 %v1013_v51 }
 0x9d3   : > { %2626 = vmatmul.msk.f32.vlgmr.msrb.gmra.mxu3 %vm382_vm1, %v3522_v33 }
 0x9d4   : > { %1248 = vmatpush.msra.mxu3 %v3645_v56 }
 0x9d6   : > { %1249 = vmatpush.msra.mxu3 %v3647_v61 }
 0x9d8   : > { %1250 = vmatpush.msra.mxu3 %v3651_v2 }
 0x9da   : > { %1251 = vmatpush.msra.mxu3 %v3654_v62 }
 0x9db   : > { %2627 = vmatmul.msk.f32.gmra.mxu3 %vm382_vm1, %v3527_v35 }
 0x9dc   : > { %1436 = vmatpush.msrb.mxu3 %v3454_v3  ;;  %v1036_v3 = vpop.f32.mrf.mxu2 }
 0x9de   : > { %1437 = vmatpush.msrb.mxu3 %v3471_v7 }
 0x9e0   : > { %1438 = vmatpush.msrb.mxu3 %v3474_v8 }
 0x9e2   : > { %1439 = vmatpush.msrb.mxu3 %v3477_v9 }
 0x9e3   : > { %2636 = vmatmul.msk.f32.vlgmr.msra.gmra.mxu3 %vm415_vm0, %v3717_v16 }
 0x9e4   : > { %1622 = vmatpush.msra.mxu3 %v3557_v57  ;;  %v1039_v9 = vpop.f32.mrf.mxu2 }
 0x9e6   : > { %1623 = vmatpush.msra.mxu3 %v3559_v58 }
 0x9e8   : > { %1624 = vmatpush.msra.mxu3 %v3562_v59 }
 0x9ea   : > { %1625 = vmatpush.msra.mxu3 %v3565_v60 }
 0x9eb   : > { %2637 = vmatmul.msk.f32.gmra.mxu3 %vm415_vm0, %v3713_v38 }
 0xa56   : > { %v1059_v7 = vpop.f32.mrf.mxu3 }
 0xa57   : > { %v1060_v33 = vadd.f32 %v1059_v7, %v1036_v3 }
 0xa59   : > { %v1065_v8 = vadd.f32 %v1060_v33, %v3539_v45 }
 0xa5b   : > { %2834 = vtanh.f32 %v1065_v8  ;;  %v2628_v53 = vmul.f32 -1.442695, %v1065_v8 }
 0xa5e   : > { %v1062_v35 = vpop.f32.mrf.mxu3 }
 0xa5f   : > { %v1063_v14 = vadd.f32 %v1062_v35, %v1039_v9 }
 0xa61   : > { %v2835_v6 = vpop.eup %2834  ;;  %v1066_v17 = vadd.f32 %v1063_v14, %v3542_v52 }
 0xa62   : > { %1111 = vrot.lane.b32.xlu0 %v2835_v6, %s3234_s27 }
 0xa63   : > { %2836 = vtanh.f32 %v1066_v17  ;;  %v2629_v47 = vmul.f32 -1.442695, %v1066_v17 }
 0xa65   : > { %2838 = vpow2.f32 %v2629_v47 }
 0xa69   : > { %v2837_v54 = vpop.eup %2836 }
 0xa6a   : > { %1113 = vrot.lane.b32.xlu2 %v2837_v54, %s3234_s27 }
 0xa6b   : > { %v2839_v15 = vpop.eup %2838 }
 0xa6c   : > { %v1074_v48 = vadd.f32 1.0, %v2839_v15 }
 0xa6e   : > { %2840 = vrcp.f32 %v1074_v48  ;;  %v1101_v3 = vand.u32 2147483648, %v1074_v48  ;;  %vm1095_vm5 = vweird.f32 %v1074_v48  ;;  %v1099_v7 = vand.u32 2147483647, %v1074_v48 }
 0xa6f   : > { %2842 = vpow2.f32 %v2628_v53 }
 0xa70   : > { %v1102_v35 = vor.u32 1.1754944e-38, %v1101_v3  ;;  %vm1100_vm7 = vcmp.eq.f32.partialorder %v1099_v7, 8.507059e+37 }
 0xa74   : > { %v2841_v25 = vpop.eup %2840 }
 0xa75   : > { %v2843_v26 = vpop.eup %2842  ;;  %v1091_v13 = vmul.f32 %v2841_v25, %v1074_v48  ;;  %vm1096_vm4 = vweird.f32 %v2841_v25 }
 0xa76   : > { %v1073_v27 = vadd.f32 1.0, %v2843_v26  ;;  %vm1097_vm6 = vmor %vm1095_vm5, %vm1096_vm4 }
 0xa77   : > { %v1092_v37 = vsub.f32 1.0, %v1091_v13 }
 0xa78   : > { %2844 = vrcp.f32 %v1073_v27  ;;  %v1086_v15 = vand.u32 2147483648, %v1073_v27  ;;  %vm1080_vm9 = vweird.f32 %v1073_v27  ;;  %v1084_v53 = vand.u32 2147483647, %v1073_v27 }
 0xa79   : > { %v1093_v23 = vmul.f32 %v2841_v25, %v1092_v37 }
 0xa7a   : > { %v1087_v48 = vor.u32 1.1754944e-38, %v1086_v15  ;;  %vm1085_vm11 = vcmp.eq.f32.partialorder %v1084_v53, 8.507059e+37 }
 0xa7b   : > { %v1094_v51 = vadd.f32 %v2841_v25, %v1093_v23 }
 0xa7d   : > { %v1098_v33 = vsel %vm1097_vm6, %v2841_v25, %v1094_v51 }
 0xa7e   : > { %v2845_v49 = vpop.eup %2844  ;;  %v1103_v14 = vsel %vm1100_vm7, %v1102_v35, %v1098_v33 }
 0xa7f   : > { %v1076_v9 = vmul.f32 %v2845_v49, %v1073_v27  ;;  %vm1081_vm8 = vweird.f32 %v2845_v49  ;;  %v1108_v23 = vmul.f32 %v1103_v14, %v3552_v55 }
 0xa80   : > { %vm1082_vm10 = vmor %vm1080_vm9, %vm1081_vm8 }
 0xa81   : > { %v1077_v17 = vsub.f32 1.0, %v1076_v9 }
 0xa83   : > { %v1078_v54 = vmul.f32 %v2845_v49, %v1077_v17 }
 0xa85   : > { %v1079_v47 = vadd.f32 %v2845_v49, %v1078_v54 }
 0xa87   : > { %v1083_v26 = vsel %vm1082_vm10, %v2845_v49, %v1079_v47 }
 0xa88   : > { %v1088_v13 = vsel %vm1085_vm11, %v1087_v48, %v1083_v26  ;;  %v4083_v48 = vld [vmem:[#allocation24_spill] sm:$0xff] }
 0xa89   : > { %v1107_v27 = vmul.f32 %v1088_v13, %v3549_v50 }
 0xac4   : > { %v1114_v8 = vpop.permute.xlu2 %1113 }
 0xac5   : > { %v1118_v6 = vmul.f32 %v1114_v8, %v1103_v14 }
 0xac7   : > { %1123 = vrot.lane.b32.xlu2 %v1118_v6, %s3235_s18 }
 0xad4   : > { %v1112_v25 = vpop.permute.xlu0 %1111 }
 0xad5   : > { %v1117_v37 = vmul.f32 %v1112_v25, %v1088_v13 }
 0xad7   : > { %1121 = vrot.lane.b32.xlu0 %v1117_v37, %s3235_s18 }
 0xb21   : > { %v1124_v51 = vpop.permute.xlu2 %1123 }
 0xb22   : > { %v3760_v3 = vadd.f32 %v1124_v51, %v1108_v23  ;;  %v4084_v51 = vld [vmem:[#allocation25_spill] sm:$0xff] }
 0xb24   : > { %2846 = vtanh.f32 %v3760_v3 }
 0xb2a   : > { %v2847_v7 = vpop.eup %2846 }
 0xb2b   : > { %1135 = vrot.lane.b32.xlu0 %v2847_v7, %s3234_s27 }
 0xb49   : > { %v1122_v49 = vpop.permute.xlu0 %1121 }
 0xb4a   : > { %v3765_v33 = vadd.f32 %v1122_v49, %v1107_v27 }
 0xb4c   : > { %2848 = vtanh.f32 %v3765_v33 }
 0xb52   : > { %v2849_v9 = vpop.eup %2848 }
 0xb53   : > { %1133 = vrot.lane.b32.xlu1 %v2849_v9, %s3234_s27 }
 0xb9d   : > { %v1136_v35 = vpop.permute.xlu0 %1135 }
 0xb9e   : > { %v1140_v55 = vmul.f32 %v1136_v35, %v1103_v14 }
 0xba0   : > { %1145 = vrot.lane.b32.xlu1 %v1140_v55, %s3235_s18 }
 0xbc5   : > { %v1134_v8 = vpop.permute.xlu1 %1133 }
 0xbc6   : > { %v1139_v6 = vmul.f32 %v1134_v8, %v1088_v13 }
 0xbc8   : > { %1143 = vrot.lane.b32.xlu2 %v1139_v6, %s3235_s18 }
 0xc12   : > { %v1146_v50 = vpop.permute.xlu1 %1145 }
 0xc22   : > { %v1144_v17 = vpop.permute.xlu2 %1143 }
 0xc23   : > { %2630 = vmatmul.msk.f32.vlgmr.msra.gmra.mxu0 %vm415_vm0, %v1144_v17 }
 0xc2b   : > { %2631 = vmatmul.msk.f32.gmra.mxu0 %vm415_vm0, %v1146_v50 }
 0xca0   : > { %v1168_v54 = vpop.f32.mrf.mxu0 }
 0xca1   : > { %v1169_v47 = vadd.f32 %v1168_v54, %v3586_v24 }
 0xca3   : > { %v1174_v15 = vmax.f32 %v1169_v47, 0.0 }
 0xca5   : > { %2632 = vmatmul.msk.f32.vlgmr.msra.gmra.mxu1 %vm415_vm0, %v1174_v15 }
 0xca6   : > { %1490 = vmatpush.msra.mxu1 %v3499_v21 }
 0xca8   : > { %v1171_v14 = vpop.f32.mrf.mxu0  ;;  %1491 = vmatpush.msra.mxu1 %v3509_v29 }
 0xca9   : > { %v1172_v53 = vadd.f32 %v1171_v14, %v3586_v24 }
 0xcaa   : > { %1492 = vmatpush.msra.mxu1 %v3511_v30 }
 0xcab   : > { %v1175_v26 = vmax.f32 %v1172_v53, 0.0 }
 0xcac   : > { %1493 = vmatpush.msra.mxu1 %v3514_v31 }
 0xcad   : > { %2633 = vmatmul.msk.f32.gmra.mxu1 %vm415_vm0, %v1175_v26 }
 0xcb5   : > { %2640 = vmatmul.msk.f32.vlgmr.msrb.gmra.mxu1 %vm415_vm0, %v3713_v38 }
 0xcb6   : > { %1684 = vmatpush.msrb.mxu1 %v3608_v41 }
 0xcb8   : > { %1685 = vmatpush.msrb.mxu1 %v3618_v42 }
 0xcba   : > { %1686 = vmatpush.msrb.mxu1 %v3622_v43  ;;  %v4081_v43 = vld [vmem:[#allocation22_spill] sm:$0xff] }
 0xcbc   : > { %1687 = vmatpush.msrb.mxu1 %v3626_v44  ;;  %v4082_v44 = vld [vmem:[#allocation23_spill] sm:$0xff] }
 0xcbd   : > { %2641 = vmatmul.msk.f32.gmra.mxu1 %vm415_vm0, %v3717_v16 }
 0xcc5   : > { %2650 = vmatmul.msk.f32.vlgmr.msra.gmra.mxu1 %vm415_vm0, %v1144_v17 }
 0xcc6   : > { %1864 = vmatpush.msra.mxu1 %v3447_v0 }
 0xcc8   : > { %1865 = vmatpush.msra.mxu1 %v3449_v1 }
 0xcca   : > { %1866 = vmatpush.msra.mxu1 %v3456_v4  ;;  %v4079_v4 = vld [vmem:[#allocation20_spill] sm:$0xff] }
 0xccc   : > { %1867 = vmatpush.msra.mxu1 %v3460_v5  ;;  %v4080_v5 = vld [vmem:[#allocation21_spill] sm:$0xff] }
 0xccd   : > { %2651 = vmatmul.msk.f32.gmra.mxu1 %vm415_vm0, %v1146_v50 }
 0xd22   : > { %v1199_v21 = vpop.f32.mrf.mxu1 }
 0xd23   : > { %v1200_v29 = vadd.f32 %v1199_v21, %v3639_v46 }
 0xd25   : > { %v1205_v30 = vmax.f32 %v1200_v29, 0.0 }
 0xd27   : > { %2634 = vmatmul.msk.f32.vlgmr.msra.gmra.mxu2 %vm415_vm0, %v1205_v30 }
 0xd2a   : > { %v1202_v31 = vpop.f32.mrf.mxu1 }
 0xd2b   : > { %v1203_v41 = vadd.f32 %v1202_v31, %v3639_v46 }
 0xd2d   : > { %v1206_v42 = vmax.f32 %v1203_v41, 0.0 }
 0xd2f   : > { %2635 = vmatmul.msk.f32.gmra.mxu2 %vm415_vm0, %v1206_v42 }
 0xd32   : > { %v1299_v38 = vpop.f32.mrf.mxu1 }
 0xdaa   : > { %v1230_v0 = vpop.f32.mrf.mxu2 }
 0xdb2   : > { %v1233_v1 = vpop.f32.mrf.mxu2 }
 0xdb3   : > { %1273 = vmatpush.msrb.mxu0 %v1233_v1 }
 0xdb5   : > { %1274 = vmatpush.msrb.mxu0 %v1230_v0 }
 0xdb6   : > { %2638 = vmatmul.msk.f32.vlgmr.msrb.gmra.mxu0 %vm382_vm1, %v3663_v63  ;;  %v1253_v63 = vpop.f32.mrf.mxu3 }
 0xdb7   : > { %1467 = vmatpush.msra.mxu0 %v3480_v10 }
 0xdb9   : > { %1468 = vmatpush.msra.mxu0 %v3490_v18 }
 0xdbb   : > { %1469 = vmatpush.msra.mxu0 %v3493_v19 }
 0xdbd   : > { %1470 = vmatpush.msra.mxu0 %v3496_v20 }
 0xdbe   : > { %2639 = vmatmul.msk.f32.gmra.mxu0 %vm382_vm1, %v3666_v12  ;;  %v1256_v20 = vpop.f32.mrf.mxu3  ;;  %v1302_v12 = vpop.f32.mrf.mxu1 }
 0xdbf   : > { %1653 = vmatpush.msrb.mxu0 %v4079_v4 }
 0xdc1   : > { %1654 = vmatpush.msrb.mxu0 %v4080_v5 }
 0xdc3   : > { %1655 = vmatpush.msrb.mxu0 %v4081_v43 }
 0xdc5   : > { %1656 = vmatpush.msrb.mxu0 %v4082_v44 }
 0xe33   : > { %v1276_v10 = vpop.f32.mrf.mxu0 }
 0xe34   : > { %v1277_v16 = vadd.f32 %v1276_v10, %v1253_v63 }
 0xe36   : > { %v1305_v18 = vadd.f32 %v1299_v38, %v1277_v16 }
 0xe38   : > { %v1307_v19 = vadd.f32 %v1305_v18, %v4083_v48 }
 0xe3a   : > { %2850 = vtanh.f32 %v1307_v19  ;;  %v2642_v55 = vmul.f32 -1.442695, %v1307_v19 }
 0xe3b   : > { %v1279_v25 = vpop.f32.mrf.mxu0 }
 0xe3c   : > { %v1280_v13 = vadd.f32 %v1279_v25, %v1256_v20 }
 0xe3e   : > { %v1306_v37 = vadd.f32 %v1302_v12, %v1280_v13 }
 0xe40   : > { %v2851_v23 = vpop.eup %2850  ;;  %v1308_v7 = vadd.f32 %v1306_v37, %v4084_v51 }
 0xe41   : > { %1353 = vrot.lane.b32.xlu0 %v2851_v23, %s3234_s27 }
 0xe42   : > { %2852 = vtanh.f32 %v1308_v7  ;;  %v2643_v49 = vmul.f32 -1.442695, %v1308_v7 }
 0xe44   : > { %2854 = vpow2.f32 %v2643_v49 }
 0xe48   : > { %v2853_v27 = vpop.eup %2852 }
 0xe49   : > { %1355 = vrot.lane.b32.xlu2 %v2853_v27, %s3234_s27 }
 0xe4a   : > { %v2855_v9 = vpop.eup %2854 }
 0xe4b   : > { %v1316_v35 = vadd.f32 1.0, %v2855_v9 }
 0xe4d   : > { %2856 = vrcp.f32 %v1316_v35  ;;  %v1343_v53 = vand.u32 2147483648, %v1316_v35  ;;  %vm1337_vm13 = vweird.f32 %v1316_v35  ;;  %v1341_v26 = vand.u32 2147483647, %v1316_v35 }
 0xe4e   : > { %2858 = vpow2.f32 %v2642_v55 }
 0xe4f   : > { %v1344_v30 = vor.u32 1.1754944e-38, %v1343_v53  ;;  %vm1342_vm15 = vcmp.eq.f32.partialorder %v1341_v26, 8.507059e+37 }
 0xe53   : > { %v2857_v8 = vpop.eup %2856 }
 0xe54   : > { %v2859_v6 = vpop.eup %2858  ;;  %v1333_v17 = vmul.f32 %v2857_v8, %v1316_v35  ;;  %vm1338_vm12 = vweird.f32 %v2857_v8 }
 0xe55   : > { %v1315_v50 = vadd.f32 1.0, %v2859_v6  ;;  %vm1339_vm14 = vmor %vm1337_vm13, %vm1338_vm12 }
 0xe56   : > { %v1334_v54 = vsub.f32 1.0, %v1333_v17 }
 0xe57   : > { %2860 = vrcp.f32 %v1315_v50  ;;  %v1328_v5 = vand.u32 2147483648, %v1315_v50  ;;  %vm1322_vm3 = vweird.f32 %v1315_v50  ;;  %v1326_v43 = vand.u32 2147483647, %v1315_v50 }
 0xe58   : > { %v1335_v47 = vmul.f32 %v2857_v8, %v1334_v54 }
 0xe59   : > { %v1329_v63 = vor.u32 1.1754944e-38, %v1328_v5  ;;  %vm1327_vm5 = vcmp.eq.f32.partialorder %v1326_v43, 8.507059e+37 }
 0xe5a   : > { %v1336_v15 = vadd.f32 %v2857_v8, %v1335_v47 }
 0xe5c   : > { %v1340_v21 = vsel %vm1339_vm14, %v2857_v8, %v1336_v15 }
 0xe5d   : > { %v2861_v14 = vpop.eup %2860  ;;  %v1345_v41 = vsel %vm1342_vm15, %v1344_v30, %v1340_v21  ;;  %v3850_v30 = vld [vmem:[%s3429_s13] sm:$0xff] }
 0xe5e   : > { %v1318_v29 = vmul.f32 %v2861_v14, %v1315_v50  ;;  %vm1323_vm2 = vweird.f32 %v2861_v14  ;;  %v1350_v18 = vmul.f32 %v1345_v41, %v3706_v40 }
 0xe5f   : > { %vm1324_vm4 = vmor %vm1322_vm3, %vm1323_vm2 }
 0xe60   : > { %v1319_v0 = vsub.f32 1.0, %v1318_v29 }
 0xe62   : > { %v1320_v1 = vmul.f32 %v2861_v14, %v1319_v0 }
 0xe64   : > { %v1321_v4 = vadd.f32 %v2861_v14, %v1320_v1 }
 0xe66   : > { %v1325_v44 = vsel %vm1324_vm4, %v2861_v14, %v1321_v4 }
 0xe67   : > { %v1330_v10 = vsel %vm1327_vm5, %v1329_v63, %v1325_v44 }
 0xe68   : > { %v1349_v13 = vmul.f32 %v1330_v10, %v3703_v39 }
 0xea3   : > { %v1356_v31 = vpop.permute.xlu2 %1355 }
 0xea4   : > { %v1360_v42 = vmul.f32 %v1356_v31, %v1345_v41  ;;  %v2935_v31 = vld [vmem:[#allocation7 + $0x20] sm:$0xff] }
 0xea6   : > { %1365 = vrot.lane.b32.xlu0 %v1360_v42, %s3235_s18 }
 0xeb3   : > { %v1354_v38 = vpop.permute.xlu0 %1353 }
 0xeb4   : > { %v1359_v16 = vmul.f32 %v1354_v38, %v1330_v10 }
 0xeb6   : > { %1363 = vrot.lane.b32.xlu1 %v1359_v16, %s3235_s18 }
 0xf18   : > { %v1366_v19 = vpop.permute.xlu0 %1365 }
 0xf19   : > { %v3818_v20 = vadd.f32 %v1366_v19, %v1350_v18 }
 0xf1b   : > { %2862 = vtanh.f32 %v3818_v20 }
 0xf21   : > { %v2863_v25 = vpop.eup %2862 }
 0xf22   : > { %1377 = vrot.lane.b32.xlu1 %v2863_v25, %s3234_s27 }
 0xf28   : > { %v1364_v12 = vpop.permute.xlu1 %1363 }
 0xf29   : > { %v3823_v37 = vadd.f32 %v1364_v12, %v1349_v13 }
 0xf2b   : > { %2864 = vtanh.f32 %v3823_v37 }
 0xf31   : > { %v2865_v23 = vpop.eup %2864 }
 0xf32   : > { %1375 = vrot.lane.b32.xlu2 %v2865_v23, %s3234_s27 }
 0xf8c   : > { %v1376_v7 = vpop.permute.xlu2 %1375 }
 0xf8d   : > { %v1381_v40 = vmul.f32 %v1376_v7, %v1330_v10 }
 0xf8f   : > { %1385 = vrot.lane.b32.xlu0 %v1381_v40, %s3235_s18 }
 0xf94   : > { %v1378_v27 = vpop.permute.xlu1 %1377 }
 0xf95   : > { %v1382_v49 = vmul.f32 %v1378_v27, %v1345_v41 }
 0xf97   : > { %1387 = vrot.lane.b32.xlu2 %v1382_v49, %s3235_s18 }
 0xff1   : > { %v3833_v39 = vpop.permute.xlu2 %1387 }
0x1001   : > { %v3829_v9 = vpop.permute.xlu0 %1385 }
0x1002   : > { %2644 = vmatmul.msk.f32.vlgmr.msrb.gmra.mxu2 %vm415_vm0, %v3829_v9 }
0x100a   : > { %2645 = vmatmul.msk.f32.gmra.mxu2 %vm415_vm0, %v3833_v39 }
0x1085   : > { %v1410_v35 = vpop.f32.mrf.mxu2 }
0x1086   : > { %v1411_v55 = vadd.f32 %v1410_v35, %v3484_v11 }
0x1088   : > { %v1416_v8 = vmax.f32 %v1411_v55, 0.0 }
0x108a   : > { %2646 = vmatmul.msk.f32.vlgmr.msrb.gmra.mxu3 %vm415_vm0, %v1416_v8 }
0x108d   : > { %v1413_v6 = vpop.f32.mrf.mxu2 }
0x108e   : > { %v1414_v17 = vadd.f32 %v1413_v6, %v3484_v11 }
0x1090   : > { %v1417_v50 = vmax.f32 %v1414_v17, 0.0 }
0x1092   : > { %2647 = vmatmul.msk.f32.gmra.mxu3 %vm415_vm0, %v1417_v50 }
0x110d   : > { %v1441_v54 = vpop.f32.mrf.mxu3 }
0x110e   : > { %v1442_v47 = vadd.f32 %v1441_v54, %v3503_v22 }
0x1110   : > { %v1447_v15 = vmax.f32 %v1442_v47, 0.0 }
0x1112   : > { %2648 = vmatmul.msk.f32.vlgmr.msra.gmra.mxu0 %vm415_vm0, %v1447_v15 }
0x1113   : > { %1753 = vmatpush.msra.mxu0 %v3590_v28  ;;  %v3859_v28 = vld [vmem:[%s3429_s13 + $0x8] sm:$0xff] }
0x1115   : > { %v1444_v14 = vpop.f32.mrf.mxu3  ;;  %1754 = vmatpush.msra.mxu0 %v3592_v32  ;;  %v2932_v32 = vld [vmem:[#allocation7 + $0x38] sm:$0xff] }
0x1116   : > { %v1445_v53 = vadd.f32 %v1444_v14, %v3503_v22 }
0x1117   : > { %1755 = vmatpush.msra.mxu0 %v3595_v34  ;;  %v2933_v34 = vld [vmem:[#allocation7 + $0x30] sm:$0xff] }
0x1118   : > { %v1448_v26 = vmax.f32 %v1445_v53, 0.0 }
0x1119   : > { %1756 = vmatpush.msra.mxu0 %v3598_v36  ;;  %v2934_v36 = vld [vmem:[#allocation7 + $0x28] sm:$0xff] }
0x111a   : > { %2649 = vmatmul.msk.f32.gmra.mxu0 %vm415_vm0, %v1448_v26 }
0x118f   : > { %v1472_v21 = vpop.f32.mrf.mxu0 }
0x1197   : > { %v1475_v29 = vpop.f32.mrf.mxu0 }
0x1198   : > { %1515 = vmatpush.msra.mxu2 %v1475_v29 }
0x119a   : > { %1516 = vmatpush.msra.mxu2 %v1472_v21 }
0x119b   : > { %2652 = vmatmul.msk.f32.vlgmr.msra.gmra.mxu2 %vm382_vm1, %v3850_v30 }
0x119c   : > { %1707 = vmatpush.msrb.mxu2 %v3645_v56  ;;  %v1495_v56 = vpop.f32.mrf.mxu1 }
0x119e   : > { %1708 = vmatpush.msrb.mxu2 %v3647_v61 }
0x11a0   : > { %1709 = vmatpush.msrb.mxu2 %v3651_v2 }
0x11a2   : > { %1710 = vmatpush.msrb.mxu2 %v3654_v62 }
0x11a3   : > { %2653 = vmatmul.msk.f32.gmra.mxu2 %vm382_vm1, %v3859_v28 }
0x11a4   : > { %1895 = vmatpush.msra.mxu2 %v2932_v32  ;;  %v1498_v41 = vpop.f32.mrf.mxu1 }
0x11a6   : > { %1896 = vmatpush.msra.mxu2 %v2933_v34 }
0x11a8   : > { %1897 = vmatpush.msra.mxu2 %v2934_v36 }
0x11aa   : > { %1898 = vmatpush.msra.mxu2 %v2935_v31 }
0x11ab   : > { %2662 = vmatmul.msk.f32.vlgmr.msrb.gmra.mxu2 %vm415_vm0, %v3833_v39 }
0x11ac   : > { %2081 = vmatpush.msrb.mxu2 %v3557_v57 }
0x11ae   : > { %2082 = vmatpush.msrb.mxu2 %v3559_v58 }
0x11b0   : > { %2083 = vmatpush.msrb.mxu2 %v3562_v59 }
0x11b2   : > { %2084 = vmatpush.msrb.mxu2 %v3565_v60 }
0x11b3   : > { %2663 = vmatmul.msk.f32.gmra.mxu2 %vm415_vm0, %v3829_v9 }
0x121e   : > { %v1518_v61 = vpop.f32.mrf.mxu2 }
0x121f   : > { %v1519_v2 = vadd.f32 %v1518_v61, %v1495_v56 }
0x1221   : > { %v1524_v62 = vadd.f32 %v1519_v2, %v3539_v45 }
0x1223   : > { %2866 = vtanh.f32 %v1524_v62  ;;  %v2654_v59 = vmul.f32 -1.442695, %v1524_v62 }
0x1226   : > { %v1521_v42 = vpop.f32.mrf.mxu2 }
0x1227   : > { %v1522_v0 = vadd.f32 %v1521_v42, %v1498_v41 }
0x1229   : > { %v2867_v1 = vpop.eup %2866  ;;  %v1525_v57 = vadd.f32 %v1522_v0, %v3542_v52 }
0x122a   : > { %1570 = vrot.lane.b32.xlu1 %v2867_v1, %s3234_s27  ;;  %v2936_v1 = vld [vmem:[#allocation8 + $0x78] sm:$0xff] }
0x122b   : > { %2868 = vtanh.f32 %v1525_v57  ;;  %v2655_v60 = vmul.f32 -1.442695, %v1525_v57 }
0x122c   : > { %2870 = vpow2.f32 %v2654_v59 }
0x122d   : > { %2872 = vpow2.f32 %v2655_v60  ;;  %v2938_v60 = vld [vmem:[#allocation8 + $0x68] sm:$0xff] }
0x1231   : > { %v2869_v58 = vpop.eup %2868 }
0x1232   : > { %1572 = vrot.lane.b32.xlu0 %v2869_v58, %s3234_s27  ;;  %v2871_v4 = vpop.eup %2870  ;;  %v2937_v58 = vld [vmem:[#allocation8 + $0x70] sm:$0xff] }
0x1233   : > { %v1532_v5 = vadd.f32 1.0, %v2871_v4  ;;  %v2873_v43 = vpop.eup %2872 }
0x1234   : > { %v1533_v44 = vadd.f32 1.0, %v2873_v43  ;;  %v2940_v43 = vld [vmem:[#allocation8 + $0x38] sm:$0xff] }
0x1235   : > { %2874 = vrcp.f32 %v1532_v5  ;;  %v1545_v12 = vand.u32 2147483648, %v1532_v5  ;;  %vm1539_vm7 = vweird.f32 %v1532_v5  ;;  %v1543_v23 = vand.u32 2147483647, %v1532_v5 }
0x1236   : > { %2876 = vrcp.f32 %v1533_v44  ;;  %v1560_v6 = vand.u32 2147483648, %v1533_v44  ;;  %vm1554_vm11 = vweird.f32 %v1533_v44  ;;  %v1558_v17 = vand.u32 2147483647, %v1533_v44 }
0x1237   : > { %v1546_v27 = vor.u32 1.1754944e-38, %v1545_v12  ;;  %vm1544_vm9 = vcmp.eq.f32.partialorder %v1543_v23, 8.507059e+37  ;;  %v2945_v23 = vld [vmem:[#allocation8 + $0x18] sm:$0xff] }
0x1238   : > { %v1561_v54 = vor.u32 1.1754944e-38, %v1560_v6  ;;  %vm1559_vm13 = vcmp.eq.f32.partialorder %v1558_v17, 8.507059e+37  ;;  %v2953_v6 = vld [vmem:[#allocation7 + $0x60] sm:$0xff]  ;;  %v1712_v17 = vpop.f32.mrf.mxu2 }
0x123b   : > { %v2875_v63 = vpop.eup %2874 }
0x123c   : > { %v1535_v38 = vmul.f32 %v2875_v63, %v1532_v5  ;;  %v2877_v16 = vpop.eup %2876  ;;  %vm1540_vm6 = vweird.f32 %v2875_v63  ;;  %v2939_v5 = vld [vmem:[#allocation8 + $0x60] sm:$0xff] }
0x123d   : > { %v1550_v19 = vmul.f32 %v2877_v16, %v1533_v44  ;;  %vm1541_vm8 = vmor %vm1539_vm7, %vm1540_vm6  ;;  %vm1555_vm10 = vweird.f32 %v2877_v16  ;;  %v2941_v44 = vld [vmem:[#allocation8 + $0x30] sm:$0xff] }
0x123e   : > { %v1536_v10 = vsub.f32 1.0, %v1535_v38  ;;  %vm1556_vm12 = vmor %vm1554_vm11, %vm1555_vm10  ;;  %v2943_v38 = vld [vmem:[#allocation8 + $0x20] sm:$0xff] }
0x123f   : > { %v1551_v13 = vsub.f32 1.0, %v1550_v19 }
0x1240   : > { %v1537_v18 = vmul.f32 %v2875_v63, %v1536_v10 }
0x1241   : > { %v1552_v40 = vmul.f32 %v2877_v16, %v1551_v13 }
0x1242   : > { %v1538_v25 = vadd.f32 %v2875_v63, %v1537_v18 }
0x1243   : > { %v1553_v8 = vadd.f32 %v2877_v16, %v1552_v40  ;;  %v2947_v40 = vld [vmem:[#allocation8 + $0x8] sm:$0xff] }
0x1244   : > { %v1542_v7 = vsel %vm1541_vm8, %v2875_v63, %v1538_v25  ;;  %v2942_v63 = vld [vmem:[#allocation8 + $0x28] sm:$0xff] }
0x1245   : > { %v1547_v35 = vsel %vm1544_vm9, %v1546_v27, %v1542_v7  ;;  %v1557_v50 = vsel %vm1556_vm12, %v2877_v16, %v1553_v8  ;;  %v2946_v7 = vld [vmem:[#allocation8 + $0x10] sm:$0xff]  ;;  %v2948_v27 = vld [vmem:[#allocation8] sm:$0xff]  ;;  %v2952_v8 = vld [vmem:[#allocation7 + $0x68] sm:$0xff] }
0x1246   : > { %v1562_v15 = vsel %vm1559_vm13, %v1561_v54, %v1557_v50  ;;  %v1566_v53 = vmul.f32 %v1547_v35, %v3765_v33 }
0x1247   : > { %v1567_v32 = vmul.f32 %v1562_v15, %v3760_v3 }
0x129c   : > { %v1571_v49 = vpop.permute.xlu1 %1570 }
0x129d   : > { %v1576_v55 = vmul.f32 %v1571_v49, %v1547_v35  ;;  %v3911_v49 = vld [vmem:[%s3422_s12 + $0x8] sm:$0xff] }
0x129f   : > { %1580 = vrot.lane.b32.xlu2 %v1576_v55, %s3235_s18  ;;  %v2951_v55 = vld [vmem:[#allocation7 + $0x70] sm:$0xff] }
0x12a4   : > { %v1573_v47 = vpop.permute.xlu0 %1572 }
0x12a5   : > { %v1577_v14 = vmul.f32 %v1573_v47, %v1562_v15 }
0x12a7   : > { %1582 = vrot.lane.b32.xlu1 %v1577_v14, %s3235_s18 }
0x12f9   : > { %v1581_v26 = vpop.permute.xlu2 %1580 }
0x12fa   : > { %v3878_v21 = vadd.f32 %v1581_v26, %v1566_v53  ;;  %v1715_v53 = vpop.f32.mrf.mxu2 }
0x12fc   : > { %2878 = vtanh.f32 %v3878_v21 }
0x1302   : > { %v2879_v29 = vpop.eup %2878 }
0x1303   : > { %1592 = vrot.lane.b32.xlu0 %v2879_v29, %s3234_s27 }
0x1319   : > { %v1583_v34 = vpop.permute.xlu1 %1582 }
0x131a   : > { %v3883_v36 = vadd.f32 %v1583_v34, %v1567_v32 }
0x131c   : > { %2880 = vtanh.f32 %v3883_v36 }
0x1322   : > { %v2881_v31 = vpop.eup %2880 }
0x1323   : > { %1594 = vrot.lane.b32.xlu2 %v2881_v31, %s3234_s27 }
0x1375   : > { %v1593_v56 = vpop.permute.xlu0 %1592 }
0x1376   : > { %v1598_v33 = vmul.f32 %v1593_v56, %v1547_v35  ;;  %v2950_v35 = vld [vmem:[#allocation7 + $0x78] sm:$0xff] }
0x1378   : > { %1602 = vrot.lane.b32.xlu1 %v1598_v33, %s3235_s18 }
0x137d   : > { %v1595_v61 = vpop.permute.xlu2 %1594 }
0x137e   : > { %v1599_v2 = vmul.f32 %v1595_v61, %v1562_v15 }
0x1380   : > { %1604 = vrot.lane.b32.xlu0 %v1599_v2, %s3235_s18 }
0x13ea   : > { %v1603_v62 = vpop.permute.xlu1 %1602 }
0x13eb   : > { %2656 = vmatmul.msk.f32.vlgmr.msra.gmra.mxu3 %vm415_vm0, %v1603_v62 }
0x13f2   : > { %v1605_v3 = vpop.permute.xlu0 %1604 }
0x13f3   : > { %2657 = vmatmul.msk.f32.gmra.mxu3 %vm415_vm0, %v1605_v3 }
0x146e   : > { %v1627_v41 = vpop.f32.mrf.mxu3 }
0x146f   : > { %v1628_v42 = vadd.f32 %v1627_v41, %v3586_v24 }
0x1471   : > { %v1633_v0 = vmax.f32 %v1628_v42, 0.0 }
0x1473   : > { %2658 = vmatmul.msk.f32.vlgmr.msrb.gmra.mxu0 %vm415_vm0, %v1633_v0 }
0x1474   : > { %1949 = vmatpush.msrb.mxu0 %v2936_v1 }
0x1476   : > { %v1630_v57 = vpop.f32.mrf.mxu3  ;;  %1950 = vmatpush.msrb.mxu0 %v2937_v58 }
0x1477   : > { %v1631_v59 = vadd.f32 %v1630_v57, %v3586_v24 }
0x1478   : > { %1951 = vmatpush.msrb.mxu0 %v2938_v60 }
0x1479   : > { %v1634_v4 = vmax.f32 %v1631_v59, 0.0 }
0x147a   : > { %1952 = vmatpush.msrb.mxu0 %v2939_v5 }
0x147b   : > { %2659 = vmatmul.msk.f32.gmra.mxu0 %vm415_vm0, %v1634_v4 }
0x1483   : > { %2666 = vmatmul.msk.f32.vlgmr.msra.gmra.mxu0 %vm415_vm0, %v3829_v9 }
0x1484   : > { %2143 = vmatpush.msra.mxu0 %v2940_v43 }
0x1486   : > { %2144 = vmatpush.msra.mxu0 %v2941_v44 }
0x1488   : > { %2145 = vmatpush.msra.mxu0 %v2942_v63 }
0x148a   : > { %2146 = vmatpush.msra.mxu0 %v2943_v38 }
0x148b   : > { %2667 = vmatmul.msk.f32.gmra.mxu0 %vm415_vm0, %v3833_v39  ;;  %v3906_v39 = vld [vmem:[%s3422_s12] sm:$0xff] }
0x1493   : > { %2676 = vmatmul.msk.f32.vlgmr.msrb.gmra.mxu0 %vm415_vm0, %v1603_v62 }
0x149b   : > { %2677 = vmatmul.msk.f32.gmra.mxu0 %vm415_vm0, %v1605_v3 }
0x14f0   : > { %v1658_v10 = vpop.f32.mrf.mxu0 }
0x14f1   : > { %v1659_v16 = vadd.f32 %v1658_v10, %v3639_v46 }
0x14f3   : > { %v1664_v9 = vmax.f32 %v1659_v16, 0.0 }
0x14f5   : > { %2660 = vmatmul.msk.f32.vlgmr.msrb.gmra.mxu1 %vm415_vm0, %v1664_v9 }
0x14f8   : > { %v1661_v18 = vpop.f32.mrf.mxu0 }
0x14f9   : > { %v1662_v19 = vadd.f32 %v1661_v18, %v3639_v46 }
0x14fb   : > { %v1665_v25 = vmax.f32 %v1662_v19, 0.0 }
0x14fd   : > { %2661 = vmatmul.msk.f32.gmra.mxu1 %vm415_vm0, %v1665_v25 }
0x1500   : > { %v1758_v50 = vpop.f32.mrf.mxu0 }
0x1508   : > { %v1761_v32 = vpop.f32.mrf.mxu0 }
0x1572   : > { %v1689_v13 = vpop.f32.mrf.mxu1 }
0x157a   : > { %v1692_v12 = vpop.f32.mrf.mxu1 }
0x157b   : > { %1732 = vmatpush.msrb.mxu3 %v1692_v12 }
0x157d   : > { %1733 = vmatpush.msrb.mxu3 %v1689_v13 }
0x157e   : > { %2664 = vmatmul.msk.f32.vlgmr.msrb.gmra.mxu3 %vm382_vm1, %v3906_v39 }
0x157f   : > { %1926 = vmatpush.msra.mxu3 %v2945_v23 }
0x1581   : > { %1927 = vmatpush.msra.mxu3 %v2946_v7 }
0x1583   : > { %1928 = vmatpush.msra.mxu3 %v2947_v40 }
0x1585   : > { %1929 = vmatpush.msra.mxu3 %v2948_v27 }
0x1586   : > { %2665 = vmatmul.msk.f32.gmra.mxu3 %vm382_vm1, %v3911_v49 }
0x1587   : > { %2112 = vmatpush.msrb.mxu3 %v2950_v35 }
0x1589   : > { %2113 = vmatpush.msrb.mxu3 %v2951_v55 }
0x158b   : > { %2114 = vmatpush.msrb.mxu3 %v2952_v8 }
0x158d   : > { %2115 = vmatpush.msrb.mxu3 %v2953_v6 }
0x1601   : > { %v1735_v54 = vpop.f32.mrf.mxu3 }
0x1602   : > { %v1736_v47 = vadd.f32 %v1735_v54, %v1712_v17 }
0x1604   : > { %v1764_v15 = vadd.f32 %v1758_v50, %v1736_v47 }
0x1606   : > { %v1766_v14 = vadd.f32 %v1764_v15, %v4083_v48 }
0x1608   : > { %2882 = vtanh.f32 %v1766_v14  ;;  %v2668_v61 = vmul.f32 -1.442695, %v1766_v14 }
0x1609   : > { %v1738_v26 = vpop.f32.mrf.mxu3 }
0x160a   : > { %v1739_v29 = vadd.f32 %v1738_v26, %v1715_v53 }
0x160c   : > { %v1765_v34 = vadd.f32 %v1761_v32, %v1739_v29 }
0x160e   : > { %v2883_v31 = vpop.eup %2882  ;;  %v1767_v56 = vadd.f32 %v1765_v34, %v4084_v51 }
0x160f   : > { %1812 = vrot.lane.b32.xlu2 %v2883_v31, %s3234_s27 }
0x1610   : > { %2884 = vtanh.f32 %v1767_v56  ;;  %v2669_v0 = vmul.f32 -1.442695, %v1767_v56 }
0x1611   : > { %2886 = vpow2.f32 %v2668_v61 }
0x1616   : > { %v2885_v33 = vpop.eup %2884 }
0x1617   : > { %1814 = vrot.lane.b32.xlu1 %v2885_v33, %s3234_s27  ;;  %v2887_v2 = vpop.eup %2886 }
0x1618   : > { %v1774_v62 = vadd.f32 1.0, %v2887_v2 }
0x161a   : > { %2888 = vrcp.f32 %v1774_v62  ;;  %v1787_v58 = vand.u32 2147483648, %v1774_v62  ;;  %vm1781_vm15 = vweird.f32 %v1774_v62  ;;  %v1785_v59 = vand.u32 2147483647, %v1774_v62 }
0x161b   : > { %2890 = vpow2.f32 %v2669_v0  ;;  %v2957_v0 = vld [vmem:[#allocation8 + $0x80] sm:$0xff] }
0x161c   : > { %v1788_v5 = vor.u32 1.1754944e-38, %v1787_v58  ;;  %vm1786_vm3 = vcmp.eq.f32.partialorder %v1785_v59, 8.507059e+37 }
0x1620   : > { %v2889_v3 = vpop.eup %2888 }
0x1621   : > { %v1777_v41 = vmul.f32 %v2889_v3, %v1774_v62  ;;  %vm1782_vm14 = vweird.f32 %v2889_v3  ;;  %v2891_v60 = vpop.eup %2890 }
0x1622   : > { %vm1783_vm2 = vmor %vm1781_vm15, %vm1782_vm14  ;;  %v1775_v43 = vadd.f32 1.0, %v2891_v60  ;;  %v2958_v60 = vld [vmem:[#allocation8 + $0x58] sm:$0xff] }
0x1623   : > { %v1778_v42 = vsub.f32 1.0, %v1777_v41  ;;  %v2955_v41 = vld [vmem:[#allocation8 + $0x90] sm:$0xff] }
0x1624   : > { %2892 = vrcp.f32 %v1775_v43  ;;  %v1802_v25 = vand.u32 2147483648, %v1775_v43  ;;  %vm1796_vm5 = vweird.f32 %v1775_v43  ;;  %v1800_v13 = vand.u32 2147483647, %v1775_v43 }
0x1625   : > { %v1779_v1 = vmul.f32 %v2889_v3, %v1778_v42  ;;  %v2956_v42 = vld [vmem:[#allocation8 + $0x88] sm:$0xff] }
0x1626   : > { %v1803_v23 = vor.u32 1.1754944e-38, %v1802_v25  ;;  %vm1801_vm7 = vcmp.eq.f32.partialorder %v1800_v13, 8.507059e+37 }
0x1627   : > { %v1780_v57 = vadd.f32 %v2889_v3, %v1779_v1 }
0x1629   : > { %v1784_v4 = vsel %vm1783_vm2, %v2889_v3, %v1780_v57  ;;  %v2954_v3 = vld [vmem:[#allocation8 + $0x98] sm:$0xff] }
0x162a   : > { %v1789_v63 = vsel %vm1786_vm3, %v1788_v5, %v1784_v4  ;;  %v2893_v10 = vpop.eup %2892  ;;  %v2959_v4 = vld [vmem:[#allocation8 + $0x50] sm:$0xff]  ;;  %v2960_v5 = vld [vmem:[#allocation8 + $0x48] sm:$0xff] }
0x162b   : > { %v1792_v16 = vmul.f32 %v2893_v10, %v1775_v43  ;;  %vm1797_vm4 = vweird.f32 %v2893_v10  ;;  %v1808_v35 = vmul.f32 %v1789_v63, %v3823_v37  ;;  %v2961_v43 = vld [vmem:[#allocation8 + $0x40] sm:$0xff] }
0x162c   : > { %vm1798_vm6 = vmor %vm1796_vm5, %vm1797_vm4 }
0x162d   : > { %v1793_v9 = vsub.f32 1.0, %v1792_v16 }
0x162f   : > { %v1794_v18 = vmul.f32 %v2893_v10, %v1793_v9 }
0x1631   : > { %v1795_v19 = vadd.f32 %v2893_v10, %v1794_v18 }
0x1633   : > { %v1799_v12 = vsel %vm1798_vm6, %v2893_v10, %v1795_v19 }
0x1634   : > { %v1804_v40 = vsel %vm1801_vm7, %v1803_v23, %v1799_v12 }
0x1635   : > { %v1809_v6 = vmul.f32 %v1804_v40, %v3818_v20 }
0x1669   : > { %v1813_v44 = vpop.permute.xlu2 %1812 }
0x166a   : > { %v1818_v38 = vmul.f32 %v1813_v44, %v1789_v63 }
0x166c   : > { %1822 = vrot.lane.b32.xlu0 %v1818_v38, %s3235_s18 }
0x1689   : > { %v1815_v7 = vpop.permute.xlu1 %1814 }
0x168a   : > { %v1819_v27 = vmul.f32 %v1815_v7, %v1804_v40 }
0x168c   : > { %1824 = vrot.lane.b32.xlu2 %v1819_v27, %s3235_s18 }
0x16de   : > { %v1823_v55 = vpop.permute.xlu0 %1822 }
0x16df   : > { %v3922_v8 = vadd.f32 %v1823_v55, %v1808_v35 }
0x16e1   : > { %2894 = vtanh.f32 %v3922_v8 }
0x16e6   : > { %v1825_v17 = vpop.permute.xlu2 %1824 }
0x16e7   : > { %v2895_v50 = vpop.eup %2894  ;;  %v3926_v54 = vadd.f32 %v1825_v17, %v1809_v6 }
0x16e8   : > { %1834 = vrot.lane.b32.xlu1 %v2895_v50, %s3234_s27 }
0x16e9   : > { %2896 = vtanh.f32 %v3926_v54 }
0x16ef   : > { %v2897_v47 = vpop.eup %2896 }
0x16f0   : > { %1836 = vrot.lane.b32.xlu0 %v2897_v47, %s3234_s27 }
0x175a   : > { %v1835_v15 = vpop.permute.xlu1 %1834 }
0x175b   : > { %v1840_v37 = vmul.f32 %v1835_v15, %v1789_v63 }
0x175d   : > { %1844 = vrot.lane.b32.xlu2 %v1840_v37, %s3235_s18 }
0x1762   : > { %v1837_v14 = vpop.permute.xlu0 %1836 }
0x1763   : > { %v1841_v53 = vmul.f32 %v1837_v14, %v1804_v40 }
0x1765   : > { %1846 = vrot.lane.b32.xlu1 %v1841_v53, %s3235_s18 }
0x17b7   : > { %v3933_v20 = vpop.permute.xlu2 %1844 }
0x17b8   : > { %2670 = vmatmul.msk.f32.vlgmr.msra.gmra.mxu1 %vm415_vm0, %v3933_v20 }
0x17d7   : > { %v3937_v26 = vpop.permute.xlu1 %1846 }
0x17d8   : > { %2671 = vmatmul.msk.f32.gmra.mxu1 %vm415_vm0, %v3937_v26 }
0x1835   : > { %v1869_v29 = vpop.f32.mrf.mxu1 }
0x1836   : > { %v1870_v32 = vadd.f32 %v1869_v29, %v3484_v11 }
0x1838   : > { %v1875_v34 = vmax.f32 %v1870_v32, 0.0 }
0x183a   : > { %2672 = vmatmul.msk.f32.vlgmr.msra.gmra.mxu2 %vm415_vm0, %v1875_v34 }
0x1855   : > { %v1872_v31 = vpop.f32.mrf.mxu1 }
0x1856   : > { %v1873_v56 = vadd.f32 %v1872_v31, %v3484_v11 }
0x1858   : > { %v1876_v33 = vmax.f32 %v1873_v56, 0.0 }
0x185a   : > { %2673 = vmatmul.msk.f32.gmra.mxu2 %vm415_vm0, %v1876_v33 }
0x18bd   : > { %v1900_v61 = vpop.f32.mrf.mxu2 }
0x18be   : > { %v1901_v2 = vadd.f32 %v1900_v61, %v3503_v22 }
0x18c0   : > { %v1906_v62 = vmax.f32 %v1901_v2, 0.0 }
0x18c2   : > { %2674 = vmatmul.msk.f32.vlgmr.msra.gmra.mxu3 %vm415_vm0, %v1906_v62 }
0x18c3   : > { %2212 = vmatpush.msra.mxu3 %v2954_v3 }
0x18c5   : > { %2213 = vmatpush.msra.mxu3 %v2955_v41 }
0x18c7   : > { %2214 = vmatpush.msra.mxu3 %v2956_v42 }
0x18c9   : > { %2215 = vmatpush.msra.mxu3 %v2957_v0 }
0x18dd   : > { %v1903_v1 = vpop.f32.mrf.mxu2 }
0x18de   : > { %v1904_v11 = vadd.f32 %v1903_v1, %v3503_v22  ;;  %v1954_v22 = vpop.f32.mrf.mxu0 }
0x18e0   : > { %v1907_v57 = vmax.f32 %v1904_v11, 0.0 }
0x18e2   : > { %2675 = vmatmul.msk.f32.gmra.mxu3 %vm415_vm0, %v1907_v57 }
0x18e6   : > { %v1957_v38 = vpop.f32.mrf.mxu0 }
0x1945   : > { %v1931_v58 = vpop.f32.mrf.mxu3 }
0x1965   : > { %v1934_v59 = vpop.f32.mrf.mxu3 }
0x1966   : > { %1974 = vmatpush.msrb.mxu1 %v1934_v59 }
0x1968   : > { %1975 = vmatpush.msrb.mxu1 %v1931_v58 }
0x1969   : > { %2678 = vmatmul.msk.f32.vlgmr.msrb.gmra.mxu1 %vm382_vm1, %v3850_v30 }
0x196a   : > { %2166 = vmatpush.msra.mxu1 %v2958_v60 }
0x196c   : > { %2167 = vmatpush.msra.mxu1 %v2959_v4 }
0x196e   : > { %2168 = vmatpush.msra.mxu1 %v2960_v5 }
0x1970   : > { %2169 = vmatpush.msra.mxu1 %v2961_v43 }
0x1971   : > { %2679 = vmatmul.msk.f32.gmra.mxu1 %vm382_vm1, %v3859_v28 }
0x1979   : > { %2688 = vmatmul.msk.f32.vlgmr.msra.gmra.mxu1 %vm415_vm0, %v3937_v26 }
0x1981   : > { %2689 = vmatmul.msk.f32.gmra.mxu1 %vm415_vm0, %v3933_v20 }
0x19e6   : > { %v1977_v44 = vpop.f32.mrf.mxu1 }
0x19e7   : > { %v1978_v30 = vadd.f32 %v1977_v44, %v1954_v22 }
0x19e9   : > { %v1983_v63 = vadd.f32 %v1978_v30, %v3539_v45 }
0x19eb   : > { %2898 = vtanh.f32 %v1983_v63  ;;  %v2680_v12 = vmul.f32 -1.442695, %v1983_v63 }
0x19ee   : > { %v1980_v10 = vpop.f32.mrf.mxu1 }
0x19ef   : > { %v1981_v16 = vadd.f32 %v1980_v10, %v1957_v38 }
0x19f1   : > { %v2899_v9 = vpop.eup %2898  ;;  %v1984_v18 = vadd.f32 %v1981_v16, %v3542_v52 }
0x19f2   : > { %2029 = vrot.lane.b32.xlu0 %v2899_v9, %s3234_s27 }
0x19f3   : > { %2900 = vtanh.f32 %v1984_v18  ;;  %v2681_v19 = vmul.f32 -1.442695, %v1984_v18 }
0x19f5   : > { %2902 = vpow2.f32 %v2681_v19 }
0x19f9   : > { %v2901_v28 = vpop.eup %2900 }
0x19fa   : > { %2031 = vrot.lane.b32.xlu2 %v2901_v28, %s3234_s27 }
0x19fb   : > { %v2903_v25 = vpop.eup %2902 }
0x19fc   : > { %v1992_v13 = vadd.f32 1.0, %v2903_v25 }
0x19fe   : > { %2904 = vrcp.f32 %v1992_v13  ;;  %v2019_v6 = vand.u32 2147483648, %v1992_v13  ;;  %vm2013_vm9 = vweird.f32 %v1992_v13  ;;  %v2017_v17 = vand.u32 2147483647, %v1992_v13 }
0x19ff   : > { %2906 = vpow2.f32 %v2680_v12 }
0x1a00   : > { %v2020_v15 = vor.u32 1.1754944e-38, %v2019_v6  ;;  %vm2018_vm11 = vcmp.eq.f32.partialorder %v2017_v17, 8.507059e+37 }
0x1a04   : > { %v2905_v45 = vpop.eup %2904 }
0x1a05   : > { %v2907_v23 = vpop.eup %2906  ;;  %v2009_v7 = vmul.f32 %v2905_v45, %v1992_v13  ;;  %vm2014_vm8 = vweird.f32 %v2905_v45 }
0x1a06   : > { %v1991_v40 = vadd.f32 1.0, %v2907_v23  ;;  %vm2015_vm10 = vmor %vm2013_vm9, %vm2014_vm8 }
0x1a07   : > { %v2010_v27 = vsub.f32 1.0, %v2009_v7 }
0x1a08   : > { %2908 = vrcp.f32 %v1991_v40  ;;  %v2004_v31 = vand.u32 2147483648, %v1991_v40  ;;  %vm1998_vm13 = vweird.f32 %v1991_v40  ;;  %v2002_v56 = vand.u32 2147483647, %v1991_v40 }
0x1a09   : > { %v2011_v52 = vmul.f32 %v2905_v45, %v2010_v27 }
0x1a0a   : > { %v2005_v61 = vor.u32 1.1754944e-38, %v2004_v31  ;;  %vm2003_vm15 = vcmp.eq.f32.partialorder %v2002_v56, 8.507059e+37 }
0x1a0b   : > { %v2012_v35 = vadd.f32 %v2905_v45, %v2011_v52 }
0x1a0d   : > { %v2016_v50 = vsel %vm2015_vm10, %v2905_v45, %v2012_v35 }
0x1a0e   : > { %v2909_v55 = vpop.eup %2908  ;;  %v2021_v14 = vsel %vm2018_vm11, %v2020_v15, %v2016_v50 }
0x1a0f   : > { %v1994_v47 = vmul.f32 %v2909_v55, %v1991_v40  ;;  %vm1999_vm12 = vweird.f32 %v2909_v55  ;;  %v2026_v41 = vmul.f32 %v2021_v14, %v3883_v36 }
0x1a10   : > { %vm2000_vm14 = vmor %vm1998_vm13, %vm1999_vm12 }
0x1a11   : > { %v1995_v29 = vsub.f32 1.0, %v1994_v47 }
0x1a13   : > { %v1996_v32 = vmul.f32 %v2909_v55, %v1995_v29 }
0x1a15   : > { %v1997_v34 = vadd.f32 %v2909_v55, %v1996_v32 }
0x1a17   : > { %v2001_v33 = vsel %vm2000_vm14, %v2909_v55, %v1997_v34 }
0x1a18   : > { %v2006_v62 = vsel %vm2003_vm15, %v2005_v61, %v2001_v33 }
0x1a19   : > { %v2025_v11 = vmul.f32 %v2006_v62, %v3878_v21 }
0x1a54   : > { %v2032_v37 = vpop.permute.xlu2 %2031 }
0x1a55   : > { %v2036_v53 = vmul.f32 %v2032_v37, %v2021_v14 }
0x1a57   : > { %2041 = vrot.lane.b32.xlu0 %v2036_v53, %s3235_s18 }
0x1a64   : > { %v2030_v2 = vpop.permute.xlu0 %2029 }
0x1a65   : > { %v2035_v3 = vmul.f32 %v2030_v2, %v2006_v62 }
0x1a67   : > { %2039 = vrot.lane.b32.xlu1 %v2035_v3, %s3235_s18 }
0x1ac9   : > { %v2042_v42 = vpop.permute.xlu0 %2041 }
0x1aca   : > { %v2046_v0 = vadd.f32 %v2042_v42, %v2026_v41 }
0x1acc   : > { %2910 = vtanh.f32 %v2046_v0 }
0x1ad2   : > { %v2911_v1 = vpop.eup %2910 }
0x1ad3   : > { %2053 = vrot.lane.b32.xlu1 %v2911_v1, %s3234_s27 }
0x1ad9   : > { %v2040_v57 = vpop.permute.xlu1 %2039 }
0x1ada   : > { %v2045_v58 = vadd.f32 %v2040_v57, %v2025_v11 }
0x1adc   : > { %2912 = vtanh.f32 %v2045_v58 }
0x1ae2   : > { %v2913_v59 = vpop.eup %2912 }
0x1ae3   : > { %2051 = vrot.lane.b32.xlu2 %v2913_v59, %s3234_s27 }
0x1b3d   : > { %v2052_v60 = vpop.permute.xlu2 %2051 }
0x1b3e   : > { %v2057_v4 = vmul.f32 %v2052_v60, %v2006_v62 }
0x1b40   : > { %2061 = vrot.lane.b32.xlu0 %v2057_v4, %s3235_s18 }
0x1b45   : > { %v2054_v5 = vpop.permute.xlu1 %2053 }
0x1b46   : > { %v2058_v36 = vmul.f32 %v2054_v5, %v2021_v14 }
0x1b48   : > { %2063 = vrot.lane.b32.xlu2 %v2058_v36, %s3235_s18 }
0x1ba2   : > { %v2064_v22 = vpop.permute.xlu2 %2063 }
0x1bb2   : > { %v2062_v43 = vpop.permute.xlu0 %2061 }
0x1bb3   : > { %2682 = vmatmul.msk.f32.vlgmr.msrb.gmra.mxu2 %vm415_vm0, %v2062_v43 }
0x1bbb   : > { %2683 = vmatmul.msk.f32.gmra.mxu2 %vm415_vm0, %v2064_v22 }
0x1c36   : > { %v2086_v21 = vpop.f32.mrf.mxu2 }
0x1c37   : > { %v2087_v44 = vadd.f32 %v2086_v21, %v3586_v24 }
0x1c39   : > { %v2092_v30 = vmax.f32 %v2087_v44, 0.0 }
0x1c3b   : > { %2684 = vmatmul.msk.f32.vlgmr.msrb.gmra.mxu3 %vm415_vm0, %v2092_v30 }
0x1c3e   : > { %v2089_v63 = vpop.f32.mrf.mxu2 }
0x1c3f   : > { %v2090_v38 = vadd.f32 %v2089_v63, %v3586_v24 }
0x1c41   : > { %v2093_v10 = vmax.f32 %v2090_v38, 0.0  ;;  %v2305_v38 = vld [vmem:[#allocation7 + $0x98] sm:$0xff] }
0x1c42   : > { %2353 = vmatpush.msrb.mxu1 %v2305_v38 }
0x1c43   : > { %2685 = vmatmul.msk.f32.gmra.mxu3 %vm415_vm0, %v2093_v10  ;;  %v2304_v10 = vld [vmem:[#allocation7 + $0x90] sm:$0xff] }
0x1c44   : > { %2354 = vmatpush.msrb.mxu1 %v2304_v10 }
0x1c4b   : > { %2692 = vmatmul.msk.f32.vlgmr.msra.gmra.mxu3 %vm415_vm0, %v3933_v20  ;;  %v2171_v20 = vpop.f32.mrf.mxu1 }
0x1c53   : > { %2693 = vmatmul.msk.f32.gmra.mxu3 %vm415_vm0, %v3937_v26  ;;  %v2174_v7 = vpop.f32.mrf.mxu1 }
0x1cbe   : > { %v2117_v16 = vpop.f32.mrf.mxu3 }
0x1cbf   : > { %v2118_v9 = vadd.f32 %v2117_v16, %v3639_v46  ;;  %v2303_v16 = vld [vmem:[#allocation7 + $0x88] sm:$0xff] }
0x1cc0   : > { %2355 = vmatpush.msrb.mxu1 %v2303_v16 }
0x1cc1   : > { %v2123_v18 = vmax.f32 %v2118_v9, 0.0 }
0x1cc3   : > { %2686 = vmatmul.msk.f32.vlgmr.msra.gmra.mxu0 %vm415_vm0, %v2123_v18 }
0x1cc6   : > { %v2120_v28 = vpop.f32.mrf.mxu3 }
0x1cc7   : > { %v2121_v19 = vadd.f32 %v2120_v28, %v3639_v46 }
0x1cc9   : > { %v2124_v25 = vmax.f32 %v2121_v19, 0.0  ;;  %v2310_v19 = vld [vmem:[#allocation7 + $0xb8] sm:$0xff] }
0x1cca   : > { %2328 = vmatpush.msrb.mxu0 %v2310_v19 }
0x1ccb   : > { %2687 = vmatmul.msk.f32.gmra.mxu0 %vm415_vm0, %v2124_v25  ;;  %v2309_v25 = vld [vmem:[#allocation7 + $0xb0] sm:$0xff] }
0x1ccc   : > { %2329 = vmatpush.msrb.mxu0 %v2309_v25 }
0x1cce   : > { %v2217_v26 = vpop.f32.mrf.mxu3 }
0x1cd6   : > { %v2220_v52 = vpop.f32.mrf.mxu3 }
0x1d40   : > { %v2148_v24 = vpop.f32.mrf.mxu0 }
0x1d48   : > { %v2151_v13 = vpop.f32.mrf.mxu0 }
0x1d49   : > { %2191 = vmatpush.msra.mxu2 %v2151_v13  ;;  %v2307_v13 = vld [vmem:[#allocation7 + $0xa0] sm:$0xff] }
0x1d4b   : > { %2192 = vmatpush.msra.mxu2 %v2148_v24  ;;  %v2308_v24 = vld [vmem:[#allocation7 + $0xa8] sm:$0xff] }
0x1d4c   : > { %2690 = vmatmul.msk.f32.vlgmr.msra.gmra.mxu2 %vm382_vm1, %v3906_v39  ;;  %2330 = vmatpush.msrb.mxu0 %v2308_v24 }
0x1d4e   : > { %2331 = vmatpush.msrb.mxu0 %v2307_v13 }
0x1d54   : > { %2691 = vmatmul.msk.f32.gmra.mxu2 %vm382_vm1, %v3911_v49 }
0x1dcf   : > { %v2194_v12 = vpop.f32.mrf.mxu2 }
0x1dd0   : > { %v2195_v45 = vadd.f32 %v2194_v12, %v2171_v20  ;;  %v2368_v12 = vld [vmem:[#allocation7 + $0xd8] sm:$0xff] }
0x1dd1   : > { %2385 = vmatpush.msrb.mxu2 %v2368_v12 }
0x1dd2   : > { %v2223_v23 = vadd.f32 %v2217_v26, %v2195_v45  ;;  %v2367_v45 = vld [vmem:[#allocation7 + $0xd0] sm:$0xff] }
0x1dd3   : > { %2386 = vmatpush.msrb.mxu2 %v2367_v45 }
0x1dd4   : > { %v2225_v46 = vadd.f32 %v2223_v23, %v4083_v48  ;;  %v2366_v23 = vld [vmem:[#allocation7 + $0xc8] sm:$0xff] }
0x1dd5   : > { %2387 = vmatpush.msrb.mxu2 %v2366_v23 }
0x1dd6   : > { %2914 = vtanh.f32 %v2225_v46  ;;  %v2694_v49 = vmul.f32 -1.442695, %v2225_v46  ;;  %v2365_v46 = vld [vmem:[#allocation7 + $0xc0] sm:$0xff] }
0x1dd7   : > { %v2197_v40 = vpop.f32.mrf.mxu2  ;;  %2388 = vmatpush.msrb.mxu2 %v2365_v46 }
0x1dd8   : > { %v2198_v27 = vadd.f32 %v2197_v40, %v2174_v7  ;;  %v2398_v7 = vld [vmem:[#allocation8 + $0xb8] sm:$0xff]  ;;  %v2962_v40 = vld [vmem:[#allocation10] sm:$0xff] }
0x1dd9   : > { %2415 = vmatpush.msrb.mxu3 %v2398_v7 }
0x1dda   : > { %v2224_v35 = vadd.f32 %v2220_v52, %v2198_v27  ;;  %v2361_v27 = vperm.slane %v2962_v40, 6 }
0x1ddc   : > { %v2915_v55 = vpop.eup %2914  ;;  %v2226_v6 = vadd.f32 %v2224_v35, %v4084_v51 }
0x1ddd   : > { %2271 = vrot.lane.b32.xlu1 %v2915_v55, %s3234_s27 }
0x1dde   : > { %2916 = vtanh.f32 %v2226_v6  ;;  %v2695_v17 = vmul.f32 -1.442695, %v2226_v6 }
0x1ddf   : > { %2918 = vpow2.f32 %v2694_v49  ;;  %v2397_v49 = vld [vmem:[#allocation8 + $0xb0] sm:$0xff] }
0x1de0   : > { %2920 = vpow2.f32 %v2695_v17  ;;  %2416 = vmatpush.msrb.mxu3 %v2397_v49  ;;  %v2396_v17 = vld [vmem:[#allocation8 + $0xa8] sm:$0xff] }
0x1de2   : > { %2417 = vmatpush.msrb.mxu3 %v2396_v17 }
0x1de4   : > { %v2917_v39 = vpop.eup %2916 }
0x1de5   : > { %2273 = vrot.lane.b32.xlu0 %v2917_v39, %s3234_s27  ;;  %v2919_v50 = vpop.eup %2918 }
0x1de6   : > { %v2233_v48 = vadd.f32 1.0, %v2919_v50  ;;  %v2921_v47 = vpop.eup %2920  ;;  %v2395_v50 = vld [vmem:[#allocation8 + $0xa0] sm:$0xff] }
0x1de7   : > { %v2234_v15 = vadd.f32 1.0, %v2921_v47  ;;  %2418 = vmatpush.msrb.mxu3 %v2395_v50 }
0x1de8   : > { %2922 = vrcp.f32 %v2233_v48  ;;  %v2246_v56 = vand.u32 2147483648, %v2233_v48  ;;  %vm2240_vm2 = vweird.f32 %v2233_v48  ;;  %v2244_v33 = vand.u32 2147483647, %v2233_v48 }
0x1de9   : > { %2924 = vrcp.f32 %v2234_v15  ;;  %v2261_v1 = vand.u32 2147483648, %v2234_v15  ;;  %vm2255_vm6 = vweird.f32 %v2234_v15  ;;  %v2259_v11 = vand.u32 2147483647, %v2234_v15 }
0x1dea   : > { %v2247_v62 = vor.u32 1.1754944e-38, %v2246_v56  ;;  %vm2245_vm4 = vcmp.eq.f32.partialorder %v2244_v33, 8.507059e+37 }
0x1deb   : > { %v2262_v58 = vor.u32 1.1754944e-38, %v2261_v1  ;;  %vm2260_vm8 = vcmp.eq.f32.partialorder %v2259_v11, 8.507059e+37 }
0x1dee   : > { %v2923_v37 = vpop.eup %2922 }
0x1def   : > { %v2236_v14 = vmul.f32 %v2923_v37, %v2233_v48  ;;  %v2925_v51 = vpop.eup %2924  ;;  %vm2241_vm1 = vweird.f32 %v2923_v37  ;;  %v2369_v48 = vperm.slane %v2962_v40, 7 }
0x1df0   : > { %v2251_v32 = vmul.f32 %v2925_v51, %v2234_v15  ;;  %vm2242_vm3 = vmor %vm2240_vm2, %vm2241_vm1  ;;  %vm2256_vm5 = vweird.f32 %v2925_v51 }
0x1df1   : > { %v2237_v53 = vsub.f32 1.0, %v2236_v14  ;;  %vm2257_vm7 = vmor %vm2255_vm6, %vm2256_vm5  ;;  %v2963_v14 = vld [vmem:[#allocation11] sm:$0x1f] }
0x1df2   : > { %v2252_v31 = vsub.f32 1.0, %v2251_v32 }
0x1df3   : > { %v2238_v29 = vmul.f32 %v2923_v37, %v2237_v53  ;;  %v2399_v53 = vperm.slane %v2963_v14, 4 }
0x1df4   : > { %v2253_v2 = vmul.f32 %v2925_v51, %v2252_v31 }
0x1df5   : > { %v2239_v34 = vadd.f32 %v2923_v37, %v2238_v29 }
0x1df6   : > { %v2254_v0 = vadd.f32 %v2925_v51, %v2253_v2 }
0x1df7   : > { %v2243_v61 = vsel %vm2242_vm3, %v2923_v37, %v2239_v34 }
0x1df8   : > { %v2248_v41 = vsel %vm2245_vm4, %v2247_v62, %v2243_v61  ;;  %v2258_v57 = vsel %vm2257_vm7, %v2925_v51, %v2254_v0 }
0x1df9   : > { %v2263_v60 = vsel %vm2260_vm8, %v2262_v58, %v2258_v57  ;;  %v2267_v5 = vmul.f32 %v2248_v41, %v3922_v8  ;;  %v2302_v8 = vld [vmem:[#allocation7 + $0x80] sm:$0xff] }
0x1dfa   : > { %v2268_v21 = vmul.f32 %v2263_v60, %v3926_v54  ;;  %2356 = vmatpush.msrb.mxu1 %v2302_v8 }
0x1e4f   : > { %v2272_v3 = vpop.permute.xlu1 %2271 }
0x1e50   : > { %v2277_v42 = vmul.f32 %v2272_v3, %v2248_v41 }
0x1e52   : > { %2281 = vrot.lane.b32.xlu2 %v2277_v42, %s3235_s18 }
0x1e57   : > { %v2274_v59 = vpop.permute.xlu0 %2273 }
0x1e58   : > { %v2278_v4 = vmul.f32 %v2274_v59, %v2263_v60 }
0x1e5a   : > { %2283 = vrot.lane.b32.xlu1 %v2278_v4, %s3235_s18 }
0x1eac   : > { %v2282_v36 = vpop.permute.xlu2 %2281 }
0x1ead   : > { %v2287_v43 = vadd.f32 %v2282_v36, %v2267_v5 }
0x1eaf   : > { %2926 = vtanh.f32 %v2287_v43 }
0x1eb5   : > { %v2927_v22 = vpop.eup %2926 }
0x1eb6   : > { %2293 = vrot.lane.b32.xlu0 %v2927_v22, %s3234_s27 }
0x1ecc   : > { %v2284_v44 = vpop.permute.xlu1 %2283 }
0x1ecd   : > { %v2288_v30 = vadd.f32 %v2284_v44, %v2268_v21 }
0x1ecf   : > { %2928 = vtanh.f32 %v2288_v30 }
0x1ed5   : > { %v2929_v63 = vpop.eup %2928 }
0x1ed6   : > { %2295 = vrot.lane.b32.xlu2 %v2929_v63, %s3234_s27 }
0x1f28   : > { %v2294_v9 = vpop.permute.xlu0 %2293 }
0x1f29   : > { %v2299_v18 = vmul.f32 %v2294_v9, %v2248_v41 }
0x1f2b   : > { %2337 = vrot.lane.b32.xlu0 %v2299_v18, %s3235_s18 }
0x1f30   : > { %v2296_v28 = vpop.permute.xlu2 %2295 }
0x1f31   : > { %v2300_v54 = vmul.f32 %v2296_v28, %v2263_v60 }
0x1f33   : > { %2312 = vrot.lane.b32.xlu1 %v2300_v54, %s3235_s18 }
0x1f9d   : > { %v2338_v20 = vpop.permute.xlu0 %2337 }
0x1f9e   : > { %2697 = vmatmul.msk.f32.vlgmr.msrb.gmra.mxu1 %vm415_vm0, %v2338_v20 }
0x1fa5   : > { %v2313_v26 = vpop.permute.xlu1 %2312 }
0x1fa6   : > { %2696 = vmatmul.msk.f32.vlgmr.msrb.gmra.mxu0 %vm415_vm0, %v2313_v26 }
0x201b   : > { %v2358_v52 = vpop.f32.mrf.mxu1 }
0x2023   : > { %v2333_v35 = vpop.f32.mrf.mxu0 }
0x2024   : > { %v2359_v55 = vadd.f32 %v2358_v52, %v2333_v35 }
0x2026   : > { %v2362_v6 = vadd.f32 %v2361_v27, %v2359_v55 }
0x2028   : > { %v2363_v39 = vmax.f32 %v2362_v6, 0.0 }
0x202a   : > { %2698 = vmatmul.msk.f32.vlgmr.msrb.gmra.mxu2 %vm415_vm0, %v2363_v39 }
0x20ad   : > { %v2390_v47 = vpop.f32.mrf.mxu2 }
0x20ae   : > { %v2391_v15 = vadd.f32 %v2390_v47, %v2369_v48 }
0x20b0   : > { %v2393_v37 = vmax.f32 %v2391_v15, 0.0 }
0x20b2   : > { %2699 = vmatmul.msk.f32.vlgmr.msrb.gmra.mxu3 %vm415_vm0, %v2393_v37 }
0x2135   : > { %v2420_v51 = vpop.f32.mrf.mxu3 }
0x2136   : > { %v2421_v29 = vadd.f32 %v2420_v51, %v2399_v53 }
0x2138   : > { %2423 = vst [vmem:[%s375_s15] sm:$0xff] %v2421_v29 }
0x2139   : > { %3171 = shalt.err (!%p3168_p10)
}
0x213a   : > { %2726 = dma.vmem_to_hbm [thread:$0]  (%p3360_p0), %s2438_s4, 128, %s2440_s30, %s2425_s10  }
0x213b PF: > { %p2761_p11 = scmp.ge.s32.totalorder %s3226_s24, 2  ;;  %s2451_s11 = sand.u32 1, %s3214_s21  }
0x213c   : > { %s2452_s8 = scalar_lea.sflag [#allocation4], %s2451_s11 }
0x213d   : > { %p2749_p12 = pnand %p2761_p11, %p3306_p6 }
0x213f   : > { %p2750_p13 = pneg %p2749_p12 }
0x2141   : > { %3209 = dma.done.wait (%p2750_p13), %s2452_s8, 128  }
0x2142   : > { %3211 = vsyncadd (%p2750_p13), %s2452_s8, 4294967168  ;;  %p24_p3 = scmp.ge.s32.totalorder %s3350_s14, 6   ;;  %s4085_s21 = smov %s3218_s22 }
0x2143   : > { %s4086_s22 = smov %s3222_s23  ;;  %s4087_s23 = smov %s3366_s20 }
0x2144   : > { %s4088_s24 = smov %s3350_s14  ;;  %26 = sbr.rel (!%p24_p3) target bundleno = 15 (0xf), region = 129 }
0x2149   :  { %2458 = vsyncpa [#allocation3], 1 }
0x214a   :  { %2460 = vsyncpa [#allocation3 + $0x1], 1 }
0x214b   :  { %2461 = vsyncpa [#allocation6], 1 }
0x214c   :  { %2463 = vsyncpa [#allocation6 + $0x1], 1 }
0x214d   :  { %2464 = vsyncpa [#allocation9], 1 }
0x214e   :  { %2465 = vsyncpa [#allocation12], 1 }
0x214f   :  { %2466 = vsyncpa [#allocation4], 1 }
0x2150   :  { %2468 = vsyncpa [#allocation4 + $0x1], 1 }

</bundles_post_ra>
